<compile_context>
chip_gen: v7x
topology: tpu7x:2x2x1
jax: 0.10.0
libtpu: 0.0.40
codegen_flags: <defaults>
</compile_context>

<pallas_src>
import jax
import jax.numpy as jnp
from jax.experimental import pallas as pl
from jax.experimental.pallas import tpu as pltpu


def _round_up(x, m):
    return -(-x // m) * m


# ---------------------------------------------------------------------------
# Static weight packing (hoist this out of the per-call hot path).
# ---------------------------------------------------------------------------
def pack_weights(weights, biases):
    """Pack all (W_i, b_i) once into a single lane-padded f32 slab.

    Returns (slab, layout) with layout[name] = (row_offset, rows, cols).
    Built with pad + one concatenate; meant to be computed once per model.
    """
    pieces = []
    for i, (w, b) in enumerate(zip(weights, biases)):
        pieces.append((f"W{i}", jnp.asarray(w, jnp.float32)))
        pieces.append((f"b{i}", jnp.asarray(b, jnp.float32).reshape(1, -1)))

    layout = {}
    padded = []
    off = 0
    for name, arr in pieces:
        r, c = arr.shape
        assert c <= 128, "weight packing assumes every layer width <= 128"
        rp = _round_up(r, 8)
        layout[name] = (off, r, c)
        padded.append(jnp.pad(arr, ((0, rp - r), (0, 128 - c))))
        off += rp
    slab = jnp.concatenate(padded, axis=0)      # (W_ROWS, 128), W_ROWS % 8 == 0
    return slab, layout


# ---------------------------------------------------------------------------
# Per-call graph-data packing: one lane-band slab per graph, [F | X | P | M | 0].
# ---------------------------------------------------------------------------
def pack_graph_data(F_b, X_b, P_b, M_b):
    B, N, _ = F_b.shape
    in_feats = X_b.shape[-1]
    C = M_b.shape[-1]
    Np = _round_up(N, 8)

    F_p = jnp.pad(jnp.asarray(F_b, jnp.float32), ((0, 0), (0, Np - N), (0, Np - N)))
    X_p = jnp.pad(jnp.asarray(X_b, jnp.float32), ((0, 0), (0, Np - N), (0, 0)))
    P_p = jnp.pad(jnp.asarray(P_b, jnp.float32), ((0, 0), (0, Np - N), (0, Np - N)))
    M_p = jnp.pad(jnp.asarray(M_b, jnp.float32), ((0, 0), (0, Np - N), (0, 0)))

    used = 2 * Np + in_feats + C
    assert used <= 128, "lane-band packing assumes 2*N_pad + in_feats + C <= 128"
    pad = jnp.zeros((B, Np, 128 - used), jnp.float32)
    slab = jnp.concatenate([F_p, X_p, P_p, M_p, pad], axis=-1)   # (B, Np, 128)

    cols = {"F": 0, "X": Np, "P": Np + in_feats, "M": 2 * Np + in_feats}
    return slab, cols, Np


# ---------------------------------------------------------------------------
# Fused kernel: F_ @ X -> MLP (tanh..., sigmoid) -> pairwise distances ->
# new_force = dist * path_forces -> new_force @ members -> silhouette score.
# Processes GB graphs per grid step.
# ---------------------------------------------------------------------------
def make_kernel(w_layout, cols, n_layers, gb, n_real, n_pad, in_feats, c_clusters, h_last):
    F_off, X_off, P_off, M_off = cols["F"], cols["X"], cols["P"], cols["M"]

    def kernel(w_ref, data_ref, out_ref):
        data = data_ref[...]                                      # (GB, Np, 128)
        F = data[:, :, F_off:F_off + n_pad]                       # (GB, Np, Np)
        X = data[:, :, X_off:X_off + in_feats]                    # (GB, Np, in)
        P = data[:, :, P_off:P_off + n_pad]                       # (GB, Np, Np)
        M = data[:, :, M_off:M_off + c_clusters]                  # (GB, Np, C)

        # input_ = F_ @ X (per graph)
        h = jnp.einsum('bij,bjk->bik', F, X,
                       preferred_element_type=jnp.float32)        # (GB, Np, in)

        # MLP: stack all graphs along sublanes -> one matmul per layer (fills MXU rows)
        h2 = h.reshape(gb * n_pad, in_feats)
        for i in range(n_layers):
            wo, wr, wc = w_layout[f"W{i}"]
            bo, _, bc = w_layout[f"b{i}"]
            w = w_ref[wo:wo + wr, 0:wc]
            b = w_ref[bo:bo + 1, 0:bc]
            h2 = jnp.dot(h2, w, preferred_element_type=jnp.float32) + b
            if i < n_layers - 1:
                h2 = jnp.tanh(h2)
                # TODO(synk): nn.Dropout is stochastic in train mode; identity (eval) here.
            else:
                h2 = jax.nn.sigmoid(h2)
        h3 = h2.reshape(gb, n_pad, h_last)                        # (GB, Np, H)

        # pairwise Euclidean distances per graph via gram expansion, zero diagonal
        gram = jnp.einsum('bnh,bmh->bnm', h3, h3,
                          preferred_element_type=jnp.float32)     # (GB, Np, Np)
        row = jax.lax.broadcasted_iota(jnp.int32, (gb, n_pad, n_pad), 1)
        col = jax.lax.broadcasted_iota(jnp.int32, (gb, n_pad, n_pad), 2)
        eye = row == col
        sq_col = jnp.sum(h3 * h3, axis=-1, keepdims=True)         # (GB, Np, 1)
        sq_row = jnp.sum(jnp.where(eye, gram, 0.0), axis=-2, keepdims=True)  # (GB, 1, Np)
        d2 = jnp.maximum(sq_col + sq_row - 2.0 * gram, 0.0)
        dist = jnp.where(eye, 0.0, jnp.sqrt(d2))                  # (GB, Np, Np)
        # TODO(synk): f32 gram expansion can lose precision for near-duplicate rows
        # vs. the f64 PyTorch reference.

        new_force = dist * P
        fm = jnp.einsum('bnm,bmc->bnc', new_force, M,
                        preferred_element_type=jnp.float32)       # (GB, Np, C)

        # silhouette score (sklearn mean-silhouette semantics), fused in-kernel
        S = jnp.einsum('bnm,bmc->bnc', dist, M,
                       preferred_element_type=jnp.float32)        # (GB, Np, C)
        counts = jnp.sum(M, axis=-2, keepdims=True)               # (GB, 1, C)
        n_own = jnp.sum(M * counts, axis=-1, keepdims=True)       # (GB, Np, 1)
        intra = jnp.sum(S * M, axis=-1, keepdims=True)            # (GB, Np, 1)
        a_i = intra / jnp.maximum(n_own - 1.0, 1.0)
        mean_to = jnp.where(counts > 0.0, S / jnp.maximum(counts, 1.0), jnp.inf)
        b_i = jnp.min(jnp.where(M > 0.5, jnp.inf, mean_to), axis=-1, keepdims=True)
        s = (b_i - a_i) / jnp.maximum(jnp.maximum(a_i, b_i), 1e-12)
        s = jnp.where(n_own <= 1.0, 0.0, s)                       # singleton cluster -> 0
        s = jnp.where(b_i < jnp.inf, s, 0.0)                      # only one non-empty cluster
        # TODO(synk): sklearn raises when <2 non-empty clusters; we return 0 instead.
        si = jnp.sum(s, axis=-2, keepdims=True) * (1.0 / n_real)  # (GB, 1, 1)
        si_col = jnp.zeros((gb, n_pad, 1), jnp.float32) + si      # broadcast to rows

        # single full-lane-width store of the packed output tile
        pad = jnp.zeros((gb, n_pad, 128 - h_last - c_clusters - 1), jnp.float32)
        out_ref[...] = jnp.concatenate([h3, fm, si_col, pad], axis=-1)

    return kernel


# ---------------------------------------------------------------------------
# Batched wrapper: B graphs, GB graphs per grid step, weights VMEM-resident.
# ---------------------------------------------------------------------------
def contro_encod_forward_batched(w_slab, w_layout, n_layers,
                                 F_b, X_b, P_b, M_b, graphs_per_step=16):
    B, N, _ = F_b.shape
    in_feats = X_b.shape[-1]
    C = M_b.shape[-1]
    h_last = w_layout[f"W{n_layers - 1}"][2]
    assert h_last + C + 1 <= 128, "output packing assumes H_last + C + 1 <= 128"

    slab, cols, Np = pack_graph_data(F_b, X_b, P_b, M_b)

    gb = min(graphs_per_step, B)
    B_pad = _round_up(B, gb)
    if B_pad != B:
        slab = jnp.pad(slab, ((0, B_pad - B), (0, 0), (0, 0)))

    kernel = make_kernel(w_layout, cols, n_layers, gb, N, Np, in_feats, C, h_last)

    out = pl.pallas_call(
        kernel,
        out_shape=jax.ShapeDtypeStruct((B_pad, Np, 128), jnp.float32),
        grid=(B_pad // gb,),
        in_specs=[
            pl.BlockSpec(w_slab.shape, lambda g: (0, 0)),        # weights: resident block 0
            pl.BlockSpec((gb, Np, 128), lambda g: (g, 0, 0)),    # per-step graph chunk
        ],
        out_specs=pl.BlockSpec((gb, Np, 128), lambda g: (g, 0, 0)),
        compiler_params=pltpu.CompilerParams(
            dimension_semantics=("parallel",),                   # v7x: split chunks across 2 TCs
            vmem_limit_bytes=16 * 1024 * 1024,                   # explicit; safe on 64 MiB v7x
        ),
    )(w_slab, slab)

    new_features = out[:B, :N, :h_last]                          # (B, N, H)
    force_members = out[:B, :N, h_last:h_last + C]               # (B, N, C)
    si = out[:B, 0:1, h_last + C:h_last + C + 1]                 # (B, 1, 1)
    return new_features, si, force_members


def contro_encod_forward(F_, X, weights, biases, path_forces, members):
    """Single-graph forward matching ControEncodNet.forward semantics."""
    # NOTE: for repeated calls, call pack_weights() once and reuse the slab.
    w_slab, w_layout = pack_weights(weights, biases)
    nf, si, fm = contro_encod_forward_batched(
        w_slab, w_layout, len(weights),
        F_[None], X[None], path_forces[None], members[None], graphs_per_step=1)
    return nf[0], si[0], fm[0]


# ---------------------------------------------------------------------------
# Pure-JAX reference (f32) for a loose correctness check.
# ---------------------------------------------------------------------------
def reference_forward(F_b, X_b, weights, biases, P_b, M_b):
    h = jnp.einsum('bij,bjk->bik', F_b, X_b)
    n_layers = len(weights)
    for i in range(n_layers):
        h = jnp.einsum('bnk,kh->bnh', h, weights[i]) + biases[i]
        h = jnp.tanh(h) if i < n_layers - 1 else jax.nn.sigmoid(h)
    diff = h[:, :, None, :] - h[:, None, :, :]
    dist = jnp.sqrt(jnp.sum(diff * diff, axis=-1))
    eye = jnp.eye(h.shape[1], dtype=bool)[None]
    dist = jnp.where(eye, 0.0, dist)
    new_force = dist * P_b
    fm = jnp.einsum('bnm,bmc->bnc', new_force, M_b)
    S = jnp.einsum('bnm,bmc->bnc', dist, M_b)
    counts = jnp.sum(M_b, axis=-2, keepdims=True)
    n_own = jnp.sum(M_b * counts, axis=-1, keepdims=True)
    intra = jnp.sum(S * M_b, axis=-1, keepdims=True)
    a_i = intra / jnp.maximum(n_own - 1.0, 1.0)
    mean_to = jnp.where(counts > 0.0, S / jnp.maximum(counts, 1.0), jnp.inf)
    b_i = jnp.min(jnp.where(M_b > 0.5, jnp.inf, mean_to), axis=-1, keepdims=True)
    s = (b_i - a_i) / jnp.maximum(jnp.maximum(a_i, b_i), 1e-12)
    s = jnp.where(n_own <= 1.0, 0.0, s)
    s = jnp.where(b_i < jnp.inf, s, 0.0)
    si = jnp.mean(s, axis=-2, keepdims=True)
    return h, si, fm


if __name__ == "__main__":
    key = jax.random.PRNGKey(0)
    B, N, in_feats, C = 32, 8, 16, 3
    hidden_feats = [32, 16, 8]

    ks = jax.random.split(key, 16)
    F_b = jax.random.normal(ks[0], (B, N, N), jnp.float32)
    X_b = jax.random.normal(ks[1], (B, N, in_feats), jnp.float32)

    dims = [in_feats] + list(hidden_feats)
    weights, biases = [], []
    for i in range(len(hidden_feats)):
        weights.append(0.1 * jax.random.normal(ks[2 + 2 * i], (dims[i], dims[i + 1]), jnp.float32))
        biases.append(0.1 * jax.random.normal(ks[3 + 2 * i], (dims[i + 1],), jnp.float32))

    path_forces = jnp.abs(jax.random.normal(ks[10], (B, N, N), jnp.float32))
    labels = jax.random.randint(ks[11], (B, N), 0, C)
    members = jax.nn.one_hot(labels, C, dtype=jnp.float32)

    # Static weight packing, hoisted out of the per-call path.
    w_slab, w_layout = pack_weights(weights, biases)

    # Batched path: 32 graphs, 16 graphs per grid step.
    nf, si, fm = contro_encod_forward_batched(
        w_slab, w_layout, len(weights), F_b, X_b, path_forces, members,
        graphs_per_step=16)
    jax.block_until_ready((nf, si, fm))

    assert nf.shape == (B, N, hidden_feats[-1])
    assert si.shape == (B, 1, 1)
    assert fm.shape == (B, N, C)
    assert bool(jnp.all(jnp.isfinite(nf)))
    assert bool(jnp.all(jnp.isfinite(si)))
    assert bool(jnp.all(jnp.isfinite(fm)))

    # Loose correctness check against the pure-JAX f32 reference.
    nf_r, si_r, fm_r = reference_forward(F_b, X_b, weights, biases, path_forces, members)
    assert bool(jnp.allclose(nf, nf_r, rtol=2e-2, atol=2e-2))
    assert bool(jnp.allclose(fm, fm_r, rtol=2e-2, atol=2e-2))
    assert bool(jnp.allclose(si, si_r, rtol=2e-2, atol=2e-2))

    # Single-graph path (module-semantics parity: forward(F_, X) for one graph).
    nf1, si1, fm1 = contro_encod_forward(
        F_b[0], X_b[0], weights, biases, path_forces[0], members[0])
    jax.block_until_ready((nf1, si1, fm1))
    assert nf1.shape == (N, hidden_feats[-1])
    assert si1.shape == (1, 1)
    assert fm1.shape == (N, C)
    assert bool(jnp.allclose(nf1, nf[0], rtol=1e-4, atol=1e-5))
    assert bool(jnp.allclose(fm1, fm[0], rtol=1e-4, atol=1e-4))
    assert bool(jnp.allclose(si1, si[0], rtol=1e-4, atol=1e-4))

    print("KERNEL_OK")
</pallas_src>

<mosaic_0001>
module attributes {stable_mosaic.version = 11 : i64} {
  func.func @kernel(%arg0: i32, %arg1: memref<88x128xf32, #tpu.memory_space<vmem>>, %arg2: memref<16x8x128xf32, #tpu.memory_space<vmem>>, %arg3: memref<16x8x128xf32, #tpu.memory_space<vmem>>) attributes {dimension_semantics = [#tpu.dimension_semantics<parallel>], iteration_bounds = array<i64: 2>, scalar_prefetch = 0 : i64, scratch_operands = 0 : i64, tpu.core_type = #tpu.core_type<tc>, window_params = [{pipeline_mode = #tpu.pipeline_mode<synchronous>, transform_indices = @transform_0, window_bounds = array<i64: 88, 128>}, {transform_indices = @transform_1, window_bounds = array<i64: 16, 8, 128>}, {transform_indices = @transform_2, window_bounds = array<i64: 16, 8, 128>}]} {
    %c0 = arith.constant 0 : index
    %c0_0 = arith.constant 0 : index
    %c0_1 = arith.constant 0 : index
    %0 = vector.load %arg2[%c0, %c0_0, %c0_1] : memref<16x8x128xf32, #tpu.memory_space<vmem>>, vector<16x8x128xf32>
    %1 = vector.extract_strided_slice %0 {offsets = [0, 0, 0], sizes = [16, 8, 8], strides = [1, 1, 1]} : vector<16x8x128xf32> to vector<16x8x8xf32>
    %2 = vector.extract_strided_slice %0 {offsets = [0, 0, 8], sizes = [16, 8, 16], strides = [1, 1, 1]} : vector<16x8x128xf32> to vector<16x8x16xf32>
    %3 = vector.extract_strided_slice %0 {offsets = [0, 0, 24], sizes = [16, 8, 8], strides = [1, 1, 1]} : vector<16x8x128xf32> to vector<16x8x8xf32>
    %4 = vector.extract_strided_slice %0 {offsets = [0, 0, 32], sizes = [16, 8, 3], strides = [1, 1, 1]} : vector<16x8x128xf32> to vector<16x8x3xf32>
    "tpu.trace_start"() <{level = 10 : i32, message = "bij,bjk->bik"}> : () -> ()
    %cst = arith.constant dense<0.000000e+00> : vector<16x8x16xf32>
    %5 = tpu.matmul %1, %2, %cst {dimension_numbers = #tpu.dot_dimension_numbers<[2], [1], [1], [2], [0, 0, 0, 1, 1, 2], [0], [0]>} : vector<16x8x8xf32>, vector<16x8x16xf32>, vector<16x8x16xf32> -> vector<16x8x16xf32>
    "tpu.trace_stop"() : () -> ()
    %6 = vector.shape_cast %5 : vector<16x8x16xf32> to vector<128x16xf32>
    %c0_2 = arith.constant 0 : index
    %c0_3 = arith.constant 0 : index
    %7 = vector.load %arg1[%c0_2, %c0_3] : memref<88x128xf32, #tpu.memory_space<vmem>>, vector<16x32xf32>
    %c16 = arith.constant 16 : index
    %c0_4 = arith.constant 0 : index
    %8 = vector.load %arg1[%c16, %c0_4] : memref<88x128xf32, #tpu.memory_space<vmem>>, vector<1x32xf32>
    %cst_5 = arith.constant dense<0.000000e+00> : vector<128x32xf32>
    %9 = tpu.matmul %6, %7, %cst_5 {dimension_numbers = #tpu.dot_dimension_numbers<[1], [0], [0], [1], [0, 0, 1, 1], [], []>} : vector<128x16xf32>, vector<16x32xf32>, vector<128x32xf32> -> vector<128x32xf32>
    %10 = vector.broadcast %8 : vector<1x32xf32> to vector<128x32xf32>
    %11 = arith.addf %9, %10 : vector<128x32xf32>
    %12 = math.tanh %11 : vector<128x32xf32>
    %c24 = arith.constant 24 : index
    %c0_6 = arith.constant 0 : index
    %13 = vector.load %arg1[%c24, %c0_6] : memref<88x128xf32, #tpu.memory_space<vmem>>, vector<32x16xf32>
    %c56 = arith.constant 56 : index
    %c0_7 = arith.constant 0 : index
    %14 = vector.load %arg1[%c56, %c0_7] : memref<88x128xf32, #tpu.memory_space<vmem>>, vector<1x16xf32>
    %cst_8 = arith.constant dense<0.000000e+00> : vector<128x16xf32>
    %15 = tpu.matmul %12, %13, %cst_8 {dimension_numbers = #tpu.dot_dimension_numbers<[1], [0], [0], [1], [0, 0, 1, 1], [], []>} : vector<128x32xf32>, vector<32x16xf32>, vector<128x16xf32> -> vector<128x16xf32>
    %16 = vector.broadcast %14 : vector<1x16xf32> to vector<128x16xf32>
    %17 = arith.addf %15, %16 : vector<128x16xf32>
    %18 = math.tanh %17 : vector<128x16xf32>
    %c64 = arith.constant 64 : index
    %c0_9 = arith.constant 0 : index
    %19 = vector.load %arg1[%c64, %c0_9] : memref<88x128xf32, #tpu.memory_space<vmem>>, vector<16x8xf32>
    %c80 = arith.constant 80 : index
    %c0_10 = arith.constant 0 : index
    %20 = vector.load %arg1[%c80, %c0_10] : memref<88x128xf32, #tpu.memory_space<vmem>>, vector<1x8xf32>
    %cst_11 = arith.constant dense<0.000000e+00> : vector<128x8xf32>
    %21 = tpu.matmul %18, %19, %cst_11 {dimension_numbers = #tpu.dot_dimension_numbers<[1], [0], [0], [1], [0, 0, 1, 1], [], []>} : vector<128x16xf32>, vector<16x8xf32>, vector<128x8xf32> -> vector<128x8xf32>
    %22 = vector.broadcast %20 : vector<1x8xf32> to vector<128x8xf32>
    %23 = arith.addf %21, %22 : vector<128x8xf32>
    %24 = arith.negf %23 : vector<128x8xf32>
    %25 = math.exp %24 : vector<128x8xf32>
    %cst_12 = arith.constant 1.000000e+00 : f32
    %26 = vector.broadcast %cst_12 : f32 to vector<128x8xf32>
    %27 = arith.addf %26, %25 : vector<128x8xf32>
    %28 = arith.divf %26, %27 : vector<128x8xf32>
    %29 = vector.shape_cast %28 : vector<128x8xf32> to vector<16x8x8xf32>
    "tpu.trace_start"() <{level = 10 : i32, message = "bnh,bmh->bnm"}> : () -> ()
    %cst_13 = arith.constant dense<0.000000e+00> : vector<16x8x8xf32>
    %30 = tpu.matmul %29, %29, %cst_13 {dimension_numbers = #tpu.dot_dimension_numbers<[2], [2], [1], [1], [0, 0, 0, 1, 1, 1], [0], [0]>} : vector<16x8x8xf32>, vector<16x8x8xf32>, vector<16x8x8xf32> -> vector<16x8x8xf32>
    "tpu.trace_stop"() : () -> ()
    %31 = tpu.iota {dimensions = array<i32: 1>} : vector<16x8x8xi32>
    %32 = tpu.iota {dimensions = array<i32: 2>} : vector<16x8x8xi32>
    %33 = arith.cmpi eq, %31, %32 : vector<16x8x8xi32>
    %34 = arith.mulf %29, %29 : vector<16x8x8xf32>
    %cst_14 = arith.constant dense<0.000000e+00> : vector<16x8xf32>
    %35 = vector.multi_reduction <add>, %34, %cst_14 [2] : vector<16x8x8xf32> to vector<16x8xf32>
    %36 = vector.shape_cast %35 : vector<16x8xf32> to vector<16x8x1xf32>
    %cst_15 = arith.constant 0.000000e+00 : f32
    %37 = vector.broadcast %cst_15 : f32 to vector<16x8x8xf32>
    %38 = arith.select %33, %30, %37 : vector<16x8x8xi1>, vector<16x8x8xf32>
    %cst_16 = arith.constant dense<0.000000e+00> : vector<16x8xf32>
    %39 = vector.multi_reduction <add>, %38, %cst_16 [1] : vector<16x8x8xf32> to vector<16x8xf32>
    %40 = vector.shape_cast %39 : vector<16x8xf32> to vector<16x1x8xf32>
    %41 = vector.broadcast %36 : vector<16x8x1xf32> to vector<16x8x8xf32>
    %42 = vector.broadcast %40 : vector<16x1x8xf32> to vector<16x8x8xf32>
    %43 = arith.addf %41, %42 : vector<16x8x8xf32>
    %cst_17 = arith.constant 2.000000e+00 : f32
    %44 = vector.broadcast %cst_17 : f32 to vector<16x8x8xf32>
    %45 = arith.mulf %44, %30 : vector<16x8x8xf32>
    %46 = arith.subf %43, %45 : vector<16x8x8xf32>
    %cst_18 = arith.constant 0.000000e+00 : f32
    %47 = vector.broadcast %cst_18 : f32 to vector<16x8x8xf32>
    %48 = arith.maximumf %46, %47 : vector<16x8x8xf32>
    %49 = math.sqrt %48 : vector<16x8x8xf32>
    %cst_19 = arith.constant 0.000000e+00 : f32
    %50 = vector.broadcast %cst_19 : f32 to vector<16x8x8xf32>
    %51 = arith.select %33, %50, %49 : vector<16x8x8xi1>, vector<16x8x8xf32>
    %52 = arith.mulf %51, %3 : vector<16x8x8xf32>
    "tpu.trace_start"() <{level = 10 : i32, message = "bnm,bmc->bnc"}> : () -> ()
    %cst_20 = arith.constant dense<0.000000e+00> : vector<16x8x3xf32>
    %53 = tpu.matmul %52, %4, %cst_20 {dimension_numbers = #tpu.dot_dimension_numbers<[2], [1], [1], [2], [0, 0, 0, 1, 1, 2], [0], [0]>} : vector<16x8x8xf32>, vector<16x8x3xf32>, vector<16x8x3xf32> -> vector<16x8x3xf32>
    %cst_21 = arith.constant dense<0.000000e+00> : vector<16x8x3xf32>
    %54 = tpu.matmul %51, %4, %cst_21 {dimension_numbers = #tpu.dot_dimension_numbers<[2], [1], [1], [2], [0, 0, 0, 1, 1, 2], [0], [0]>} : vector<16x8x8xf32>, vector<16x8x3xf32>, vector<16x8x3xf32> -> vector<16x8x3xf32>
    "tpu.trace_stop"() : () -> ()
    %cst_22 = arith.constant dense<0.000000e+00> : vector<16x3xf32>
    %55 = vector.multi_reduction <add>, %4, %cst_22 [1] : vector<16x8x3xf32> to vector<16x3xf32>
    %56 = vector.shape_cast %55 : vector<16x3xf32> to vector<16x1x3xf32>
    %57 = vector.broadcast %56 : vector<16x1x3xf32> to vector<16x8x3xf32>
    %58 = arith.mulf %4, %57 : vector<16x8x3xf32>
    %cst_23 = arith.constant dense<0.000000e+00> : vector<16x8xf32>
    %59 = vector.multi_reduction <add>, %58, %cst_23 [2] : vector<16x8x3xf32> to vector<16x8xf32>
    %60 = vector.shape_cast %59 : vector<16x8xf32> to vector<16x8x1xf32>
    %61 = arith.mulf %54, %4 : vector<16x8x3xf32>
    %cst_24 = arith.constant dense<0.000000e+00> : vector<16x8xf32>
    %62 = vector.multi_reduction <add>, %61, %cst_24 [2] : vector<16x8x3xf32> to vector<16x8xf32>
    %63 = vector.shape_cast %62 : vector<16x8xf32> to vector<16x8x1xf32>
    %cst_25 = arith.constant 1.000000e+00 : f32
    %64 = vector.broadcast %cst_25 : f32 to vector<16x8x1xf32>
    %65 = arith.subf %60, %64 : vector<16x8x1xf32>
    %cst_26 = arith.constant 1.000000e+00 : f32
    %66 = vector.broadcast %cst_26 : f32 to vector<16x8x1xf32>
    %67 = arith.maximumf %65, %66 : vector<16x8x1xf32>
    %68 = arith.divf %63, %67 : vector<16x8x1xf32>
    %cst_27 = arith.constant 0.000000e+00 : f32
    %69 = vector.broadcast %cst_27 : f32 to vector<16x1x3xf32>
    %70 = arith.cmpf ogt, %56, %69 : vector<16x1x3xf32>
    %cst_28 = arith.constant 1.000000e+00 : f32
    %71 = vector.broadcast %cst_28 : f32 to vector<16x1x3xf32>
    %72 = arith.maximumf %56, %71 : vector<16x1x3xf32>
    %73 = vector.broadcast %72 : vector<16x1x3xf32> to vector<16x8x3xf32>
    %74 = arith.divf %54, %73 : vector<16x8x3xf32>
    %cst_29 = arith.constant 0x7F800000 : f32
    %75 = vector.shape_cast %70 : vector<16x1x3xi1> to vector<16x1x3xi1>
    %76 = vector.broadcast %75 : vector<16x1x3xi1> to vector<16x8x3xi1>
    %77 = vector.broadcast %cst_29 : f32 to vector<16x8x3xf32>
    %78 = arith.select %76, %74, %77 : vector<16x8x3xi1>, vector<16x8x3xf32>
    %cst_30 = arith.constant 5.000000e-01 : f32
    %79 = vector.broadcast %cst_30 : f32 to vector<16x8x3xf32>
    %80 = arith.cmpf ogt, %4, %79 : vector<16x8x3xf32>
    %cst_31 = arith.constant 0x7F800000 : f32
    %81 = vector.broadcast %cst_31 : f32 to vector<16x8x3xf32>
    %82 = arith.select %80, %81, %78 : vector<16x8x3xi1>, vector<16x8x3xf32>
    %cst_32 = arith.constant dense<0x7F800000> : vector<16x8xf32>
    %83 = vector.multi_reduction <minimumf>, %82, %cst_32 [2] : vector<16x8x3xf32> to vector<16x8xf32>
    %84 = vector.shape_cast %83 : vector<16x8xf32> to vector<16x8x1xf32>
    %85 = arith.subf %84, %68 : vector<16x8x1xf32>
    %86 = arith.maximumf %68, %84 : vector<16x8x1xf32>
    %cst_33 = arith.constant 9.99999996E-13 : f32
    %87 = vector.broadcast %cst_33 : f32 to vector<16x8x1xf32>
    %88 = arith.maximumf %86, %87 : vector<16x8x1xf32>
    %89 = arith.divf %85, %88 : vector<16x8x1xf32>
    %cst_34 = arith.constant 1.000000e+00 : f32
    %90 = vector.broadcast %cst_34 : f32 to vector<16x8x1xf32>
    %91 = arith.cmpf ole, %60, %90 : vector<16x8x1xf32>
    %cst_35 = arith.constant 0.000000e+00 : f32
    %92 = vector.broadcast %cst_35 : f32 to vector<16x8x1xf32>
    %93 = arith.select %91, %92, %89 : vector<16x8x1xi1>, vector<16x8x1xf32>
    %cst_36 = arith.constant 0x7F800000 : f32
    %94 = vector.broadcast %cst_36 : f32 to vector<16x8x1xf32>
    %95 = arith.cmpf olt, %84, %94 : vector<16x8x1xf32>
    %cst_37 = arith.constant 0.000000e+00 : f32
    %96 = vector.broadcast %cst_37 : f32 to vector<16x8x1xf32>
    %97 = arith.select %95, %93, %96 : vector<16x8x1xi1>, vector<16x8x1xf32>
    %cst_38 = arith.constant dense<0.000000e+00> : vector<16x1xf32>
    %98 = vector.multi_reduction <add>, %97, %cst_38 [1] : vector<16x8x1xf32> to vector<16x1xf32>
    %99 = vector.shape_cast %98 : vector<16x1xf32> to vector<16x1x1xf32>
    %cst_39 = arith.constant 1.250000e-01 : f32
    %100 = vector.broadcast %cst_39 : f32 to vector<16x1x1xf32>
    %101 = arith.mulf %99, %100 : vector<16x1x1xf32>
    %cst_40 = arith.constant 0.000000e+00 : f32
    %102 = vector.broadcast %cst_40 : f32 to vector<16x8x1xf32>
    %103 = vector.broadcast %101 : vector<16x1x1xf32> to vector<16x8x1xf32>
    %104 = arith.addf %102, %103 : vector<16x8x1xf32>
    %cst_41 = arith.constant 0.000000e+00 : f32
    %105 = vector.broadcast %cst_41 : f32 to vector<16x8x116xf32>
    %106 = tpu.concatenate %29, %53, %104, %105 in 2 : vector<16x8x8xf32>, vector<16x8x3xf32>, vector<16x8x1xf32>, vector<16x8x116xf32> -> vector<16x8x128xf32>
    %c0_42 = arith.constant 0 : index
    %c0_43 = arith.constant 0 : index
    %c0_44 = arith.constant 0 : index
    %107 = vector.load %arg3[%c0_42, %c0_43, %c0_44] : memref<16x8x128xf32, #tpu.memory_space<vmem>>, vector<16x8x128xf32>
    tpu.vector_store %arg3[%c0_42, %c0_43, %c0_44], %106 {strides = array<i32>} : memref<16x8x128xf32, #tpu.memory_space<vmem>>, vector<16x8x128xf32>,
    return
  }
  func.func @transform_0(%arg0: i32) -> (i32, i32) {
    %c0_i32 = arith.constant 0 : i32
    %c0_i32_0 = arith.constant 0 : i32
    %c0_i32_1 = arith.constant 0 : i32
    return %c0_i32, %c0_i32_0 : i32, i32
  }
  func.func @transform_1(%arg0: i32) -> (i32, i32, i32) {
    %c0_i32 = arith.constant 0 : i32
    %c0_i32_0 = arith.constant 0 : i32
    %c0_i32_1 = arith.constant 0 : i32
    return %arg0, %c0_i32, %c0_i32_0 : i32, i32, i32
  }
  func.func @transform_2(%arg0: i32) -> (i32, i32, i32) {
    %c0_i32 = arith.constant 0 : i32
    %c0_i32_0 = arith.constant 0 : i32
    %c0_i32_1 = arith.constant 0 : i32
    return %arg0, %c0_i32, %c0_i32_0 : i32, i32, i32
  }
}

</mosaic_0001>

<bundles_post_ra>
// kernel: tpu_custom_call.1
= control target key start
LH: loop header
LB: loop body
LE: loop exit
PB: predicated region body
PF: predicated region fallthrough
CT: control target
= control target key end

     0   :  { %7 = vsyncpa [#allocation3], 0  ;;  %s10673_s0 = inlined_call_operand.hbm [shape: f32[88,128], index: 0, kind: input, shape index: {}]   ;;  %s10674_s1 = inlined_call_operand.hbm [shape: f32[32,8,128], index: 1, kind: input, shape index: {}]   ;;  %s10675_s2 = inlined_call_operand.hbm [shape: f32[32,8,128], index: 2, kind: output, shape index: {}]  }
   0x1   :  { %8 = vsyncpa [#allocation6], 0 }
   0x2   :  { %10 = vsyncpa [#allocation6 + $0x1], 0 }
   0x3   :  { %11 = vsyncpa [#allocation4], 0 }
   0x4   :  { %13 = vsyncpa [#allocation4 + $0x1], 0  ;;  %s8626_s9 = smov 0   ;;  %s8628_s10 = smov 0  }
   0x5   :  { %s8630_s11 = smov 0   ;;  %s8632_s12 = smov 0  }
   0x6 LB: > { %s8647_s13 = sadd.s32 4294967295, %s8596_s12   ;;  %s7340_s14 = sadd.s32 4294967294, %s8596_s12   ;;  %s8596_s12 = sphi %s8632_s12, %s10916_s12   ;;  %s8592_s11 = sphi %s8630_s11, %s10915_s11   ;;  %s8588_s10 = sphi %s8628_s10, %s10914_s10   ;;  %s8584_s9 = sphi %s8626_s9, %s10913_s9  }
   0x7   : > { %p60_p0 = scmp.ne.s32.totalorder %s8588_s10, %s8584_s9  ;;  %p10676_p1 = scmp.eq.s32.totalorder %s8647_s13, 0 }
   0x8   : > { %p90_p3 = scmp.eq.s32.totalorder %s7340_s14, 1  ;;  %p7341_p5 = scmp.ge.s32.totalorder %s8596_s12, 1 }
   0x9   : > { %p8656_p4 = por %p10676_p1, %p60_p0  ;;  %p97_p7 = scmp.lt.s32.totalorder %s8596_s12, 3 }
   0xa   : > { %p8661_p6 = por %p90_p3, %p60_p0  ;;  %s8598_s18 = smov [#allocation2]  }
   0xb   : > { %s10739_s15 = scalar_select %p8656_p4, 1, 0 }
   0xc   : > { %s10740_s16 = scalar_select %p8661_p6, 1, 0 }
   0xd   : > { %p8666_p8 = pnand %p7341_p5, %p97_p7  ;;  %s109_s19 = sshll.u32 %s8598_s18, 4  ;;  %s8670_s19 = int_to_ptr.vmem [resolvable:$true] %s109_s19 }
   0xe   : > { %s8682_s21 = sadd.s32 1, %s8596_s12   ;;  %s47_s22 = sadd.s32 1, %s8592_s11 }
   0xf   : > { %s10741_s17 = scalar_select %p8666_p8, 1, 0 }
  0x10   : > { %p8137_p9 = pneg %p8666_p8  ;;  %s44_s23 = ssub.s32 %s8596_s12, %s8682_s21 }
  0x11   : > { %s8468_s26 = scalar_lea.hbm %s10673_s0, 1408 }
  0x12   : > { %p8677_p11 = pnand %p8137_p9, %p10676_p1  ;;  %p8469_p12 = scmp.ne.s32.totalorder %s10673_s0, %s8468_s26 }
  0x13   : > { %p8475_p5 = scmp.lt.u32.totalorder %s8468_s26, %s10673_s0 }
  0x14   : > { %p8470_p13 = pneg %p8677_p11 }
  0x16   : > { %p8471_p0 = pnand %p8470_p13, %p8469_p12 }
  0x18   : > { %p8472_p3 = pneg %p8471_p0 }
  0x1a   : > { %p8477_p7 = pnand %p8475_p5, %p8472_p3 }
  0x1c   : > { %8480 = shalt.err (!%p8477_p7)
}
  0x1d   : > { %s8481_s3 = scalar_lea.vmem %s8670_s19, 1408  ;;  %p8489_p2 = scmp.lt.s32.totalorder %s8670_s19, %s8670_s19 }
  0x1e   : > { %p8482_p9 = scmp.ne.s32.totalorder %s8670_s19, %s8481_s3  ;;  %p8490_p6 = scmp.lt.s32.totalorder %s8481_s3, %s8481_s3 }
  0x20   : > { %p8484_p10 = pnand %p8482_p9, %p8470_p13  ;;  %p8491_p4 = por %p8490_p6, %p8489_p2 }
  0x22   : > { %p8485_p1 = pneg %p8484_p10 }
  0x24   : > { %p8492_p8 = pnand %p8491_p4, %p8485_p1 }
  0x26   : > { %8495 = shalt.err (!%p8492_p8)
}
  0x27   : > { %s8599_s4 = smov 128   ;;  %s8600_s5 = smov 8  }
  0x28   : > { %8140 = dma.hbm_to_vmem [thread:$0]  (!%p8677_p11), %s10673_s0, 1408, %s8670_s19, [#allocation3], %s8599_s4, %s8599_s4, %s8600_s5  }
  0x29   : > { %p45_p1 = scmp.eq.s32.totalorder %s44_s23, 0  ;;  %p54_p2 = scmp.ne.s32.totalorder %s8592_s11, %s8588_s10 }
  0x2a   : > { %p55_p4 = scmp.eq.s32.totalorder %s8596_s12, 0  ;;  %p8150_p6 = scmp.lt.s32.totalorder %s8596_s12, 2 }
  0x2b   : > { %s8716_s8 = scalar_select %p45_p1, %s8592_s11, %s47_s22  }
  0x2c   : > { %p56_p8 = por %p55_p4, %p54_p2  ;;  %p10743_p10 = scmp.eq.s32.totalorder %s8647_s13, 1 }
  0x2d   : > { %s123_s18 = sand.u32 1, %s8592_s11   ;;  %s7519_s20 = sshll.u32 %s8596_s12, 11 }
  0x2e   : > { %p8720_p12 = por %p10743_p10, %p54_p2  ;;  %s7344_s24 = sshll.u32 %s123_s18, 7 }
  0x2f   : > { %s8729_s27 = scalar_lea.hbm %s10674_s1, %s7519_s20  ;;  %s127_s19 = scalar_lea.vmem [#allocation5], %s7344_s24 }
  0x30   : > { %s134_s22 = sshll.u32 %s127_s19, 4  ;;  %p8731_p11 = pnand %p8150_p6, %p56_p8  ;;  %s8735_s22 = int_to_ptr.vmem [resolvable:$true] %s134_s22 }
  0x31   : > { %s8737_s28 = scalar_lea.sflag [#allocation6], %s123_s18  ;;  %s8496_s29 = scalar_lea.hbm %s8729_s27, 2048 }
  0x32   : > { %p8497_p13 = scmp.ne.s32.totalorder %s8729_s27, %s8496_s29  ;;  %p8498_p0 = pneg %p8731_p11 }
  0x33   : > { %s8501_s6 = scalar_lea.hbm %s10674_s1, 4096  ;;  %p8502_p7 = scmp.lt.u32.totalorder %s8729_s27, %s10674_s1 }
  0x34   : > { %p8499_p3 = pnand %p8498_p0, %p8497_p13  ;;  %p8503_p9 = scmp.lt.u32.totalorder %s8501_s6, %s8496_s29 }
  0x35   : > { %p8505_p2 = scmp.lt.u32.totalorder %s8496_s29, %s8729_s27 }
  0x36   : > { %p8500_p5 = pneg %p8499_p3  ;;  %p8504_p1 = por %p8503_p9, %p8502_p7 }
  0x38   : > { %p8506_p4 = por %p8505_p2, %p8504_p1 }
  0x3a   : > { %p8507_p6 = pnand %p8506_p4, %p8500_p5 }
  0x3c   : > { %8510 = shalt.err (!%p8507_p6)
}
  0x3d   : > { %s8511_s18 = scalar_lea.vmem %s8735_s22, 2048  ;;  %s8601_s24 = smov [#allocation5]  }
  0x3e   : > { %p8512_p8 = scmp.ne.s32.totalorder %s8735_s22, %s8511_s18  ;;  %s8516_s25 = sshll.u32 %s8601_s24, 4  ;;  %s8517_s25 = int_to_ptr.vmem [resolvable:$false] %s8516_s25 }
  0x3f   : > { %s8518_s26 = scalar_lea.vmem %s8517_s25, 4096  ;;  %p8519_p3 = scmp.lt.s32.totalorder %s8735_s22, %s8517_s25 }
  0x40   : > { %p8514_p10 = pnand %p8512_p8, %p8498_p0  ;;  %p8520_p7 = scmp.lt.s32.totalorder %s8518_s26, %s8511_s18 }
  0x42   : > { %p8515_p13 = pneg %p8514_p10  ;;  %p8521_p9 = por %p8520_p7, %p8519_p3 }
  0x44   : > { %p8522_p1 = pnand %p8521_p9, %p8515_p13 }
  0x46   : > { %8525 = shalt.err (!%p8522_p1)
}
  0x47   : > { %8144 = dma.hbm_to_vmem [thread:$0]  (!%p8731_p11), %s8729_s27, 2048, %s8735_s22, %s8737_s28, %s8599_s4, %s8599_s4, %s8600_s5  }
  0x48   : > { %p10746_p0 = scmp.ne.s32.totalorder %s10741_s17, 0 }
  0x4a   : > { %146 = sbr.rel (%p10746_p0) target bundleno = 2347 (0x92b), region = 28 }
  0x51   : > { %p10747_p5 = scmp.eq.s32.totalorder %s8647_s13, 0 }
  0x53   : > { %8571 = dma.done.wait (%p10747_p5), [#allocation3], 1408   ;;  %p10748_p2 = pmov %p10747_p5 }
  0x54   : > { %s8775_s19 = sand.u32 1, %s8588_s10   ;;  %p10749_p11 = scmp.ne.s32.totalorder %s10739_s15, 0 }
  0x55   : > { %8573 = vsyncadd (%p10748_p2), [#allocation3], 4294965888  ;;  %s7349_s23 = sshll.u32 %s8775_s19, 7  ;;  %s153_s29 = scalar_lea.sflag [#allocation6], %s8775_s19 }
  0x56   : > { %s8781_s4 = scalar_lea.vmem [#allocation5], %s7349_s23 }
  0x57   : > { %8575 = dma.done.wait (%p10749_p11), %s153_s29, 2048  }
  0x58   : > { %8577 = vsyncadd (%p10749_p11), %s153_s29, 4294965248  ;;  %v10679_v0 = vmov 0.0   ;;  %vm8603_vm0 = vmmov 0   ;;  %v8794_v1 = vld [vmem:[%s8781_s4] sm:$0xff]  ;;  %v8797_v2 = vld [vmem:[%s8781_s4 + $0x10] sm:$0xff]  ;;  %s8604_s15 = smov 120  }
  0x59   : > { %7705 = vmatprep.subr.mxu0 %v10679_v0  ;;  %7707 = vmatprep.mubr.msk.f32.mxu0 %vm8603_vm0, %v10679_v0  ;;  %v8802_v3 = vld [vmem:[%s8781_s4 + $0x8] sm:$0xff]  ;;  %v8805_v4 = vld [vmem:[%s8781_s4 + $0x18] sm:$0xff]  ;;  %v8810_v5 = vld [vmem:[%s8781_s4 + $0x20] sm:$0xff]  ;;  %vm199_vm1 = vcmask 64512   ;;  %vm1419_vm2 = vcmask 130048   ;;  %vm1638_vm3 = vcmask 261120  }
  0x5a   : > { %7710 = vmatprep.subr.mxu1 %v10679_v0  ;;  %7712 = vmatprep.mubr.msk.f32.mxu1 %vm8603_vm0, %v10679_v0  ;;  %v8813_v6 = vld [vmem:[%s8781_s4 + $0x28] sm:$0xff]  ;;  %v8818_v7 = vld [vmem:[%s8781_s4 + $0x30] sm:$0xff]  ;;  %v8821_v8 = vld [vmem:[%s8781_s4 + $0x38] sm:$0xff]  ;;  %s8605_s17 = smov 104   ;;  %s8606_s5 = smov 96   ;;  %vm6149_vm4 = vcmask 285952  }
  0x5b   : > { %196 = vrot.lane.b32.xlu0 %v8794_v1, %s8604_s15  ;;  %349 = vrot.lane.b32.xlu1 %v8797_v2, %s8604_s15  ;;  %v8826_v9 = vld [vmem:[%s8781_s4 + $0x40] sm:$0xff]  ;;  %v8829_v10 = vld [vmem:[%s8781_s4 + $0x48] sm:$0xff]  ;;  %v1413_v30 = vld [vmem:[#allocation2 + $0x8] sm:$0xff]  ;;  %vm6342_vm5 = vcmask 23552   ;;  %s8607_s27 = smov 8   ;;  %s8608_s22 = smov 32  }
  0x5c   : > { %v8834_v11 = vld [vmem:[%s8781_s4 + $0x50] sm:$0xff]  ;;  %v8837_v12 = vld [vmem:[%s8781_s4 + $0x58] sm:$0xff]  ;;  %v8842_v13 = vld [vmem:[%s8781_s4 + $0x60] sm:$0xff]  ;;  %s10446_s28 = scalar_lea.vmem [#allocation7], %s7349_s23  ;;  %s7520_s30 = sshll.u32 %s8647_s13, 11 }
  0x5d   : > { %v8845_v14 = vld [vmem:[%s8781_s4 + $0x68] sm:$0xff]  ;;  %v8850_v15 = vld [vmem:[%s8781_s4 + $0x70] sm:$0xff]  ;;  %v8853_v16 = vld [vmem:[%s8781_s4 + $0x78] sm:$0xff]  ;;  %s7255_s3 = sshll.u32 %s10446_s28, 4  ;;  %s10623_s20 = scalar_lea.hbm %s10675_s2, %s7520_s30  ;;  %s10626_s3 = int_to_ptr.vmem [resolvable:$true] %s7255_s3 }
  0x5e   : > { %v1412_v29 = vld [vmem:[#allocation2] sm:$0xff]  ;;  %s7242_s13 = scalar_lea.sflag [#allocation4], %s8775_s19  ;;  %s8526_s18 = scalar_lea.vmem %s10626_s3, 2048 }
  0x5f   : > { %273 = vrot.lane.b32.xlu0 %v8802_v3, %s8604_s15  ;;  %425 = vrot.lane.b32.xlu1 %v8805_v4, %s8604_s15  ;;  %v8113_v33 = vpack.c.bf16 %v1413_v30, %v1412_v29  ;;  %p8527_p4 = scmp.ne.s32.totalorder %s10626_s3, %s8526_s18  ;;  %s8609_s24 = smov [#allocation7]  }
  0x60   : > { %s8530_s25 = sshll.u32 %s8609_s24, 4  ;;  %s8531_s25 = int_to_ptr.vmem [resolvable:$false] %s8530_s25 }
  0x61   : > { %p8528_p6 = pnand %p8527_p4, %p8720_p12  ;;  %s8532_s26 = scalar_lea.vmem %s8531_s25, 4096 }
  0x62   : > { %p8533_p10 = scmp.lt.s32.totalorder %s10626_s3, %s8531_s25  ;;  %p8534_p13 = scmp.lt.s32.totalorder %s8532_s26, %s8526_s18 }
  0x63   : > { %501 = vrot.lane.b32.xlu0 %v8810_v5, %s8604_s15  ;;  %577 = vrot.lane.b32.xlu1 %v8813_v6, %s8604_s15  ;;  %p8529_p8 = pneg %p8528_p6 }
  0x64   : > { %p8535_p3 = por %p8534_p13, %p8533_p10 }
  0x66   : > { %p8536_p7 = pnand %p8535_p3, %p8529_p8 }
  0x67   : > { %653 = vrot.lane.b32.xlu0 %v8818_v7, %s8604_s15  ;;  %729 = vrot.lane.b32.xlu1 %v8821_v8, %s8604_s15 }
  0x6b   : > { %805 = vrot.lane.b32.xlu0 %v8826_v9, %s8604_s15  ;;  %881 = vrot.lane.b32.xlu1 %v8829_v10, %s8604_s15 }
  0x6f   : > { %957 = vrot.lane.b32.xlu0 %v8834_v11, %s8604_s15  ;;  %1033 = vrot.lane.b32.xlu1 %v8837_v12, %s8604_s15 }
  0x73   : > { %1109 = vrot.lane.b32.xlu0 %v8842_v13, %s8604_s15  ;;  %1185 = vrot.lane.b32.xlu1 %v8845_v14, %s8604_s15 }
  0x77   : > { %1261 = vrot.lane.b32.xlu0 %v8850_v15, %s8604_s15  ;;  %1337 = vrot.lane.b32.xlu1 %v8853_v16, %s8604_s15 }
  0x7b   : > { %3701 = vrot.lane.b32.xlu1 %v8794_v1, %s8605_s17  ;;  %3703 = vrot.lane.b32.xlu0 %v8802_v3, %s8605_s17 }
  0x7f   : > { %3765 = vrot.lane.b32.xlu1 %v8794_v1, %s8606_s5  ;;  %3705 = vrot.lane.b32.xlu0 %v8797_v2, %s8605_s17 }
  0x83   : > { %3841 = vrot.lane.b32.xlu1 %v8802_v3, %s8606_s5  ;;  %3917 = vrot.lane.b32.xlu0 %v8797_v2, %s8606_s5 }
  0x87   : > { %3707 = vrot.lane.b32.xlu1 %v8805_v4, %s8605_s17  ;;  %3709 = vrot.lane.b32.xlu0 %v8810_v5, %s8605_s17 }
  0x8b   : > { %3993 = vrot.lane.b32.xlu1 %v8805_v4, %s8606_s5  ;;  %4069 = vrot.lane.b32.xlu0 %v8810_v5, %s8606_s5 }
  0x8f   : > { %3711 = vrot.lane.b32.xlu1 %v8813_v6, %s8605_s17  ;;  %3713 = vrot.lane.b32.xlu0 %v8818_v7, %s8605_s17 }
  0x93   : > { %4145 = vrot.lane.b32.xlu1 %v8813_v6, %s8606_s5  ;;  %4221 = vrot.lane.b32.xlu0 %v8818_v7, %s8606_s5 }
  0x97   : > { %3715 = vrot.lane.b32.xlu1 %v8821_v8, %s8605_s17  ;;  %3717 = vrot.lane.b32.xlu0 %v8826_v9, %s8605_s17 }
  0x9b   : > { %4297 = vrot.lane.b32.xlu1 %v8821_v8, %s8606_s5  ;;  %4373 = vrot.lane.b32.xlu0 %v8826_v9, %s8606_s5 }
  0x9f   : > { %3719 = vrot.lane.b32.xlu1 %v8829_v10, %s8605_s17  ;;  %3721 = vrot.lane.b32.xlu0 %v8834_v11, %s8605_s17 }
  0xa3   : > { %4449 = vrot.lane.b32.xlu1 %v8829_v10, %s8606_s5  ;;  %4525 = vrot.lane.b32.xlu0 %v8834_v11, %s8606_s5 }
  0xa7   : > { %3723 = vrot.lane.b32.xlu1 %v8837_v12, %s8605_s17  ;;  %3725 = vrot.lane.b32.xlu0 %v8842_v13, %s8605_s17 }
  0xab   : > { %4601 = vrot.lane.b32.xlu1 %v8837_v12, %s8606_s5  ;;  %4677 = vrot.lane.b32.xlu0 %v8842_v13, %s8606_s5 }
  0xaf   : > { %3727 = vrot.lane.b32.xlu1 %v8845_v14, %s8605_s17  ;;  %3729 = vrot.lane.b32.xlu0 %v8850_v15, %s8605_s17 }
  0xb3   : > { %4753 = vrot.lane.b32.xlu1 %v8845_v14, %s8606_s5  ;;  %4829 = vrot.lane.b32.xlu0 %v8850_v15, %s8606_s5 }
  0xb7   : > { %3731 = vrot.lane.b32.xlu1 %v8853_v16, %s8605_s17 }
  0xbb   : > { %4905 = vrot.lane.b32.xlu1 %v8853_v16, %s8606_s5 }
  0xcd   : > { %v197_v17 = vpop.permute.xlu0 %196  ;;  %v350_v18 = vpop.permute.xlu1 %349 }
  0xce   : > { %7706 = vmatpush3.msra.mxu0 %v197_v17 }
  0xcf   : > { %7708 = vmatmul.mubr.msk.f32.vlgmr.msra.gmra.mrb[0].mxu0 %vm199_vm1, %v8794_v1  ;;  %7715 = vmatprep.subr.mxu0 %v10679_v0 }
  0xd0   : > { %7716 = vmatpush3.msra.mxu0 %v350_v18  ;;  %7717 = vmatprep.mubr.msk.f32.mxu0 %vm8603_vm0, %v10679_v0 }
  0xd1   : > { %v274_v19 = vpop.permute.xlu0 %273  ;;  %v426_v20 = vpop.permute.xlu1 %425  ;;  %7725 = vmatprep.subr.mxu0 %v10679_v0 }
  0xd2   : > { %7711 = vmatpush3.msra.mxu1 %v274_v19 }
  0xd3   : > { %7713 = vmatmul.mubr.msk.f32.vlgmr.msra.gmra.mrb[0].mxu1 %vm199_vm1, %v8802_v3  ;;  %7720 = vmatprep.subr.mxu1 %v10679_v0 }
  0xd4   : > { %7718 = vmatmul.mubr.msk.f32.vlgmr.msra.gmra.mrb[2].mxu0 %vm199_vm1, %v8797_v2  ;;  %7721 = vmatpush3.msra.mxu1 %v426_v20 }
  0xd5   : > { %7722 = vmatprep.mubr.msk.f32.mxu1 %vm8603_vm0, %v10679_v0  ;;  %v502_v21 = vpop.permute.xlu0 %501  ;;  %v578_v22 = vpop.permute.xlu1 %577  ;;  %7727 = vmatprep.mubr.msk.f32.mxu0 %vm8603_vm0, %v10679_v0 }
  0xd6   : > { %7726 = vmatpush3.msra.mxu0 %v502_v21  ;;  %7730 = vmatprep.subr.mxu1 %v10679_v0  ;;  %v1629_v21 = vld [vmem:[#allocation2 + $0x18] sm:$0xff] }
  0xd7   : > { %7723 = vmatmul.mubr.msk.f32.vlgmr.msra.gmra.mrb[2].mxu1 %vm199_vm1, %v8805_v4  ;;  %7735 = vmatprep.subr.mxu0 %v10679_v0 }
  0xd8   : > { %7728 = vmatmul.mubr.msk.f32.vlgmr.msra.gmra.mrb[4].mxu0 %vm199_vm1, %v8810_v5  ;;  %7731 = vmatpush3.msra.mxu1 %v578_v22  ;;  %v1630_v22 = vld [vmem:[#allocation2 + $0x20] sm:$0xff] }
  0xd9   : > { %7732 = vmatprep.mubr.msk.f32.mxu1 %vm8603_vm0, %v10679_v0  ;;  %v654_v23 = vpop.permute.xlu0 %653  ;;  %v730_v24 = vpop.permute.xlu1 %729  ;;  %7737 = vmatprep.mubr.msk.f32.mxu0 %vm8603_vm0, %v10679_v0 }
  0xda   : > { %7736 = vmatpush3.msra.mxu0 %v654_v23  ;;  %7740 = vmatprep.subr.mxu1 %v10679_v0  ;;  %v8117_v23 = vpack.c.bf16 %v1630_v22, %v1629_v21 }
  0xdb   : > { %7733 = vmatmul.mubr.msk.f32.vlgmr.msra.gmra.mrb[4].mxu1 %vm199_vm1, %v8813_v6  ;;  %7745 = vmatprep.subr.mxu0 %v10679_v0 }
  0xdc   : > { %7738 = vmatmul.mubr.msk.f32.vlgmr.msra.gmra.mrb[6].mxu0 %vm199_vm1, %v8818_v7  ;;  %7741 = vmatpush3.msra.mxu1 %v730_v24  ;;  %v1631_v24 = vld [vmem:[#allocation2 + $0x28] sm:$0xff] }
  0xdd   : > { %7742 = vmatprep.mubr.msk.f32.mxu1 %vm8603_vm0, %v10679_v0  ;;  %v806_v25 = vpop.permute.xlu0 %805  ;;  %v882_v26 = vpop.permute.xlu1 %881  ;;  %7747 = vmatprep.mubr.msk.f32.mxu0 %vm8603_vm0, %v10679_v0 }
  0xde   : > { %7746 = vmatpush3.msra.mxu0 %v806_v25  ;;  %7750 = vmatprep.subr.mxu1 %v10679_v0  ;;  %v1632_v25 = vld [vmem:[#allocation2 + $0x30] sm:$0xff] }
  0xdf   : > { %7743 = vmatmul.mubr.msk.f32.vlgmr.msra.gmra.mrb[6].mxu1 %vm199_vm1, %v8821_v8  ;;  %7755 = vmatprep.subr.mxu0 %v10679_v0 }
  0xe0   : > { %7748 = vmatmul.mubr.msk.f32.vlgmr.msra.gmra.mrb[8].mxu0 %vm199_vm1, %v8826_v9  ;;  %7751 = vmatpush3.msra.mxu1 %v882_v26  ;;  %v8121_v26 = vpack.c.bf16 %v1632_v25, %v1631_v24 }
  0xe1   : > { %7752 = vmatprep.mubr.msk.f32.mxu1 %vm8603_vm0, %v10679_v0  ;;  %v958_v27 = vpop.permute.xlu0 %957  ;;  %v1034_v28 = vpop.permute.xlu1 %1033  ;;  %7757 = vmatprep.mubr.msk.f32.mxu0 %vm8603_vm0, %v10679_v0 }
  0xe2   : > { %7756 = vmatpush3.msra.mxu0 %v958_v27  ;;  %7760 = vmatprep.subr.mxu1 %v10679_v0  ;;  %v8948_v27 = vld [vmem:[#allocation2 + $0x10] ss:$0 sm:$0xff] }
  0xe3   : > { %7753 = vmatmul.mubr.msk.f32.vlgmr.msra.gmra.mrb[8].mxu1 %vm199_vm1, %v8829_v10  ;;  %7765 = vmatprep.subr.mxu0 %v10679_v0 }
  0xe4   : > { %7758 = vmatmul.mubr.msk.f32.vlgmr.msra.gmra.mrb[10].mxu0 %vm199_vm1, %v8834_v11  ;;  %7761 = vmatpush3.msra.mxu1 %v1034_v28 }
  0xe5   : > { %7762 = vmatprep.mubr.msk.f32.mxu1 %vm8603_vm0, %v10679_v0  ;;  %v1110_v31 = vpop.permute.xlu0 %1109  ;;  %v1186_v32 = vpop.permute.xlu1 %1185  ;;  %7767 = vmatprep.mubr.msk.f32.mxu0 %vm8603_vm0, %v10679_v0 }
  0xe6   : > { %7766 = vmatpush3.msra.mxu0 %v1110_v31  ;;  %7770 = vmatprep.subr.mxu1 %v10679_v0 }
  0xe7   : > { %7763 = vmatmul.mubr.msk.f32.vlgmr.msra.gmra.mrb[10].mxu1 %vm199_vm1, %v8837_v12  ;;  %7775 = vmatprep.subr.mxu0 %v10679_v0 }
  0xe8   : > { %7768 = vmatmul.mubr.msk.f32.vlgmr.msra.gmra.mrb[12].mxu0 %vm199_vm1, %v8842_v13  ;;  %7771 = vmatpush3.msra.mxu1 %v1186_v32 }
  0xe9   : > { %7772 = vmatprep.mubr.msk.f32.mxu1 %vm8603_vm0, %v10679_v0  ;;  %v1262_v34 = vpop.permute.xlu0 %1261  ;;  %v1338_v35 = vpop.permute.xlu1 %1337  ;;  %7777 = vmatprep.mubr.msk.f32.mxu0 %vm8603_vm0, %v10679_v0 }
  0xea   : > { %7776 = vmatpush3.msra.mxu0 %v1262_v34  ;;  %7780 = vmatprep.subr.mxu1 %v10679_v0 }
  0xeb   : > { %7773 = vmatmul.mubr.msk.f32.vlgmr.msra.gmra.mrb[12].mxu1 %vm199_vm1, %v8845_v14  ;;  %8114 = vmatprep.subr.bf16.mxu0 %v8113_v33 }
  0xec   : > { %7778 = vmatmul.mubr.msk.f32.vlgmr.msra.gmra.mrb[14].mxu0 %vm199_vm1, %v8850_v15  ;;  %7781 = vmatpush3.msra.mxu1 %v1338_v35 }
  0xed   : > { %7782 = vmatprep.mubr.msk.f32.mxu1 %vm8603_vm0, %v10679_v0  ;;  %8116 = vmatpush3.bf16.msra.mxu0 %v8113_v33 }
  0xee   : > { %8118 = vmatprep.subr.bf16.mxu1 %v8117_v23 }
  0xef   : > { %7783 = vmatmul.mubr.msk.f32.vlgmr.msra.gmra.mrb[14].mxu1 %vm199_vm1, %v8853_v16 }
  0xf0   : > { %8120 = vmatpush3.bf16.msra.mxu1 %v8117_v23 }
  0xf1   : > { %8122 = vmatprep.subr.bf16.mxu1 %v8121_v26 }
  0xf4   : > { %8124 = vmatpush3.bf16.msra.mxu1 %v8121_v26 }
  0xf5   : > { %7873 = vmatprep.subr.mxu1 %v10679_v0 }
 0x1a2   : > { %v268_v36 = vpop.f32.mrb[0].mxu0 }
 0x1a3   : > { %v7709_v37 = vpop.f32.mrb[1].mxu0  ;;  %7789 = vmatprep.mubr.msk.f32.mxu0 %vm1419_vm2, %v268_v36 }
 0x1a6   : > { %v344_v38 = vpop.f32.mrb[0].mxu1 }
 0x1a7   : > { %v7714_v39 = vpop.f32.mrb[1].mxu1  ;;  %7790 = vmatmul.mubr.msk.f32.vlgmr.msra.gmra.mrb[16].mxu0 %vm1419_vm2, %v344_v38  ;;  %v420_v40 = vpop.f32.mrb[2].mxu0 }
 0x1a8   : > { %7792 = vmatprep.mubr.msk.f32.mxu0 %vm1419_vm2, %v420_v40  ;;  %v7719_v41 = vpop.f32.mrb[3].mxu0 }
 0x1aa   : > { %v496_v42 = vpop.f32.mrb[2].mxu1 }
 0x1ab   : > { %7793 = vmatmul.mubr.msk.f32.gmra.mrb[18].mxu0 %vm1419_vm2, %v496_v42  ;;  %v7724_v43 = vpop.f32.mrb[3].mxu1  ;;  %v572_v44 = vpop.f32.mrb[4].mxu0 }
 0x1ac   : > { %7795 = vmatprep.mubr.msk.f32.mxu0 %vm1419_vm2, %v572_v44  ;;  %v7729_v45 = vpop.f32.mrb[5].mxu0 }
 0x1ae   : > { %v648_v46 = vpop.f32.mrb[4].mxu1 }
 0x1af   : > { %7796 = vmatmul.mubr.msk.f32.gmra.mrb[20].mxu0 %vm1419_vm2, %v648_v46  ;;  %v7734_v47 = vpop.f32.mrb[5].mxu1  ;;  %v724_v48 = vpop.f32.mrb[6].mxu0 }
 0x1b0   : > { %7798 = vmatprep.mubr.msk.f32.mxu0 %vm1419_vm2, %v724_v48  ;;  %v7739_v49 = vpop.f32.mrb[7].mxu0 }
 0x1b2   : > { %v800_v50 = vpop.f32.mrb[6].mxu1 }
 0x1b3   : > { %7799 = vmatmul.mubr.msk.f32.gmra.mrb[22].mxu0 %vm1419_vm2, %v800_v50  ;;  %v7744_v51 = vpop.f32.mrb[7].mxu1  ;;  %v876_v52 = vpop.f32.mrb[8].mxu0 }
 0x1b4   : > { %7801 = vmatprep.mubr.msk.f32.mxu0 %vm1419_vm2, %v876_v52  ;;  %v7749_v53 = vpop.f32.mrb[9].mxu0 }
 0x1b6   : > { %v952_v54 = vpop.f32.mrb[8].mxu1 }
 0x1b7   : > { %7802 = vmatmul.mubr.msk.f32.gmra.mrb[24].mxu0 %vm1419_vm2, %v952_v54  ;;  %v7754_v55 = vpop.f32.mrb[9].mxu1  ;;  %v1028_v56 = vpop.f32.mrb[10].mxu0 }
 0x1b8   : > { %7804 = vmatprep.mubr.msk.f32.mxu0 %vm1419_vm2, %v1028_v56  ;;  %v7759_v57 = vpop.f32.mrb[11].mxu0 }
 0x1ba   : > { %v1104_v58 = vpop.f32.mrb[10].mxu1 }
 0x1bb   : > { %7805 = vmatmul.mubr.msk.f32.gmra.mrb[26].mxu0 %vm1419_vm2, %v1104_v58  ;;  %v7764_v59 = vpop.f32.mrb[11].mxu1  ;;  %v1180_v60 = vpop.f32.mrb[12].mxu0 }
 0x1bc   : > { %7807 = vmatprep.mubr.msk.f32.mxu0 %vm1419_vm2, %v1180_v60  ;;  %v7769_v61 = vpop.f32.mrb[13].mxu0 }
 0x1be   : > { %v1256_v62 = vpop.f32.mrb[12].mxu1 }
 0x1bf   : > { %7808 = vmatmul.mubr.msk.f32.gmra.mrb[28].mxu0 %vm1419_vm2, %v1256_v62  ;;  %v7774_v63 = vpop.f32.mrb[13].mxu1  ;;  %v1332_v17 = vpop.f32.mrb[14].mxu0 }
 0x1c0   : > { %7810 = vmatprep.mubr.msk.f32.mxu0 %vm1419_vm2, %v1332_v17  ;;  %v7779_v18 = vpop.f32.mrb[15].mxu0 }
 0x1c2   : > { %v1408_v19 = vpop.f32.mrb[14].mxu1 }
 0x1c3   : > { %7811 = vmatmul.mubr.msk.f32.gmra.mrb[30].mxu0 %vm1419_vm2, %v1408_v19  ;;  %v7784_v20 = vpop.f32.mrb[15].mxu1 }
 0x27a   : > { %v7791_v28 = vpop.f32.mrb[16].mxu0 }
 0x27b   : > { %v1540_v29 = vadd.f32 %v7791_v28, %v8948_v27  ;;  %v1534_v30 = vpop.f32.mrb[17].mxu0 }
 0x27c   : > { %v1535_v31 = vadd.f32 %v8948_v27, %v1534_v30  ;;  %v1849_v30 = vld [vmem:[#allocation2 + $0x48] sm:$0xff] }
 0x27e   : > { %8196 = vtanh.f32 %v1535_v31  ;;  %v7794_v32 = vpop.f32.mrb[18].mxu0 }
 0x27f   : > { %8198 = vtanh.f32 %v1540_v29  ;;  %v1550_v33 = vadd.f32 %v7794_v32, %v8948_v27  ;;  %v1544_v34 = vpop.f32.mrb[19].mxu0  ;;  %v1848_v29 = vld [vmem:[#allocation2 + $0x40] sm:$0xff]  ;;  %v6150_v32 = vsel %vm6149_vm4, %v8794_v1, 0.0 }
 0x280   : > { %v1545_v35 = vadd.f32 %v8948_v27, %v1544_v34  ;;  %v8125_v31 = vpack.c.bf16 %v1849_v30, %v1848_v29  ;;  %v6151_v34 = vrot.slane %v6150_v32, 4 }
 0x281   : > { %8200 = vtanh.f32 %v1550_v33  ;;  %v6157_v33 = vsel %vm6149_vm4, %v8802_v3, 0.0 }
 0x282   : > { %8202 = vtanh.f32 %v1545_v35  ;;  %v7797_v36 = vpop.f32.mrb[20].mxu0  ;;  %8126 = vmatprep.subr.bf16.mxu0 %v8125_v31  ;;  %v6158_v35 = vrot.slane %v6157_v33, 4 }
 0x283   : > { %v1560_v37 = vadd.f32 %v7797_v36, %v8948_v27  ;;  %v1554_v38 = vpop.f32.mrb[21].mxu0  ;;  %8128 = vmatpush3.bf16.msra.mxu0 %v8125_v31  ;;  %v6152_v36 = vadd.f32 %v6151_v34, %v6150_v32 }
 0x284   : > { %v1555_v39 = vadd.f32 %v8948_v27, %v1554_v38  ;;  %7908 = vmatprep.subr.mxu0 %v10679_v0 }
 0x285   : > { %8204 = vtanh.f32 %v1560_v37  ;;  %v6171_v37 = vsel %vm6149_vm4, %v8805_v4, 0.0  ;;  %v6153_v38 = vrot.slane %v6152_v36, 2 }
 0x286   : > { %8206 = vtanh.f32 %v1555_v39  ;;  %v7800_v40 = vpop.f32.mrb[22].mxu0  ;;  %v6159_v39 = vadd.f32 %v6158_v35, %v6157_v33 }
 0x287   : > { %v1570_v41 = vadd.f32 %v7800_v40, %v8948_v27  ;;  %v1564_v42 = vpop.f32.mrb[23].mxu0  ;;  %v6172_v40 = vrot.slane %v6171_v37, 4 }
 0x288   : > { %v8197_v43 = vpop.eup %8196  ;;  %v1565_v44 = vadd.f32 %v8948_v27, %v1564_v42  ;;  %v6154_v42 = vadd.f32 %v6153_v38, %v6152_v36  ;;  %v6248_v38 = vsel %vm6149_vm4, %v8850_v15, 0.0 }
 0x289   : > { %v8199_v45 = vpop.eup %8198  ;;  %8208 = vtanh.f32 %v1570_v41  ;;  %7821 = vmatprep.mubr.msk.f32.mxu1 %vm1638_vm3, %v8197_v43  ;;  %v6185_v41 = vsel %vm6149_vm4, %v8813_v6, 0.0 }
 0x28a   : > { %8210 = vtanh.f32 %v1565_v44  ;;  %v7803_v46 = vpop.f32.mrb[24].mxu0  ;;  %7822 = vmatmul.mubr.msk.f32.vlgmr.msra.gmra.mrb[16].mxu1 %vm1638_vm3, %v8199_v45  ;;  %v6186_v43 = vrot.slane %v6185_v41, 4  ;;  %v6199_v44 = vsel %vm6149_vm4, %v8821_v8, 0.0  ;;  %v6160_v45 = vrot.slane %v6159_v39, 2 }
 0x28b   : > { %v8201_v47 = vpop.eup %8200  ;;  %v1580_v48 = vadd.f32 %v7803_v46, %v8948_v27  ;;  %v1574_v49 = vpop.f32.mrb[25].mxu0  ;;  %v6173_v46 = vadd.f32 %v6172_v40, %v6171_v37  ;;  %v6241_v40 = vsel %vm6149_vm4, %v8845_v14, 0.0 }
 0x28c   : > { %v8203_v50 = vpop.eup %8202  ;;  %v1575_v51 = vadd.f32 %v8948_v27, %v1574_v49  ;;  %v6178_v49 = vsel %vm6149_vm4, %v8810_v5, 0.0 }
 0x28d   : > { %8212 = vtanh.f32 %v1580_v48  ;;  %7824 = vmatprep.mubr.msk.f32.mxu1 %vm1638_vm3, %v8203_v50  ;;  %v6164_v48 = vsel %vm6149_vm4, %v8797_v2, 0.0  ;;  %v6192_v50 = vsel %vm6149_vm4, %v8818_v7, 0.0 }
 0x28e   : > { %8214 = vtanh.f32 %v1575_v51  ;;  %v7806_v52 = vpop.f32.mrb[26].mxu0  ;;  %7825 = vmatmul.mubr.msk.f32.gmra.mrb[18].mxu1 %vm1638_vm3, %v8201_v47  ;;  %v6155_v47 = vrot.slane %v6154_v42, 1  ;;  %v6206_v51 = vsel %vm6149_vm4, %v8826_v9, 0.0 }
 0x28f   : > { %v8205_v53 = vpop.eup %8204  ;;  %v1590_v54 = vadd.f32 %v7806_v52, %v8948_v27  ;;  %v1584_v55 = vpop.f32.mrb[27].mxu0  ;;  %v6200_v52 = vrot.slane %v6199_v44, 4 }
 0x290   : > { %v8207_v56 = vpop.eup %8206  ;;  %v1585_v57 = vadd.f32 %v8948_v27, %v1584_v55  ;;  %v6165_v55 = vrot.slane %v6164_v48, 4 }
 0x291   : > { %8216 = vtanh.f32 %v1590_v54  ;;  %7827 = vmatprep.mubr.msk.f32.mxu1 %vm1638_vm3, %v8207_v56  ;;  %v6187_v54 = vadd.f32 %v6186_v43, %v6185_v41  ;;  %v6179_v56 = vrot.slane %v6178_v49, 4 }
 0x292   : > { %8218 = vtanh.f32 %v1585_v57  ;;  %v7809_v58 = vpop.f32.mrb[28].mxu0  ;;  %7828 = vmatmul.mubr.msk.f32.gmra.mrb[20].mxu1 %vm1638_vm3, %v8205_v53  ;;  %v6213_v53 = vsel %vm6149_vm4, %v8829_v10, 0.0  ;;  %v6193_v57 = vrot.slane %v6192_v50, 4 }
 0x293   : > { %v8209_v59 = vpop.eup %8208  ;;  %v1600_v60 = vadd.f32 %v7809_v58, %v8948_v27  ;;  %v1594_v61 = vpop.f32.mrb[29].mxu0  ;;  %v6161_v58 = vadd.f32 %v6160_v45, %v6159_v39  ;;  %v6188_v29 = vrot.slane %v6187_v54, 2  ;;  %v6214_v30 = vrot.slane %v6213_v53, 4 }
 0x294   : > { %v8211_v62 = vpop.eup %8210  ;;  %v1595_v63 = vadd.f32 %v8948_v27, %v1594_v61  ;;  %v6220_v61 = vsel %vm6149_vm4, %v8834_v11, 0.0 }
 0x295   : > { %8220 = vtanh.f32 %v1600_v60  ;;  %7830 = vmatprep.mubr.msk.f32.mxu1 %vm1638_vm3, %v8211_v62  ;;  %v6207_v60 = vrot.slane %v6206_v51, 4  ;;  %v9061_v62 = vadd.f32 %v6155_v47, %v6154_v42  ;;  %v6215_v45 = vadd.f32 %v6214_v30, %v6213_v53 }
 0x296   : > { %8222 = vtanh.f32 %v1595_v63  ;;  %v7812_v17 = vpop.f32.mrb[30].mxu0  ;;  %7831 = vmatmul.mubr.msk.f32.gmra.mrb[22].mxu1 %vm1638_vm3, %v8209_v59  ;;  %v6174_v59 = vrot.slane %v6173_v46, 2  ;;  %v6166_v63 = vadd.f32 %v6165_v55, %v6164_v48 }
 0x297   : > { %v8213_v18 = vpop.eup %8212  ;;  %v1610_v19 = vadd.f32 %v7812_v17, %v8948_v27  ;;  %v1604_v20 = vpop.f32.mrb[31].mxu0  ;;  %10750 = vst [vmem:[#allocation11_spill] sm:$0xff] %v9061_v62  ;;  %v6180_v17 = vadd.f32 %v6179_v56, %v6178_v49  ;;  %v6262_v31 = vmul.f32 %v9061_v62, %v8794_v1  ;;  %v6189_v1 = vadd.f32 %v6188_v29, %v6187_v54 }
 0x298   : > { %v8215_v21 = vpop.eup %8214  ;;  %v1605_v22 = vadd.f32 %v8948_v27, %v1604_v20  ;;  %v6208_v20 = vadd.f32 %v6207_v60, %v6206_v51  ;;  %v6249_v49 = vrot.slane %v6248_v38, 4  ;;  %v6242_v56 = vrot.slane %v6241_v40, 4 }
 0x299   : > { %8224 = vtanh.f32 %v1610_v19  ;;  %7833 = vmatprep.mubr.msk.f32.mxu1 %vm1638_vm3, %v8215_v21  ;;  %v6227_v19 = vsel %vm6149_vm4, %v8837_v12, 0.0  ;;  %v6221_v21 = vrot.slane %v6220_v61, 4  ;;  %6294 = vrot.lane.b32.xlu0 %v6262_v31, %s8606_s5  ;;  %v6190_v54 = vrot.slane %v6189_v1, 1 }
 0x29a   : > { %8226 = vtanh.f32 %v1605_v22  ;;  %7834 = vmatmul.mubr.msk.f32.gmra.mrb[24].mxu1 %vm1638_vm3, %v8213_v18  ;;  %v6194_v18 = vadd.f32 %v6193_v57, %v6192_v50  ;;  %v6234_v22 = vsel %vm6149_vm4, %v8842_v13, 0.0  ;;  %v6209_v36 = vrot.slane %v6208_v20, 2 }
 0x29b   : > { %v8217_v23 = vpop.eup %8216  ;;  %v6235_v34 = vrot.slane %v6234_v22, 4  ;;  %v6222_v37 = vadd.f32 %v6221_v21, %v6220_v61  ;;  %v6228_v39 = vrot.slane %v6227_v19, 4 }
 0x29c   : > { %v8219_v24 = vpop.eup %8218 }
 0x29d   : > { %7836 = vmatprep.mubr.msk.f32.mxu1 %vm1638_vm3, %v8219_v24  ;;  %v6167_v24 = vrot.slane %v6166_v63, 2  ;;  %v6236_v48 = vadd.f32 %v6235_v34, %v6234_v22  ;;  %v6223_v55 = vrot.slane %v6222_v37, 2 }
 0x29e   : > { %7837 = vmatmul.mubr.msk.f32.gmra.mrb[26].mxu1 %vm1638_vm3, %v8217_v23  ;;  %v6201_v23 = vadd.f32 %v6200_v52, %v6199_v44  ;;  %v6210_v52 = vadd.f32 %v6209_v36, %v6208_v20 }
 0x29f   : > { %v8221_v25 = vpop.eup %8220  ;;  %v6168_v32 = vadd.f32 %v6167_v24, %v6166_v63  ;;  %v6237_v63 = vrot.slane %v6236_v48, 2  ;;  %v6224_v21 = vadd.f32 %v6223_v55, %v6222_v37  ;;  %v9104_v24 = vadd.f32 %v6190_v54, %v6189_v1 }
 0x2a0   : > { %v8223_v26 = vpop.eup %8222  ;;  %v6202_v44 = vrot.slane %v6201_v23, 2  ;;  %v6211_v20 = vrot.slane %v6210_v52, 1 }
 0x2a1   : > { %7839 = vmatprep.mubr.msk.f32.mxu1 %vm1638_vm3, %v8223_v26  ;;  %v6195_v26 = vrot.slane %v6194_v18, 2  ;;  %v6169_v41 = vrot.slane %v6168_v32, 1  ;;  %10756 = vst [vmem:[#allocation17_spill] sm:$0xff] %v9104_v24  ;;  %v6238_v29 = vadd.f32 %v6237_v63, %v6236_v48  ;;  %v6267_v31 = vmul.f32 %v9104_v24, %v8813_v6 }
 0x2a2   : > { %7840 = vmatmul.mubr.msk.f32.gmra.mrb[28].mxu1 %vm1638_vm3, %v8221_v25  ;;  %v6181_v25 = vrot.slane %v6180_v17, 2  ;;  %v6203_v57 = vadd.f32 %v6202_v44, %v6201_v23  ;;  %v6243_v23 = vadd.f32 %v6242_v56, %v6241_v40 }
 0x2a3   : > { %v8225_v28 = vpop.eup %8224  ;;  %v6196_v35 = vadd.f32 %v6195_v26, %v6194_v18  ;;  %v9083_v47 = vadd.f32 %v6169_v41, %v6168_v32 }
 0x2a4   : > { %v8227_v27 = vpop.eup %8226  ;;  %v6182_v33 = vadd.f32 %v6181_v25, %v6180_v17  ;;  %v6250_v17 = vadd.f32 %v6249_v49, %v6248_v38  ;;  %v6244_v30 = vrot.slane %v6243_v23, 2  ;;  %v6255_v49 = vsel %vm6149_vm4, %v8853_v16, 0.0 }
 0x2a5   : > { %7842 = vmatprep.mubr.msk.f32.mxu1 %vm1638_vm3, %v8227_v27  ;;  %v6175_v27 = vadd.f32 %v6174_v59, %v6173_v46  ;;  %10752 = vst [vmem:[#allocation13_spill] sm:$0xff] %v9083_v47  ;;  %v6197_v51 = vrot.slane %v6196_v35, 1  ;;  %v6264_v53 = vmul.f32 %v9083_v47, %v8797_v2  ;;  %v6216_v59 = vrot.slane %v6215_v45, 2 }
 0x2a6   : > { %7843 = vmatmul.mubr.msk.f32.gmra.mrb[30].mxu1 %vm1638_vm3, %v8225_v28  ;;  %v6162_v28 = vrot.slane %v6161_v58, 1  ;;  %v6183_v42 = vrot.slane %v6182_v33, 1  ;;  %v6251_v26 = vrot.slane %v6250_v17, 2 }
 0x2a7   : > { %7875 = vmatprep.mubr.msk.f32.mxu1 %vm8603_vm0, %v10679_v0  ;;  %v6176_v43 = vrot.slane %v6175_v27, 1  ;;  %6298 = vrot.lane.b32.xlu0 %v6264_v53, %s8606_s5  ;;  %v9099_v2 = vadd.f32 %v6197_v51, %v6196_v35  ;;  %v6217_v25 = vadd.f32 %v6216_v59, %v6215_v45  ;;  %v6239_v35 = vrot.slane %v6238_v29, 1 }
 0x2a8   : > { %v9081_v46 = vadd.f32 %v6162_v28, %v6161_v58  ;;  %v9086_v50 = vadd.f32 %v6183_v42, %v6182_v33  ;;  %v6229_v58 = vadd.f32 %v6228_v39, %v6227_v19  ;;  %v6204_v19 = vrot.slane %v6203_v57, 1 }
 0x2a9   : > { %v9094_v61 = vadd.f32 %v6176_v43, %v6175_v27  ;;  %10755 = vst [vmem:[#allocation16_spill] sm:$0xff] %v9099_v2  ;;  %v9109_v28 = vadd.f32 %v6211_v20, %v6210_v52  ;;  %v6225_v27 = vrot.slane %v6224_v21, 1  ;;  %v6218_v32 = vrot.slane %v6217_v25, 1 }
 0x2aa   : > { %10751 = vst [vmem:[#allocation12_spill] sm:$0xff] %v9081_v46  ;;  %10753 = vst [vmem:[#allocation14_spill] sm:$0xff] %v9086_v50  ;;  %v6263_v60 = vmul.f32 %v9081_v46, %v8802_v3  ;;  %v6266_v18 = vmul.f32 %v9086_v50, %v8810_v5  ;;  %v6230_v22 = vrot.slane %v6229_v58, 2  ;;  %v6268_v5 = vmul.f32 %v9099_v2, %v8818_v7 }
 0x2ab   : > { %10754 = vst [vmem:[#allocation15_spill] sm:$0xff] %v9094_v61  ;;  %v6265_v3 = vmul.f32 %v9094_v61, %v8805_v4  ;;  %10757 = vst [vmem:[#allocation18_spill] sm:$0xff] %v9109_v28  ;;  %v9114_v4 = vadd.f32 %v6204_v19, %v6203_v57  ;;  %v6270_v34 = vmul.f32 %v9109_v28, %v8826_v9  ;;  %v6256_v51 = vrot.slane %v6255_v49, 4  ;;  %v9182_v19 = vpop.permute.xlu1 %3701 }
 0x2ac   : > { %6296 = vrot.lane.b32.xlu1 %v6263_v60, %s8606_s5  ;;  %6302 = vrot.lane.b32.xlu0 %v6266_v18, %s8606_s5  ;;  %v6231_v33 = vadd.f32 %v6230_v22, %v6229_v58  ;;  %v9119_v7 = vadd.f32 %v6225_v27, %v6224_v21  ;;  %v6252_v36 = vadd.f32 %v6251_v26, %v6250_v17  ;;  %v6540_v52 = vmax.f32 %v9104_v24, 1.0  ;;  %v9180_v21 = vld [vmem:[#allocation2 + $0x38] ss:$0 sm:$0xff] }
 0x2ad   : > { %10758 = vst [vmem:[#allocation19_spill] sm:$0xff] %v9114_v4  ;;  %v6269_v37 = vmul.f32 %v9114_v4, %v8821_v8  ;;  %v9124_v38 = vadd.f32 %v6218_v32, %v6217_v25  ;;  %v6245_v39 = vadd.f32 %v6244_v30, %v6243_v23  ;;  %v9129_v41 = vadd.f32 %v6239_v35, %v6238_v29  ;;  %v9186_v23 = vpop.permute.xlu0 %3703 }
 0x2ae   : > { %10759 = vst [vmem:[#allocation20_spill] sm:$0xff] %v9119_v7  ;;  %v6232_v6 = vrot.slane %v6231_v33, 1  ;;  %v6272_v40 = vmul.f32 %v9119_v7, %v8834_v11  ;;  %v6253_v9 = vrot.slane %v6252_v36, 1  ;;  %v6257_v55 = vadd.f32 %v6256_v51, %v6255_v49 }
 0x2af   : > { %10760 = vst [vmem:[#allocation21_spill] sm:$0xff] %v9124_v38  ;;  %10761 = vst [vmem:[#allocation22_spill] sm:$0xff] %v9129_v41  ;;  %v6271_v42 = vmul.f32 %v9124_v38, %v8829_v10  ;;  %v6246_v8 = vrot.slane %v6245_v39, 1  ;;  %v6274_v1 = vmul.f32 %v9129_v41, %v8842_v13  ;;  %v6536_v13 = vmax.f32 %v9081_v46, 1.0  ;;  %v9194_v30 = vpop.permute.xlu1 %3765 }
 0x2b0   : > { %6300 = vrot.lane.b32.xlu1 %v6265_v3, %s8606_s5  ;;  %6306 = vrot.lane.b32.xlu0 %v6268_v5, %s8606_s5  ;;  %v9134_v43 = vadd.f32 %v6232_v6, %v6231_v33  ;;  %v9139_v44 = vadd.f32 %v6253_v9, %v6252_v36  ;;  %v6539_v56 = vmax.f32 %v9086_v50, 1.0  ;;  %v6542_v53 = vmax.f32 %v9114_v4, 1.0  ;;  %10766 = vst [vmem:[#allocation27_spill] sm:$0xff] %v9194_v30 }
 0x2b1   : > { %v9144_v45 = vadd.f32 %v6246_v8, %v6245_v39  ;;  %v6258_v54 = vrot.slane %v6257_v55, 2  ;;  %v6541_v57 = vmax.f32 %v9099_v2, 1.0  ;;  %v6544_v59 = vmax.f32 %v9124_v38, 1.0 }
 0x2b2   : > { %10762 = vst [vmem:[#allocation23_spill] sm:$0xff] %v9134_v43  ;;  %10763 = vst [vmem:[#allocation24_spill] sm:$0xff] %v9139_v44  ;;  %v6273_v11 = vmul.f32 %v9134_v43, %v8837_v12  ;;  %v6276_v10 = vmul.f32 %v9139_v44, %v8850_v15  ;;  %v6535_v12 = vmax.f32 %v9061_v62, 1.0  ;;  %v6538_v15 = vmax.f32 %v9094_v61, 1.0 }
 0x2b3   : > { %10764 = vst [vmem:[#allocation25_spill] sm:$0xff] %v9144_v45  ;;  %v6275_v48 = vmul.f32 %v9144_v45, %v8845_v14  ;;  %v6537_v14 = vmax.f32 %v9083_v47, 1.0  ;;  %v6259_v58 = vadd.f32 %v6258_v54, %v6257_v55  ;;  %v6543_v60 = vmax.f32 %v9109_v28, 1.0 }
 0x2b4   : > { %6304 = vrot.lane.b32.xlu1 %v6267_v31, %s8606_s5  ;;  %6310 = vrot.lane.b32.xlu0 %v6270_v34, %s8606_s5  ;;  %v6546_v63 = vmax.f32 %v9134_v43, 1.0  ;;  %v6545_v18 = vmax.f32 %v9119_v7, 1.0  ;;  %v6548_v20 = vmax.f32 %v9144_v45, 1.0  ;;  %v6547_v25 = vmax.f32 %v9129_v41, 1.0  ;;  %v9196_v31 = vpop.permute.xlu0 %3705 }
 0x2b5   : > { %v6260_v17 = vrot.slane %v6259_v58, 1  ;;  %v6549_v33 = vmax.f32 %v9139_v44, 1.0  ;;  %v3312_v4 = vlaneseq }
 0x2b7   : > { %v9184_v22 = vadd.f32 %v6260_v17, %v6259_v58  ;;  %v3313_v61 = vshrl.u32 %v3312_v4, 7  ;;  %v3315_v46 = vand.u32 127, %v3312_v4 }
 0x2b8   : > { %6308 = vrot.lane.b32.xlu1 %v6269_v37, %s8606_s5  ;;  %6314 = vrot.lane.b32.xlu0 %v6272_v40, %s8606_s5  ;;  %v9203_v37 = vpop.permute.xlu1 %3841  ;;  %v9205_v6 = vpop.permute.xlu0 %3917 }
 0x2b9   : > { %10765 = vst [vmem:[#allocation26_spill] sm:$0xff] %v9184_v22  ;;  %v6550_v27 = vmax.f32 %v9184_v22, 1.0  ;;  %10767 = vst [vmem:[#allocation28_spill] sm:$0xff] %v9203_v37  ;;  %v6277_v40 = vmul.f32 %v9184_v22, %v8853_v16  ;;  %vm9583_vm6 = vcmp.eq.s32.totalorder %v3313_v61, %v3315_v46 }
 0x2bc   : > { %6312 = vrot.lane.b32.xlu1 %v6271_v42, %s8606_s5  ;;  %6318 = vrot.lane.b32.xlu0 %v6274_v1, %s8606_s5  ;;  %v9212_v1 = vpop.permute.xlu1 %3707 }
 0x2c0   : > { %6316 = vrot.lane.b32.xlu1 %v6273_v11, %s8606_s5  ;;  %6322 = vrot.lane.b32.xlu0 %v6276_v10, %s8606_s5  ;;  %v9214_v11 = vpop.permute.xlu0 %3709  ;;  %v9219_v49 = vpop.permute.xlu1 %3993 }
 0x2c4   : > { %6320 = vrot.lane.b32.xlu1 %v6275_v48, %s8606_s5  ;;  %6569 = vrot.lane.b32.xlu0 %v6536_v13, %s8606_s5  ;;  %v9222_v51 = vpop.permute.xlu0 %4069 }
 0x2c8   : > { %6567 = vrot.lane.b32.xlu1 %v6535_v12, %s8606_s5  ;;  %6573 = vrot.lane.b32.xlu0 %v6538_v15, %s8606_s5 }
 0x2cc   : > { %6571 = vrot.lane.b32.xlu1 %v6537_v14, %s8606_s5  ;;  %6577 = vrot.lane.b32.xlu0 %v6540_v52, %s8606_s5 }
 0x2d0   : > { %6575 = vrot.lane.b32.xlu1 %v6539_v56, %s8606_s5  ;;  %6581 = vrot.lane.b32.xlu0 %v6542_v53, %s8606_s5 }
 0x2d4   : > { %6579 = vrot.lane.b32.xlu1 %v6541_v57, %s8606_s5  ;;  %6585 = vrot.lane.b32.xlu0 %v6544_v59, %s8606_s5  ;;  %v9227_v57 = vpop.permute.xlu1 %3711  ;;  %v9230_v59 = vpop.permute.xlu0 %3713 }
 0x2d8   : > { %6583 = vrot.lane.b32.xlu1 %v6543_v60, %s8606_s5  ;;  %6589 = vrot.lane.b32.xlu0 %v6546_v63, %s8606_s5 }
 0x2dc   : > { %6587 = vrot.lane.b32.xlu1 %v6545_v18, %s8606_s5  ;;  %6593 = vrot.lane.b32.xlu0 %v6548_v20, %s8606_s5 }
 0x2e0   : > { %6591 = vrot.lane.b32.xlu1 %v6547_v25, %s8606_s5  ;;  %6597 = vrot.lane.b32.xlu0 %v6550_v27, %s8606_s5  ;;  %v9238_v25 = vpop.permute.xlu0 %4221 }
 0x2e4   : > { %6595 = vrot.lane.b32.xlu1 %v6549_v33, %s8606_s5 }
 0x2e8   : > { %6324 = vrot.lane.b32.xlu1 %v6277_v40, %s8606_s5 }
 0x35d   : > { %v7823_v3 = vpop.f32.mrb[16].mxu1 }
 0x35e   : > { %v1759_v26 = vadd.f32 %v7823_v3, %v9180_v21  ;;  %v1753_v5 = vpop.f32.mrb[17].mxu1  ;;  %v9235_v3 = vpop.permute.xlu1 %4145 }
 0x35f   : > { %v1754_v29 = vadd.f32 %v9180_v21, %v1753_v5 }
 0x361   : > { %8228 = vtanh.f32 %v1754_v29  ;;  %v7826_v32 = vpop.f32.mrb[18].mxu1 }
 0x362   : > { %8230 = vtanh.f32 %v1759_v26  ;;  %v1769_v34 = vadd.f32 %v7826_v32, %v9180_v21  ;;  %v1763_v35 = vpop.f32.mrb[19].mxu1 }
 0x363   : > { %v1764_v36 = vadd.f32 %v9180_v21, %v1763_v35  ;;  %v9246_v35 = vpop.permute.xlu0 %3717 }
 0x364   : > { %8232 = vtanh.f32 %v1769_v34  ;;  %v9243_v34 = vpop.permute.xlu1 %3715 }
 0x365   : > { %8234 = vtanh.f32 %v1764_v36  ;;  %v7829_v39 = vpop.f32.mrb[20].mxu1 }
 0x366   : > { %v1779_v9 = vadd.f32 %v7829_v39, %v9180_v21  ;;  %v1773_v42 = vpop.f32.mrb[21].mxu1 }
 0x367   : > { %v1774_v8 = vadd.f32 %v9180_v21, %v1773_v42 }
 0x368   : > { %8236 = vtanh.f32 %v1779_v9 }
 0x369   : > { %8238 = vtanh.f32 %v1774_v8  ;;  %v7832_v10 = vpop.f32.mrb[22].mxu1 }
 0x36a   : > { %v1789_v48 = vadd.f32 %v7832_v10, %v9180_v21  ;;  %v1783_v13 = vpop.f32.mrb[23].mxu1  ;;  %v9251_v10 = vpop.permute.xlu1 %4297 }
 0x36b   : > { %v8229_v12 = vpop.eup %8228  ;;  %v1784_v16 = vadd.f32 %v9180_v21, %v1783_v13 }
 0x36c   : > { %v8231_v15 = vpop.eup %8230  ;;  %8240 = vtanh.f32 %v1789_v48  ;;  %7849 = vmatprep.mubr.msk.f32.mxu0 %vm1419_vm2, %v8229_v12  ;;  %v9254_v48 = vpop.permute.xlu0 %4373 }
 0x36d   : > { %8242 = vtanh.f32 %v1784_v16  ;;  %v7835_v14 = vpop.f32.mrb[24].mxu1  ;;  %7850 = vmatmul.mubr.msk.f32.vlgmr.msra.gmra.mrb[32].mxu0 %vm1419_vm2, %v8231_v15 }
 0x36e   : > { %v8233_v52 = vpop.eup %8232  ;;  %v1799_v55 = vadd.f32 %v7835_v14, %v9180_v21  ;;  %v1793_v56 = vpop.f32.mrb[25].mxu1 }
 0x36f   : > { %v8235_v53 = vpop.eup %8234  ;;  %v1794_v54 = vadd.f32 %v9180_v21, %v1793_v56  ;;  %v9257_v16 = vpop.permute.xlu1 %3719 }
 0x370   : > { %8244 = vtanh.f32 %v1799_v55  ;;  %7852 = vmatprep.mubr.msk.f32.mxu0 %vm1419_vm2, %v8235_v53  ;;  %10768 = vst [vmem:[#allocation29_spill] sm:$0xff] %v9257_v16  ;;  %v9260_v15 = vpop.permute.xlu0 %3721 }
 0x371   : > { %8246 = vtanh.f32 %v1794_v54  ;;  %v7838_v58 = vpop.f32.mrb[26].mxu1  ;;  %7853 = vmatmul.mubr.msk.f32.gmra.mrb[34].mxu0 %vm1419_vm2, %v8233_v52  ;;  %10769 = vst [vmem:[#allocation30_spill] sm:$0xff] %v9260_v15 }
 0x372   : > { %v8237_v60 = vpop.eup %8236  ;;  %v1809_v63 = vadd.f32 %v7838_v58, %v9180_v21  ;;  %v1803_v17 = vpop.f32.mrb[27].mxu1 }
 0x373   : > { %v8239_v18 = vpop.eup %8238  ;;  %v1804_v20 = vadd.f32 %v9180_v21, %v1803_v17  ;;  %v9263_v52 = vpop.permute.xlu1 %4449 }
 0x374   : > { %8248 = vtanh.f32 %v1809_v63  ;;  %7855 = vmatprep.mubr.msk.f32.mxu0 %vm1419_vm2, %v8239_v18  ;;  %v9266_v55 = vpop.permute.xlu0 %4525 }
 0x375   : > { %8250 = vtanh.f32 %v1804_v20  ;;  %v7841_v26 = vpop.f32.mrb[28].mxu1  ;;  %7856 = vmatmul.mubr.msk.f32.gmra.mrb[36].mxu0 %vm1419_vm2, %v8237_v60  ;;  %10770 = vst [vmem:[#allocation31_spill] sm:$0xff] %v9266_v55 }
 0x376   : > { %v8241_v5 = vpop.eup %8240  ;;  %v1819_v27 = vadd.f32 %v7841_v26, %v9180_v21  ;;  %v1813_v29 = vpop.f32.mrb[29].mxu1 }
 0x377   : > { %v8243_v32 = vpop.eup %8242  ;;  %v1814_v33 = vadd.f32 %v9180_v21, %v1813_v29  ;;  %v9269_v54 = vpop.permute.xlu1 %3723 }
 0x378   : > { %8252 = vtanh.f32 %v1819_v27  ;;  %7858 = vmatprep.mubr.msk.f32.mxu0 %vm1419_vm2, %v8243_v32  ;;  %10771 = vst [vmem:[#allocation32_spill] sm:$0xff] %v9269_v54  ;;  %v9272_v58 = vpop.permute.xlu0 %3725 }
 0x379   : > { %8254 = vtanh.f32 %v1814_v33  ;;  %v7844_v36 = vpop.f32.mrb[30].mxu1  ;;  %7859 = vmatmul.mubr.msk.f32.gmra.mrb[38].mxu0 %vm1419_vm2, %v8241_v5  ;;  %10772 = vst [vmem:[#allocation33_spill] sm:$0xff] %v9272_v58 }
 0x37a   : > { %v8245_v39 = vpop.eup %8244  ;;  %v1829_v40 = vadd.f32 %v7844_v36, %v9180_v21  ;;  %v1823_v9 = vpop.f32.mrb[31].mxu1 }
 0x37b   : > { %v8247_v42 = vpop.eup %8246  ;;  %v1824_v8 = vadd.f32 %v9180_v21, %v1823_v9  ;;  %v9277_v60 = vpop.permute.xlu1 %4601 }
 0x37c   : > { %8256 = vtanh.f32 %v1829_v40  ;;  %7861 = vmatprep.mubr.msk.f32.mxu0 %vm1419_vm2, %v8247_v42  ;;  %10773 = vst [vmem:[#allocation34_spill] sm:$0xff] %v9277_v60  ;;  %v9279_v63 = vpop.permute.xlu0 %4677 }
 0x37d   : > { %8258 = vtanh.f32 %v1824_v8  ;;  %7862 = vmatmul.mubr.msk.f32.gmra.mrb[40].mxu0 %vm1419_vm2, %v8245_v39  ;;  %10774 = vst [vmem:[#allocation35_spill] sm:$0xff] %v9279_v63 }
 0x37e   : > { %v8249_v13 = vpop.eup %8248 }
 0x37f   : > { %v8251_v12 = vpop.eup %8250  ;;  %v9281_v17 = vpop.permute.xlu1 %3727 }
 0x380   : > { %7864 = vmatprep.mubr.msk.f32.mxu0 %vm1419_vm2, %v8251_v12  ;;  %10775 = vst [vmem:[#allocation36_spill] sm:$0xff] %v9281_v17  ;;  %v9283_v18 = vpop.permute.xlu0 %3729 }
 0x381   : > { %7865 = vmatmul.mubr.msk.f32.gmra.mrb[42].mxu0 %vm1419_vm2, %v8249_v13  ;;  %10776 = vst [vmem:[#allocation37_spill] sm:$0xff] %v9283_v18 }
 0x382   : > { %v8253_v21 = vpop.eup %8252 }
 0x383   : > { %v8255_v14 = vpop.eup %8254  ;;  %v9285_v20 = vpop.permute.xlu1 %4753 }
 0x384   : > { %7867 = vmatprep.mubr.msk.f32.mxu0 %vm1419_vm2, %v8255_v14  ;;  %10777 = vst [vmem:[#allocation38_spill] sm:$0xff] %v9285_v20  ;;  %v9287_v26 = vpop.permute.xlu0 %4829 }
 0x385   : > { %7868 = vmatmul.mubr.msk.f32.gmra.mrb[44].mxu0 %vm1419_vm2, %v8253_v21  ;;  %10778 = vst [vmem:[#allocation39_spill] sm:$0xff] %v9287_v26 }
 0x386   : > { %v8257_v56 = vpop.eup %8256 }
 0x387   : > { %v8259_v53 = vpop.eup %8258  ;;  %v9289_v5 = vpop.permute.xlu1 %3731 }
 0x388   : > { %7870 = vmatprep.mubr.msk.f32.mxu0 %vm1419_vm2, %v8259_v53  ;;  %10779 = vst [vmem:[#allocation40_spill] sm:$0xff] %v9289_v5  ;;  %v6295_v27 = vpop.permute.xlu0 %6294 }
 0x389   : > { %7871 = vmatmul.mubr.msk.f32.gmra.mrb[46].mxu0 %vm1419_vm2, %v8257_v56  ;;  %v6343_v29 = vsel %vm6342_vm5, %v6295_v27, 0.0 }
 0x38a   : > { %7910 = vmatprep.mubr.msk.f32.mxu0 %vm8603_vm0, %v10679_v0  ;;  %6344 = vadd.xlane.f32.xlu0 %v6343_v29 }
 0x38b   : > { %v9292_v32 = vpop.permute.xlu1 %4905 }
 0x38c   : > { %10780 = vst [vmem:[#allocation41_spill] sm:$0xff] %v9292_v32  ;;  %v6299_v33 = vpop.permute.xlu0 %6298 }
 0x38d   : > { %v6349_v36 = vsel %vm6342_vm5, %v6299_v33, 0.0 }
 0x38e   : > { %6350 = vadd.xlane.f32.xlu0 %v6349_v36 }
 0x38f   : > { %v6297_v39 = vpop.permute.xlu1 %6296 }
 0x390   : > { %v6303_v27 = vpop.permute.xlu0 %6302  ;;  %v6346_v0 = vsel %vm6342_vm5, %v6297_v39, 0.0 }
 0x391   : > { %6347 = vadd.xlane.f32.xlu1 %v6346_v0 }
 0x393   : > { %v6301_v40 = vpop.permute.xlu1 %6300 }
 0x394   : > { %v6352_v56 = vsel %vm6342_vm5, %v6301_v40, 0.0  ;;  %v6307_v36 = vpop.permute.xlu0 %6306  ;;  %v6355_v40 = vsel %vm6342_vm5, %v6303_v27, 0.0 }
 0x395   : > { %6353 = vadd.xlane.f32.xlu0 %v6352_v56  ;;  %6356 = vadd.xlane.f32.xlu1 %v6355_v40  ;;  %v6361_v41 = vsel %vm6342_vm5, %v6307_v36, 0.0 }
 0x397   : > { %v6305_v9 = vpop.permute.xlu1 %6304 }
 0x398   : > { %v6358_v29 = vsel %vm6342_vm5, %v6305_v9, 0.0  ;;  %v6311_v44 = vpop.permute.xlu0 %6310 }
 0x399   : > { %6359 = vadd.xlane.f32.xlu0 %v6358_v29  ;;  %6362 = vadd.xlane.f32.xlu1 %v6361_v41 }
 0x39b   : > { %v6309_v42 = vpop.permute.xlu1 %6308 }
 0x39c   : > { %v6364_v22 = vsel %vm6342_vm5, %v6309_v42, 0.0  ;;  %v6315_v29 = vpop.permute.xlu0 %6314  ;;  %v6367_v42 = vsel %vm6342_vm5, %v6311_v44, 0.0  ;;  %v9325_v44 = vld [vmem:[#allocation2 + $0x50] ss:$0 sm:$0xff] }
 0x39d   : > { %6365 = vadd.xlane.f32.xlu0 %v6364_v22  ;;  %6368 = vadd.xlane.f32.xlu1 %v6367_v42 }
 0x39f   : > { %v6313_v8 = vpop.permute.xlu1 %6312 }
 0x3a0   : > { %v6370_v56 = vsel %vm6342_vm5, %v6313_v8, 0.0  ;;  %v6319_v22 = vpop.permute.xlu0 %6318 }
 0x3a1   : > { %6371 = vadd.xlane.f32.xlu0 %v6370_v56  ;;  %v6379_v27 = vsel %vm6342_vm5, %v6319_v22, 0.0  ;;  %v6373_v56 = vsel %vm6342_vm5, %v6315_v29, 0.0 }
 0x3a2   : > { %6374 = vadd.xlane.f32.xlu1 %v6373_v56 }
 0x3a3   : > { %v6317_v13 = vpop.permute.xlu1 %6316 }
 0x3a4   : > { %v6376_v0 = vsel %vm6342_vm5, %v6317_v13, 0.0  ;;  %v6323_v40 = vpop.permute.xlu0 %6322 }
 0x3a5   : > { %6377 = vadd.xlane.f32.xlu0 %v6376_v0  ;;  %v6385_v41 = vsel %vm6342_vm5, %v6323_v40, 0.0 }
 0x3a7   : > { %v6321_v12 = vpop.permute.xlu1 %6320 }
 0x3a8   : > { %v6382_v36 = vsel %vm6342_vm5, %v6321_v12, 0.0 }
 0x3a9   : > { %6380 = vadd.xlane.f32.xlu0 %v6379_v27  ;;  %6383 = vadd.xlane.f32.xlu1 %v6382_v36 }
 0x3ab   : > { %v9295_v21 = vpop.permute.xlu1 %6567 }
 0x3ac   : > { %10781 = vst [vmem:[#allocation42_spill] sm:$0xff] %v9295_v21 }
 0x3ad   : > { %6386 = vadd.xlane.f32.xlu0 %v6385_v41 }
 0x3af   : > { %v9297_v14 = vpop.permute.xlu1 %6571 }
 0x3b0   : > { %10782 = vst [vmem:[#allocation43_spill] sm:$0xff] %v9297_v14 }
 0x3b3   : > { %v9300_v53 = vpop.permute.xlu1 %6575 }
 0x3b4   : > { %10783 = vst [vmem:[#allocation44_spill] sm:$0xff] %v9300_v53 }
 0x3b7   : > { %v9303_v33 = vpop.permute.xlu1 %6579 }
 0x3b8   : > { %10784 = vst [vmem:[#allocation45_spill] sm:$0xff] %v9303_v33 }
 0x3bb   : > { %v9307_v45 = vpop.permute.xlu1 %6583 }
 0x3bc   : > { %10785 = vst [vmem:[#allocation46_spill] sm:$0xff] %v9307_v45 }
 0x3bf   : > { %v9311_v9 = vpop.permute.xlu1 %6587 }
 0x3c0   : > { %10786 = vst [vmem:[#allocation47_spill] sm:$0xff] %v9311_v9 }
 0x3c3   : > { %v9315_v39 = vpop.permute.xlu1 %6591 }
 0x3c4   : > { %10787 = vst [vmem:[#allocation48_spill] sm:$0xff] %v9315_v39 }
 0x3c7   : > { %v9319_v8 = vpop.permute.xlu1 %6595 }
 0x3c8   : > { %10788 = vst [vmem:[#allocation49_spill] sm:$0xff] %v9319_v8 }
 0x3cb   : > { %v6325_v13 = vpop.permute.xlu1 %6324 }
 0x3cc   : > { %v6388_v0 = vsel %vm6342_vm5, %v6325_v13, 0.0 }
 0x3cd   : > { %6389 = vadd.xlane.f32.xlu0 %v6388_v0 }
 0x440   : > { %v7851_v22 = vpop.f32.mrb[32].mxu0 }
 0x441   : > { %v1975_v42 = vadd.f32 %v7851_v22, %v9325_v44  ;;  %v1969_v27 = vpop.f32.mrb[33].mxu0 }
 0x442   : > { %v1970_v7 = vadd.f32 %v9325_v44, %v1969_v27 }
 0x443   : > { %v7419_v29 = vmul.f32 -1.442695, %v1975_v42 }
 0x444   : > { %v7418_v56 = vmul.f32 -1.442695, %v1970_v7  ;;  %v7854_v28 = vpop.f32.mrb[34].mxu0 }
 0x445   : > { %8260 = vpow2.f32 %v7419_v29  ;;  %v1985_v40 = vadd.f32 %v7854_v28, %v9325_v44  ;;  %v1979_v41 = vpop.f32.mrb[35].mxu0 }
 0x446   : > { %8262 = vpow2.f32 %v7418_v56  ;;  %v1980_v12 = vadd.f32 %v9325_v44, %v1979_v41 }
 0x447   : > { %v7421_v13 = vmul.f32 -1.442695, %v1985_v40 }
 0x448   : > { %v7420_v36 = vmul.f32 -1.442695, %v1980_v12  ;;  %v7857_v0 = vpop.f32.mrb[36].mxu0 }
 0x449   : > { %8264 = vpow2.f32 %v7421_v13  ;;  %v1989_v2 = vpop.f32.mrb[37].mxu0  ;;  %v1995_v27 = vadd.f32 %v7857_v0, %v9325_v44 }
 0x44a   : > { %8266 = vpow2.f32 %v7420_v36  ;;  %v1990_v22 = vadd.f32 %v9325_v44, %v1989_v2 }
 0x44b   : > { %v7423_v40 = vmul.f32 -1.442695, %v1995_v27 }
 0x44c   : > { %v7422_v42 = vmul.f32 -1.442695, %v1990_v22  ;;  %v7860_v7 = vpop.f32.mrb[38].mxu0 }
 0x44d   : > { %v2005_v29 = vadd.f32 %v7860_v7, %v9325_v44  ;;  %v1999_v50 = vpop.f32.mrb[39].mxu0 }
 0x44e   : > { %8268 = vpow2.f32 %v7422_v42  ;;  %v2000_v12 = vadd.f32 %v9325_v44, %v1999_v50 }
 0x44f   : > { %v8261_v28 = vpop.eup %8260  ;;  %v7425_v56 = vmul.f32 -1.442695, %v2005_v29 }
 0x450   : > { %v8263_v47 = vpop.eup %8262  ;;  %v2097_v41 = vadd.f32 1.0, %v8261_v28  ;;  %v7863_v13 = vpop.f32.mrb[40].mxu0  ;;  %v7424_v42 = vmul.f32 -1.442695, %v2000_v12 }
 0x451   : > { %v2096_v62 = vadd.f32 1.0, %v8263_v47  ;;  %8270 = vpow2.f32 %v7425_v56  ;;  %v2015_v2 = vadd.f32 %v7863_v13, %v9325_v44  ;;  %v2009_v36 = vpop.f32.mrb[41].mxu0 }
 0x452   : > { %8272 = vrcp.f32 %v2097_v41  ;;  %v2010_v29 = vadd.f32 %v9325_v44, %v2009_v36 }
 0x453   : > { %v8265_v0 = vpop.eup %8264  ;;  %8274 = vrcp.f32 %v2096_v62  ;;  %v7427_v22 = vmul.f32 -1.442695, %v2015_v2 }
 0x454   : > { %v8267_v7 = vpop.eup %8266  ;;  %v2099_v43 = vadd.f32 1.0, %v8265_v0  ;;  %8276 = vpow2.f32 %v7423_v40  ;;  %v7866_v28 = vpop.f32.mrb[42].mxu0  ;;  %v7426_v13 = vmul.f32 -1.442695, %v2010_v29 }
 0x455   : > { %8278 = vpow2.f32 %v7427_v22  ;;  %v2025_v50 = vadd.f32 %v7866_v28, %v9325_v44  ;;  %v2019_v27 = vpop.f32.mrb[43].mxu0  ;;  %v2098_v47 = vadd.f32 1.0, %v8267_v7 }
 0x456   : > { %8280 = vrcp.f32 %v2099_v43  ;;  %v2020_v41 = vadd.f32 %v9325_v44, %v2019_v27 }
 0x457   : > { %v7429_v56 = vmul.f32 -1.442695, %v2025_v50  ;;  %8282 = vpow2.f32 %v7424_v42 }
 0x458   : > { %v7869_v62 = vpop.f32.mrb[44].mxu0  ;;  %v8269_v2 = vpop.eup %8268  ;;  %v7428_v43 = vmul.f32 -1.442695, %v2020_v41 }
 0x459   : > { %8284 = vpow2.f32 %v7429_v56  ;;  %v2035_v40 = vadd.f32 %v7869_v62, %v9325_v44  ;;  %v2029_v12 = vpop.f32.mrb[45].mxu0  ;;  %v2100_v28 = vadd.f32 1.0, %v8269_v2 }
 0x45a   : > { %8286 = vrcp.f32 %v2098_v47  ;;  %v2030_v29 = vadd.f32 %v9325_v44, %v2029_v12 }
 0x45b   : > { %v8271_v36 = vpop.eup %8270  ;;  %v7431_v0 = vmul.f32 -1.442695, %v2035_v40  ;;  %8288 = vpow2.f32 %v7426_v13  ;;  %v10791_v40 = vmov 0.0  }
 0x45c   : > { %v9340_v22 = vpop.eup %8272  ;;  %v2103_v38 = vadd.f32 1.0, %v8271_v36  ;;  %v7872_v7 = vpop.f32.mrb[46].mxu0 }
 0x45d   : > { %10789 = vst [vmem:[#allocation50_spill] sm:$0xff] %v9340_v22  ;;  %v9342_v42 = vpop.eup %8274  ;;  %8290 = vpow2.f32 %v7431_v0  ;;  %v2045_v50 = vadd.f32 %v7872_v7, %v9325_v44  ;;  %v3318_v27 = vmul.f32 %v9340_v22, %v9340_v22  ;;  %v2039_v47 = vpop.f32.mrb[47].mxu0 }
 0x45e   : > { %10790 = vst [vmem:[#allocation51_spill] sm:$0xff] %v9342_v42  ;;  %v8277_v56 = vpop.eup %8276  ;;  %8292 = vrcp.f32 %v2103_v38  ;;  %7874 = vmatpush3.xpose.msk.msra.mxu1 %vm199_vm1, %v9342_v42  ;;  %v3317_v13 = vmul.f32 %v9342_v42, %v9342_v42  ;;  %v7430_v38 = vmul.f32 -1.442695, %v2030_v29  ;;  %v2040_v7 = vadd.f32 %v9325_v44, %v2039_v47 }
 0x45f   : > { %v8279_v41 = vpop.eup %8278  ;;  %v7433_v62 = vmul.f32 -1.442695, %v2045_v50  ;;  %v3336_v2 = vsel %vm199_vm1, %v3318_v27, 0.0  ;;  %7878 = vmatprep.subr.mxu1 %v10791_v40  ;;  %8294 = vrcp.f32 %v2100_v28 }
 0x460   : > { %v9354_v12 = vpop.eup %8280  ;;  %v2105_v36 = vadd.f32 1.0, %v8279_v41  ;;  %3337 = vadd.xlane.f32.xlu1 %v3336_v2  ;;  %v3333_v0 = vsel %vm199_vm1, %v3317_v13, 0.0  ;;  %8296 = vpow2.f32 %v7428_v43  ;;  %v2101_v43 = vadd.f32 1.0, %v8277_v56 }
 0x461   : > { %10792 = vst [vmem:[#allocation52_spill] sm:$0xff] %v9354_v12  ;;  %7876 = vmatmul.mubr.msk.f32.vlgmr.msra.gmra.mrb[32].mxu1 %vm199_vm1, %v9342_v42  ;;  %3334 = vadd.xlane.f32.xlu0 %v3333_v0  ;;  %v3320_v50 = vmul.f32 %v9354_v12, %v9354_v12  ;;  %v8283_v27 = vpop.eup %8282  ;;  %v7432_v47 = vmul.f32 -1.442695, %v2040_v7  ;;  %v9569_v42 = vpop.xlane.xlu1 %6347 }
 0x462   : > { %8298 = vrcp.f32 %v2105_v36  ;;  %7879 = vmatpush3.xpose.msk.msra.mxu1 %vm199_vm1, %v9340_v22  ;;  %7880 = vmatprep.mubr.msk.f32.mxu1 %vm8603_vm0, %v10791_v40  ;;  %10821 = vst [vmem:[#allocation81_spill] sm:$0xff] %v9569_v42 }
 0x463   : > { %v8285_v28 = vpop.eup %8284  ;;  %8300 = vpow2.f32 %v7433_v62  ;;  %7883 = vmatprep.subr.mxu1 %v10791_v40  ;;  %v3342_v29 = vsel %vm199_vm1, %v3320_v50, 0.0  ;;  %v2102_v62 = vadd.f32 1.0, %v8283_v27 }
 0x464   : > { %v9368_v13 = vpop.eup %8286  ;;  %v2107_v44 = vadd.f32 1.0, %v8285_v28  ;;  %8302 = vpow2.f32 %v7430_v38 }
 0x465   : > { %10793 = vst [vmem:[#allocation53_spill] sm:$0xff] %v9368_v13  ;;  %7881 = vmatmul.mubr.msk.f32.vlgmr.msra.gmra.mrb[34].mxu1 %vm199_vm1, %v9340_v22  ;;  %3343 = vadd.xlane.f32.xlu0 %v3342_v29  ;;  %v8289_v41 = vpop.eup %8288  ;;  %v3319_v2 = vmul.f32 %v9368_v13, %v9368_v13 }
 0x466   : > { %8304 = vrcp.f32 %v2107_v44  ;;  %7884 = vmatpush3.xpose.msk.msra.mxu1 %vm199_vm1, %v9368_v13  ;;  %7885 = vmatprep.mubr.msk.f32.mxu1 %vm8603_vm0, %v10791_v40  ;;  %v2104_v50 = vadd.f32 1.0, %v8289_v41 }
 0x467   : > { %v8291_v56 = vpop.eup %8290  ;;  %8306 = vrcp.f32 %v2101_v43  ;;  %7888 = vmatprep.subr.mxu1 %v10791_v40  ;;  %v3339_v27 = vsel %vm199_vm1, %v3319_v2, 0.0 }
 0x468   : > { %v9379_v36 = vpop.eup %8292  ;;  %v2109_v0 = vadd.f32 1.0, %v8291_v56  ;;  %8308 = vpow2.f32 %v7432_v47 }
 0x469   : > { %10794 = vst [vmem:[#allocation54_spill] sm:$0xff] %v9379_v36  ;;  %7886 = vmatmul.mubr.msk.f32.vlgmr.msra.gmra.mrb[36].mxu1 %vm199_vm1, %v9368_v13  ;;  %7909 = vmatpush3.xpose.msk.msra.mxu0 %vm199_vm1, %v9379_v36  ;;  %v9385_v38 = vpop.eup %8294 }
 0x46a   : > { %10795 = vst [vmem:[#allocation55_spill] sm:$0xff] %v9385_v38  ;;  %8310 = vrcp.f32 %v2109_v0  ;;  %7889 = vmatpush3.xpose.msk.msra.mxu1 %vm199_vm1, %v9354_v12  ;;  %7890 = vmatprep.mubr.msk.f32.mxu1 %vm8603_vm0, %v10791_v40  ;;  %v8297_v7 = vpop.eup %8296 }
 0x46b   : > { %8312 = vrcp.f32 %v2102_v62  ;;  %7918 = vmatprep.subr.mxu0 %v10791_v40  ;;  %7893 = vmatprep.subr.mxu1 %v10791_v40  ;;  %v2106_v47 = vadd.f32 1.0, %v8297_v7 }
 0x46c   : > { %v9394_v28 = vpop.eup %8298  ;;  %7911 = vmatmul.mubr.msk.f32.vlgmr.msra.gmra.mrb[48].mxu0 %vm199_vm1, %v9379_v36  ;;  %3340 = vadd.xlane.f32.xlu0 %v3339_v27  ;;  %8314 = vrcp.f32 %v2104_v50  ;;  %v3321_v50 = vmul.f32 %v9385_v38, %v9385_v38 }
 0x46d   : > { %10796 = vst [vmem:[#allocation56_spill] sm:$0xff] %v9394_v28  ;;  %v8301_v43 = vpop.eup %8300  ;;  %7891 = vmatmul.mubr.msk.f32.vlgmr.msra.gmra.mrb[38].mxu1 %vm199_vm1, %v9354_v12  ;;  %7919 = vmatpush3.xpose.msk.msra.mxu0 %vm199_vm1, %v9394_v28  ;;  %v9573_v12 = vpop.xlane.xlu1 %6356 }
 0x46e   : > { %v2111_v29 = vadd.f32 1.0, %v8301_v43  ;;  %7894 = vmatpush3.xpose.msk.msra.mxu1 %vm199_vm1, %v9385_v38  ;;  %7920 = vmatprep.mubr.msk.f32.mxu0 %vm8603_vm0, %v10791_v40  ;;  %v8303_v44 = vpop.eup %8302  ;;  %10823 = vst [vmem:[#allocation83_spill] sm:$0xff] %v9573_v12 }
 0x46f   : > { %7895 = vmatprep.mubr.msk.f32.mxu1 %vm8603_vm0, %v10791_v40  ;;  %7928 = vmatprep.subr.mxu0 %v10791_v40  ;;  %v2108_v2 = vadd.f32 1.0, %v8303_v44  ;;  %v3345_v44 = vsel %vm199_vm1, %v3321_v50, 0.0 }
 0x470   : > { %v9409_v41 = vpop.eup %8304  ;;  %8316 = vrcp.f32 %v2111_v29  ;;  %7921 = vmatmul.mubr.msk.f32.vlgmr.msra.gmra.mrb[50].mxu0 %vm199_vm1, %v9394_v28  ;;  %7898 = vmatprep.subr.mxu1 %v10791_v40 }
 0x471   : > { %10797 = vst [vmem:[#allocation57_spill] sm:$0xff] %v9409_v41  ;;  %v9414_v56 = vpop.eup %8306  ;;  %7896 = vmatmul.mubr.msk.f32.vlgmr.msra.gmra.mrb[40].mxu1 %vm199_vm1, %v9385_v38  ;;  %7929 = vmatpush3.xpose.msk.msra.mxu0 %vm199_vm1, %v9409_v41  ;;  %8318 = vrcp.f32 %v2106_v47  ;;  %v3324_v38 = vmul.f32 %v9379_v36, %v9379_v36 }
 0x472   : > { %10798 = vst [vmem:[#allocation58_spill] sm:$0xff] %v9414_v56  ;;  %7899 = vmatpush3.xpose.msk.msra.mxu1 %vm199_vm1, %v9414_v56  ;;  %7930 = vmatprep.mubr.msk.f32.mxu0 %vm8603_vm0, %v10791_v40  ;;  %v8309_v62 = vpop.eup %8308  ;;  %v3322_v27 = vmul.f32 %v9414_v56, %v9414_v56  ;;  %8320 = vrcp.f32 %v2108_v2 }
 0x473   : > { %7900 = vmatprep.mubr.msk.f32.mxu1 %vm8603_vm0, %v10791_v40  ;;  %7938 = vmatprep.subr.mxu0 %v10791_v40  ;;  %v2110_v43 = vadd.f32 1.0, %v8309_v62 }
 0x474   : > { %v9427_v0 = vpop.eup %8310  ;;  %7931 = vmatmul.mubr.msk.f32.vlgmr.msra.gmra.mrb[52].mxu0 %vm199_vm1, %v9409_v41  ;;  %7903 = vmatprep.subr.mxu1 %v10791_v40  ;;  %v3348_v2 = vsel %vm199_vm1, %v3322_v27, 0.0 }
 0x475   : > { %10799 = vst [vmem:[#allocation59_spill] sm:$0xff] %v9427_v0  ;;  %v9432_v7 = vpop.eup %8312  ;;  %7901 = vmatmul.mubr.msk.f32.vlgmr.msra.gmra.mrb[42].mxu1 %vm199_vm1, %v9414_v56  ;;  %7939 = vmatpush3.xpose.msk.msra.mxu0 %vm199_vm1, %v9427_v0  ;;  %8322 = vrcp.f32 %v2110_v43  ;;  %v3354_v43 = vsel %vm199_vm1, %v3324_v38, 0.0 }
 0x476   : > { %10800 = vst [vmem:[#allocation60_spill] sm:$0xff] %v9432_v7  ;;  %7904 = vmatpush3.xpose.msk.msra.mxu1 %vm199_vm1, %v9432_v7  ;;  %7940 = vmatprep.mubr.msk.f32.mxu0 %vm8603_vm0, %v10791_v40  ;;  %v9452_v29 = vpop.eup %8314  ;;  %v3323_v47 = vmul.f32 %v9432_v7, %v9432_v7 }
 0x477   : > { %7905 = vmatprep.mubr.msk.f32.mxu1 %vm8603_vm0, %v10791_v40  ;;  %7948 = vmatprep.subr.mxu0 %v10791_v40  ;;  %10801 = vst [vmem:[#allocation61_spill] sm:$0xff] %v9452_v29 }
 0x478   : > { %7941 = vmatmul.mubr.msk.f32.vlgmr.msra.gmra.mrb[54].mxu0 %vm199_vm1, %v9427_v0  ;;  %7913 = vmatprep.subr.mxu1 %v10791_v40  ;;  %v3351_v27 = vsel %vm199_vm1, %v3323_v47, 0.0 }
 0x479   : > { %7906 = vmatmul.mubr.msk.f32.vlgmr.msra.gmra.mrb[44].mxu1 %vm199_vm1, %v9432_v7  ;;  %7950 = vmatprep.mubr.msk.f32.mxu0 %vm8603_vm0, %v10791_v40  ;;  %v3325_v7 = vmul.f32 %v9452_v29, %v9452_v29 }
 0x47a   : > { %v9461_v62 = vpop.eup %8316  ;;  %7914 = vmatpush3.xpose.msk.msra.mxu1 %vm199_vm1, %v9452_v29  ;;  %7915 = vmatprep.mubr.msk.f32.mxu1 %vm8603_vm0, %v10791_v40 }
 0x47b   : > { %10802 = vst [vmem:[#allocation62_spill] sm:$0xff] %v9461_v62  ;;  %7949 = vmatpush3.xpose.msk.msra.mxu0 %vm199_vm1, %v9461_v62  ;;  %7923 = vmatprep.subr.mxu1 %v10791_v40  ;;  %v9474_v50 = vpop.eup %8318 }
 0x47c   : > { %7958 = vmatprep.subr.mxu0 %v10791_v40  ;;  %3346 = vadd.xlane.f32.xlu1 %v3345_v44  ;;  %10803 = vst [vmem:[#allocation63_spill] sm:$0xff] %v9474_v50  ;;  %v3326_v44 = vmul.f32 %v9394_v28, %v9394_v28  ;;  %v9492_v47 = vpop.eup %8320  ;;  %v3327_v38 = vmul.f32 %v9474_v50, %v9474_v50 }
 0x47d   : > { %7916 = vmatmul.mubr.msk.f32.vlgmr.msra.gmra.mrb[46].mxu1 %vm199_vm1, %v9452_v29  ;;  %3349 = vadd.xlane.f32.xlu0 %v3348_v2  ;;  %10804 = vst [vmem:[#allocation64_spill] sm:$0xff] %v9492_v47  ;;  %v3357_v2 = vsel %vm199_vm1, %v3325_v7, 0.0 }
 0x47e   : > { %7951 = vmatmul.mubr.msk.f32.vlgmr.msra.gmra.mrb[56].mxu0 %vm199_vm1, %v9461_v62  ;;  %7924 = vmatpush3.xpose.msk.msra.mxu1 %vm199_vm1, %v9474_v50  ;;  %v3360_v29 = vsel %vm199_vm1, %v3326_v44, 0.0  ;;  %v3329_v44 = vmul.f32 %v9492_v47, %v9492_v47 }
 0x47f   : > { %7959 = vmatpush3.msra.mxu0 %v9203_v37  ;;  %7925 = vmatprep.mubr.msk.f32.mxu1 %vm8603_vm0, %v10791_v40  ;;  %v9510_v7 = vpop.eup %8322 }
 0x480   : > { %7933 = vmatprep.subr.mxu1 %v10791_v40  ;;  %3352 = vadd.xlane.f32.xlu1 %v3351_v27  ;;  %v3328_v27 = vmul.f32 %v9409_v41, %v9409_v41  ;;  %10805 = vst [vmem:[#allocation65_spill] sm:$0xff] %v9510_v7 }
 0x481   : > { %7926 = vmatmul.mubr.msk.f32.vlgmr.msra.gmra.mrb[48].mxu1 %vm199_vm1, %v9474_v50  ;;  %3355 = vadd.xlane.f32.xlu0 %v3354_v43  ;;  %v3363_v43 = vsel %vm199_vm1, %v3327_v38, 0.0  ;;  %v3330_v50 = vmul.f32 %v9427_v0, %v9427_v0  ;;  %v3331_v38 = vmul.f32 %v9510_v7, %v9510_v7 }
 0x482   : > { %7934 = vmatpush3.xpose.msk.msra.mxu1 %vm199_vm1, %v9492_v47  ;;  %7935 = vmatprep.mubr.msk.f32.mxu1 %vm8603_vm0, %v10791_v40 }
 0x483   : > { %7943 = vmatprep.subr.mxu1 %v10791_v40  ;;  %7960 = vmatprep.mubr.msk.f32.mxu0 %vm8603_vm0, %v10791_v40 }
 0x484   : > { %3358 = vadd.xlane.f32.xlu1 %v3357_v2  ;;  %7968 = vmatprep.subr.mxu0 %v10791_v40  ;;  %v3366_v2 = vsel %vm199_vm1, %v3328_v27, 0.0  ;;  %v3332_v27 = vmul.f32 %v9461_v62, %v9461_v62 }
 0x485   : > { %7936 = vmatmul.mubr.msk.f32.vlgmr.msra.gmra.mrb[50].mxu1 %vm199_vm1, %v9492_v47  ;;  %3361 = vadd.xlane.f32.xlu0 %v3360_v29  ;;  %v3369_v29 = vsel %vm199_vm1, %v3329_v44, 0.0  ;;  %v3372_v47 = vsel %vm199_vm1, %v3330_v50, 0.0 }
 0x486   : > { %7944 = vmatpush3.xpose.msk.msra.mxu1 %vm199_vm1, %v9510_v7  ;;  %7945 = vmatprep.mubr.msk.f32.mxu1 %vm8603_vm0, %v10791_v40  ;;  %v3378_v44 = vsel %vm199_vm1, %v3332_v27, 0.0 }
 0x487   : > { %7953 = vmatprep.subr.mxu1 %v10791_v40 }
 0x488   : > { %3364 = vadd.xlane.f32.xlu1 %v3363_v43  ;;  %v3375_v43 = vsel %vm199_vm1, %v3331_v38, 0.0 }
 0x489   : > { %7946 = vmatmul.mubr.msk.f32.vlgmr.msra.gmra.mrb[52].mxu1 %vm199_vm1, %v9510_v7  ;;  %3367 = vadd.xlane.f32.xlu0 %v3366_v2  ;;  %v9539_v2 = vpop.permute.xlu0 %6569 }
 0x48a   : > { %7954 = vmatpush3.msra.mxu1 %v9194_v30  ;;  %7955 = vmatprep.mubr.msk.f32.mxu1 %vm8603_vm0, %v10791_v40  ;;  %10806 = vst [vmem:[#allocation66_spill] sm:$0xff] %v9539_v2 }
 0x48b   : > { %7963 = vmatprep.subr.mxu1 %v10791_v40 }
 0x48c   : > { %3370 = vadd.xlane.f32.xlu1 %v3369_v29 }
 0x48d   : > { %3373 = vadd.xlane.f32.xlu0 %v3372_v47  ;;  %v9541_v7 = vpop.permute.xlu0 %6573 }
 0x48e   : > { %10807 = vst [vmem:[#allocation67_spill] sm:$0xff] %v9541_v7 }
 0x490   : > { %3376 = vadd.xlane.f32.xlu1 %v3375_v43 }
 0x491   : > { %3379 = vadd.xlane.f32.xlu0 %v3378_v44  ;;  %v9543_v50 = vpop.permute.xlu0 %6577 }
 0x492   : > { %10808 = vst [vmem:[#allocation68_spill] sm:$0xff] %v9543_v50 }
 0x495   : > { %v9545_v62 = vpop.permute.xlu0 %6581 }
 0x496   : > { %10809 = vst [vmem:[#allocation69_spill] sm:$0xff] %v9545_v62 }
 0x499   : > { %v9547_v0 = vpop.permute.xlu0 %6585 }
 0x49a   : > { %10810 = vst [vmem:[#allocation70_spill] sm:$0xff] %v9547_v0 }
 0x49d   : > { %v9549_v41 = vpop.permute.xlu0 %6589 }
 0x49e   : > { %10811 = vst [vmem:[#allocation71_spill] sm:$0xff] %v9549_v41 }
 0x4a1   : > { %v9551_v29 = vpop.permute.xlu0 %6593 }
 0x4a2   : > { %10812 = vst [vmem:[#allocation72_spill] sm:$0xff] %v9551_v29 }
 0x4a5   : > { %v9553_v47 = vpop.permute.xlu0 %6597 }
 0x4a6   : > { %10813 = vst [vmem:[#allocation73_spill] sm:$0xff] %v9553_v47  ;;  %v9577_v47 = vpop.xlane.xlu1 %6362 }
 0x4a7   : > { %10825 = vst [vmem:[#allocation85_spill] sm:$0xff] %v9577_v47 }
 0x4a9   : > { %v9555_v38 = vpop.xlane.xlu0 %6344 }
 0x4aa   : > { %10814 = vst [vmem:[#allocation74_spill] sm:$0xff] %v9555_v38  ;;  %v9581_v29 = vpop.xlane.xlu1 %6368 }
 0x4ab   : > { %10827 = vst [vmem:[#allocation87_spill] sm:$0xff] %v9581_v29 }
 0x4ad   : > { %v9557_v27 = vpop.xlane.xlu0 %6350 }
 0x4ae   : > { %10815 = vst [vmem:[#allocation75_spill] sm:$0xff] %v9557_v27  ;;  %v9590_v47 = vpop.xlane.xlu1 %6374 }
 0x4af   : > { %10830 = vst [vmem:[#allocation88_spill] sm:$0xff] %v9590_v47 }
 0x4b1   : > { %v9559_v43 = vpop.xlane.xlu0 %6353 }
 0x4b2   : > { %10816 = vst [vmem:[#allocation76_spill] sm:$0xff] %v9559_v43  ;;  %v9599_v47 = vpop.xlane.xlu1 %6383 }
 0x4b3   : > { %10831 = vst [vmem:[#allocation89_spill] sm:$0xff] %v9599_v47 }
 0x4b5   : > { %v9561_v44 = vpop.xlane.xlu0 %6359 }
 0x4b6   : > { %10817 = vst [vmem:[#allocation77_spill] sm:$0xff] %v9561_v44 }
 0x4b9   : > { %v9563_v28 = vpop.xlane.xlu0 %6365 }
 0x4ba   : > { %10818 = vst [vmem:[#allocation78_spill] sm:$0xff] %v9563_v28 }
 0x4bd   : > { %v9565_v13 = vpop.xlane.xlu0 %6371 }
 0x4be   : > { %10819 = vst [vmem:[#allocation79_spill] sm:$0xff] %v9565_v13 }
 0x4c1   : > { %v9567_v36 = vpop.xlane.xlu0 %6377 }
 0x4c2   : > { %10820 = vst [vmem:[#allocation80_spill] sm:$0xff] %v9567_v36 }
 0x4c5   : > { %v9571_v56 = vpop.xlane.xlu0 %6380 }
 0x4c6   : > { %10822 = vst [vmem:[#allocation82_spill] sm:$0xff] %v9571_v56 }
 0x4c9   : > { %v9575_v22 = vpop.xlane.xlu0 %6386 }
 0x4ca   : > { %10824 = vst [vmem:[#allocation84_spill] sm:$0xff] %v9575_v22 }
 0x4cd   : > { %v9579_v24 = vpop.xlane.xlu0 %6389 }
 0x4ce   : > { %10826 = vst [vmem:[#allocation86_spill] sm:$0xff] %v9579_v24 }
 0x4ee   : > { %v3335_v36 = vpop.xlane.xlu0 %3334 }
 0x4f2   : > { %v9592_v41 = vpop.xlane.xlu0 %3343 }
 0x534   : > { %v2213_v28 = vpop.f32.mrb[32].mxu1 }
 0x535   : > { %v3381_v56 = vsel %vm9583_vm6, %v2213_v28, 0.0  ;;  %v7877_v12 = vpop.f32.mrb[33].mxu1 }
 0x536   : > { %v3397_v22 = vsel %vm199_vm1, %v3381_v56, 0.0 }
 0x537   : > { %v3398_v39 = vrot.slane %v3397_v22, 4 }
 0x538   : > { %v2286_v24 = vpop.f32.mrb[34].mxu1 }
 0x539   : > { %v3399_v4 = vadd.f32 %v3398_v39, %v3397_v22  ;;  %v3382_v46 = vsel %vm9583_vm6, %v2286_v24, 0.0  ;;  %v7882_v61 = vpop.f32.mrb[35].mxu1  ;;  %v9602_v39 = vpop.xlane.xlu0 %3340  ;;  %v3526_v62 = vmul.f32 2.0, %v2286_v24 }
 0x53a   : > { %v3404_v29 = vsel %vm199_vm1, %v3382_v46, 0.0  ;;  %v3525_v46 = vmul.f32 2.0, %v2213_v28 }
 0x53b   : > { %v3400_v27 = vrot.slane %v3399_v4, 2  ;;  %v3405_v44 = vrot.slane %v3404_v29, 4 }
 0x53c   : > { %v2359_v9 = vpop.f32.mrb[36].mxu1 }
 0x53d   : > { %v3401_v0 = vadd.f32 %v3400_v27, %v3399_v4  ;;  %v3406_v12 = vadd.f32 %v3405_v44, %v3404_v29  ;;  %v3383_v56 = vsel %vm9583_vm6, %v2359_v9, 0.0  ;;  %v7887_v43 = vpop.f32.mrb[37].mxu1  ;;  %v9619_v21 = vpop.xlane.xlu0 %3349 }
 0x53e   : > { %v3411_v38 = vsel %vm199_vm1, %v3383_v56, 0.0  ;;  %v9607_v56 = vmul.f32 2.0, %v2359_v9 }
 0x53f   : > { %v3402_v22 = vrot.slane %v3401_v0, 1  ;;  %v3407_v42 = vrot.slane %v3406_v12, 2  ;;  %v3412_v61 = vrot.slane %v3411_v38, 4  ;;  %v2724_v45 = vpop.f32.mrb[48].mxu0 }
 0x540   : > { %v3388_v27 = vsel %vm9583_vm6, %v2724_v45, 0.0  ;;  %v2432_v29 = vpop.f32.mrb[38].mxu1  ;;  %v7912_v44 = vpop.f32.mrb[49].mxu0  ;;  %v9609_v7 = vmul.f32 2.0, %v2724_v45 }
 0x541   : > { %v3403_v4 = vadd.f32 %v3402_v22, %v3401_v0  ;;  %v3408_v33 = vadd.f32 %v3407_v42, %v3406_v12  ;;  %v3413_v43 = vadd.f32 %v3412_v61, %v3411_v38  ;;  %v3446_v47 = vsel %vm199_vm1, %v3388_v27, 0.0  ;;  %v7892_v50 = vpop.f32.mrb[39].mxu1 }
 0x542   : > { %v3447_v53 = vrot.slane %v3446_v47, 4  ;;  %v3384_v28 = vsel %vm9583_vm6, %v2432_v29, 0.0  ;;  %v9614_v38 = vmul.f32 2.0, %v2432_v29 }
 0x543   : > { %v3509_v24 = vadd.f32 %v3403_v4, %v3335_v36  ;;  %v3409_v14 = vrot.slane %v3408_v33, 1  ;;  %v3414_v8 = vrot.slane %v3413_v43, 2  ;;  %v3418_v2 = vsel %vm199_vm1, %v3384_v28, 0.0  ;;  %v2870_v44 = vpop.f32.mrb[50].mxu0  ;;  %v3338_v4 = vpop.xlane.xlu1 %3337 }
 0x544   : > { %v3448_v0 = vadd.f32 %v3447_v53, %v3446_v47  ;;  %v3419_v42 = vrot.slane %v3418_v2, 4  ;;  %v3390_v9 = vsel %vm9583_vm6, %v2870_v44, 0.0  ;;  %v2505_v50 = vpop.f32.mrb[40].mxu1  ;;  %v7922_v12 = vpop.f32.mrb[51].mxu0 }
 0x545   : > { %v3541_v45 = vsub.f32 %v3509_v24, %v3525_v46  ;;  %v3410_v22 = vadd.f32 %v3409_v14, %v3408_v33  ;;  %v3415_v61 = vadd.f32 %v3414_v8, %v3413_v43  ;;  %v3460_v27 = vsel %vm199_vm1, %v3390_v9, 0.0  ;;  %v7897_v36 = vpop.f32.mrb[41].mxu1 }
 0x546   : > { %v3449_v28 = vrot.slane %v3448_v0, 2  ;;  %v3420_v37 = vadd.f32 %v3419_v42, %v3418_v2  ;;  %v3461_v53 = vrot.slane %v3460_v27, 4  ;;  %v3385_v47 = vsel %vm9583_vm6, %v2505_v50, 0.0 }
 0x547   : > { %v9623_v29 = vmax.f32 %v3541_v45, 0.0  ;;  %v3510_v30 = vadd.f32 %v3410_v22, %v3338_v4  ;;  %v3416_v5 = vrot.slane %v3415_v61, 1  ;;  %v3425_v46 = vsel %vm199_vm1, %v3385_v47, 0.0  ;;  %v3016_v14 = vpop.f32.mrb[52].mxu0  ;;  %v3356_v45 = vpop.xlane.xlu0 %3355 }
 0x548   : > { %v3450_v33 = vadd.f32 %v3449_v28, %v3448_v0  ;;  %v3421_v8 = vrot.slane %v3420_v37, 2  ;;  %v3462_v43 = vadd.f32 %v3461_v53, %v3460_v27  ;;  %v3426_v24 = vrot.slane %v3425_v46, 4  ;;  %v2578_v9 = vpop.f32.mrb[42].mxu1  ;;  %v7932_v12 = vpop.f32.mrb[53].mxu0 }
 0x549   : > { %8324 = vrsqrt.f32 %v9623_v29  ;;  %v3542_v2 = vsub.f32 %v3510_v30, %v3526_v62  ;;  %v3417_v42 = vadd.f32 %v3416_v5, %v3415_v61  ;;  %v9627_v36 = vmul.f32 2.0, %v2870_v44  ;;  %v7902_v32 = vpop.f32.mrb[43].mxu1 }
 0x54a   : > { %v3451_v18 = vrot.slane %v3450_v33, 1  ;;  %v3422_v22 = vadd.f32 %v3421_v8, %v3420_v37  ;;  %v3463_v4 = vrot.slane %v3462_v43, 2  ;;  %v3427_v26 = vadd.f32 %v3426_v24, %v3425_v46 }
 0x54b   : > { %v9629_v47 = vmax.f32 %v3542_v2, 0.0  ;;  %v3511_v0 = vadd.f32 %v3417_v42, %v9602_v39  ;;  %v9632_v27 = vmul.f32 2.0, %v2505_v50  ;;  %v3392_v28 = vsel %vm9583_vm6, %v3016_v14, 0.0  ;;  %v3162_v53 = vpop.f32.mrb[54].mxu0 }
 0x54c   : > { %v3452_v30 = vadd.f32 %v3451_v18, %v3450_v33  ;;  %v3423_v5 = vrot.slane %v3422_v22, 1  ;;  %v3464_v62 = vadd.f32 %v3463_v4, %v3462_v43  ;;  %v3428_v44 = vrot.slane %v3427_v26, 2  ;;  %v9636_v32 = vpop.f32.mrb[44].mxu1  ;;  %v7942_v61 = vpop.f32.mrb[55].mxu0 }
 0x54d   : > { %v3543_v37 = vsub.f32 %v3511_v0, %v9607_v56  ;;  %v3474_v46 = vsel %vm199_vm1, %v3392_v28, 0.0  ;;  %v9640_v8 = vmul.f32 2.0, %v3016_v14  ;;  %v3386_v39 = vsel %vm9583_vm6, %v2578_v9, 0.0  ;;  %v7907_v50 = vpop.f32.mrb[45].mxu1  ;;  %v3362_v56 = vpop.xlane.xlu0 %3361 }
 0x54e   : > { %v3516_v24 = vadd.f32 %v3452_v30, %v3356_v45  ;;  %v3424_v12 = vadd.f32 %v3423_v5, %v3422_v22  ;;  %v3465_v2 = vrot.slane %v3464_v62, 1  ;;  %v3429_v18 = vadd.f32 %v3428_v44, %v3427_v26 }
 0x54f   : > { %8326 = vrsqrt.f32 %v9629_v47  ;;  %v9645_v33 = vmax.f32 %v3543_v37, 0.0  ;;  %v3475_v43 = vrot.slane %v3474_v46, 4  ;;  %v3432_v42 = vsel %vm199_vm1, %v3386_v39, 0.0 }
 0x550   : > { %v3548_v4 = vsub.f32 %v3516_v24, %v9609_v7  ;;  %v3512_v14 = vadd.f32 %v3424_v12, %v9592_v41  ;;  %v3466_v0 = vadd.f32 %v3465_v2, %v3464_v62  ;;  %v3430_v28 = vrot.slane %v3429_v18, 1  ;;  %v9650_v61 = vpop.f32.mrb[46].mxu1  ;;  %v3347_v24 = vpop.xlane.xlu1 %3346 }
 0x551   : > { %v3476_v45 = vadd.f32 %v3475_v43, %v3474_v46  ;;  %v3433_v22 = vrot.slane %v3432_v42, 4  ;;  %v9652_v30 = vmul.f32 2.0, %v2578_v9  ;;  %v3394_v26 = vsel %vm9583_vm6, %v3162_v53, 0.0  ;;  %v3308_v5 = vpop.f32.mrb[56].mxu0  ;;  %v7917_v44 = vpop.f32.mrb[47].mxu1 }
 0x552   : > { %v9656_v37 = vmax.f32 %v3548_v4, 0.0  ;;  %v3544_v39 = vsub.f32 %v3512_v14, %v9614_v38  ;;  %v3518_v7 = vadd.f32 %v3466_v0, %v3362_v56  ;;  %v3431_v50 = vadd.f32 %v3430_v28, %v3429_v18  ;;  %v7952_v41 = vpop.f32.mrb[57].mxu0 }
 0x553   : > { %v9659_v62 = vpop.eup %8324  ;;  %8328 = vrsqrt.f32 %v9645_v33  ;;  %v3477_v46 = vrot.slane %v3476_v45, 2  ;;  %v3434_v9 = vadd.f32 %v3433_v22, %v3432_v42  ;;  %v3488_v12 = vsel %vm199_vm1, %v3394_v26, 0.0 }
 0x554   : > { %8330 = vrsqrt.f32 %v9656_v37  ;;  %v9664_v2 = vmax.f32 %v3544_v39, 0.0  ;;  %v3550_v43 = vsub.f32 %v3518_v7, %v9627_v36  ;;  %v3513_v4 = vadd.f32 %v3431_v50, %v3347_v24  ;;  %v9667_v38 = vpop.f32.mrb[48].mxu1 }
 0x555   : > { %v3478_v18 = vadd.f32 %v3477_v46, %v3476_v45  ;;  %v3435_v56 = vrot.slane %v3434_v9, 2  ;;  %v3489_v14 = vrot.slane %v3488_v12, 4  ;;  %v3387_v0 = vsel %vm9583_vm6, %v9636_v32, 0.0  ;;  %v7927_v28 = vpop.f32.mrb[49].mxu1 }
 0x556   : > { %8332 = vrsqrt.f32 %v9664_v2  ;;  %v9673_v42 = vmax.f32 %v3550_v43, 0.0  ;;  %v3545_v22 = vsub.f32 %v3513_v4, %v9632_v27  ;;  %v3439_v26 = vsel %vm199_vm1, %v3387_v0, 0.0 }
 0x557   : > { %v3479_v36 = vrot.slane %v3478_v18, 1  ;;  %v3436_v44 = vadd.f32 %v3435_v56, %v3434_v9  ;;  %v3490_v39 = vadd.f32 %v3489_v14, %v3488_v12  ;;  %v3440_v7 = vrot.slane %v3439_v26, 4  ;;  %v3368_v12 = vpop.xlane.xlu0 %3367 }
 0x558   : > { %8334 = vrsqrt.f32 %v9673_v42  ;;  %v9678_v45 = vmax.f32 %v3545_v22, 0.0  ;;  %v9680_v50 = vmul.f32 2.0, %v3162_v53  ;;  %v3396_v41 = vsel %vm9583_vm6, %v3308_v5, 0.0  ;;  %v9684_v24 = vpop.f32.mrb[50].mxu1 }
 0x559   : > { %v9686_v46 = vpop.eup %8326  ;;  %v3480_v27 = vadd.f32 %v3479_v36, %v3478_v18  ;;  %v3437_v43 = vrot.slane %v3436_v44, 1  ;;  %v3491_v4 = vrot.slane %v3490_v39, 2  ;;  %v3441_v0 = vadd.f32 %v3440_v7, %v3439_v26  ;;  %v7937_v9 = vpop.f32.mrb[51].mxu1 }
 0x55a   : > { %8336 = vrsqrt.f32 %v9678_v45  ;;  %v9690_v56 = vmul.f32 2.0, %v9636_v32  ;;  %v3502_v53 = vsel %vm199_vm1, %v3396_v41, 0.0  ;;  %v3389_v14 = vsel %vm9583_vm6, %v9650_v61, 0.0  ;;  %v3353_v36 = vpop.xlane.xlu1 %3352 }
 0x55b   : > { %v3520_v28 = vadd.f32 %v3480_v27, %v3368_v12  ;;  %v3438_v22 = vadd.f32 %v3437_v43, %v3436_v44  ;;  %v3492_v17 = vadd.f32 %v3491_v4, %v3490_v39  ;;  %v3442_v18 = vrot.slane %v3441_v0, 2 }
 0x55c   : > { %v3503_v20 = vrot.slane %v3502_v53, 4  ;;  %v9696_v26 = vmul.f32 2.0, %v3308_v5  ;;  %v3453_v7 = vsel %vm199_vm1, %v3389_v14, 0.0  ;;  %v3391_v32 = vsel %vm9583_vm6, %v9667_v38, 0.0  ;;  %v9702_v9 = vpop.f32.mrb[52].mxu1 }
 0x55d   : > { %v9704_v41 = vpop.eup %8328  ;;  %v3552_v58 = vsub.f32 %v3520_v28, %v9640_v8  ;;  %v3514_v44 = vadd.f32 %v3438_v22, %v9619_v21  ;;  %v3493_v39 = vrot.slane %v3492_v17, 1  ;;  %v3443_v27 = vadd.f32 %v3442_v18, %v3441_v0  ;;  %v7947_v43 = vpop.f32.mrb[53].mxu1 }
 0x55e   : > { %v9708_v4 = vpop.eup %8330  ;;  %v3504_v5 = vadd.f32 %v3503_v20, %v3502_v53  ;;  %v3454_v12 = vrot.slane %v3453_v7, 4  ;;  %v9711_v14 = vmul.f32 2.0, %v9650_v61  ;;  %v3467_v63 = vsel %vm199_vm1, %v3391_v32, 0.0  ;;  %v3374_v21 = vpop.xlane.xlu0 %3373 }
 0x55f   : > { %v9714_v54 = vmax.f32 %v3552_v58, 0.0  ;;  %v3546_v60 = vsub.f32 %v3514_v44, %v9652_v30  ;;  %v3494_v15 = vadd.f32 %v3493_v39, %v3492_v17  ;;  %v3444_v8 = vrot.slane %v3443_v27, 1  ;;  %v3359_v17 = vpop.xlane.xlu1 %3358 }
 0x560   : > { %v9717_v28 = vpop.eup %8332  ;;  %v3505_v0 = vrot.slane %v3504_v5, 2  ;;  %v3455_v22 = vadd.f32 %v3454_v12, %v3453_v7  ;;  %v3468_v18 = vrot.slane %v3467_v63, 4  ;;  %v3393_v20 = vsel %vm9583_vm6, %v9684_v24, 0.0 }
 0x561   : > { %v9722_v61 = vmax.f32 %v3546_v60, 0.0  ;;  %v3522_v53 = vadd.f32 %v3494_v15, %v3374_v21  ;;  %v3445_v32 = vadd.f32 %v3444_v8, %v3443_v27  ;;  %v9725_v58 = vmul.f32 2.0, %v9667_v38 }
 0x562   : > { %v9727_v30 = vpop.eup %8334  ;;  %v3506_v44 = vadd.f32 %v3505_v0, %v3504_v5  ;;  %v3456_v39 = vrot.slane %v3455_v22, 2  ;;  %v3469_v43 = vadd.f32 %v3468_v18, %v3467_v63  ;;  %v3481_v7 = vsel %vm199_vm1, %v3393_v20, 0.0  ;;  %v3380_v20 = vpop.xlane.xlu0 %3379 }
 0x563   : > { %8338 = vrsqrt.f32 %v9714_v54  ;;  %v3554_v12 = vsub.f32 %v3522_v53, %v9680_v50  ;;  %v3515_v55 = vadd.f32 %v3445_v32, %v3353_v36  ;;  %v3482_v60 = vrot.slane %v3481_v7, 4  ;;  %v3365_v32 = vpop.xlane.xlu1 %3364 }
 0x564   : > { %v9732_v16 = vpop.eup %8336  ;;  %8340 = vrsqrt.f32 %v9722_v61  ;;  %v3507_v15 = vrot.slane %v3506_v44, 1  ;;  %v3457_v38 = vadd.f32 %v3456_v39, %v3455_v22  ;;  %v3470_v27 = vrot.slane %v3469_v43, 2 }
 0x565   : > { %v9735_v8 = vmax.f32 %v3554_v12, 0.0  ;;  %v3547_v5 = vsub.f32 %v3515_v55, %v9690_v56  ;;  %v3483_v63 = vadd.f32 %v3482_v60, %v3481_v7  ;;  %v3574_v21 = vmul.f32 %v9659_v62, %v9623_v29 }
 0x566   : > { %v3508_v0 = vadd.f32 %v3507_v15, %v3506_v44  ;;  %v3458_v18 = vrot.slane %v3457_v38, 1  ;;  %v3471_v50 = vadd.f32 %v3470_v27, %v3469_v43  ;;  %v3537_v36 = vmul.f32 2.0, %v9684_v24 }
 0x567   : > { %8342 = vrsqrt.f32 %v9735_v8  ;;  %v9742_v53 = vmax.f32 %v3547_v5, 0.0  ;;  %v3484_v22 = vrot.slane %v3483_v63, 2  ;;  %vm3575_vm7 = vcmp.eq.f32.partialorder %v9623_v29, inf }
 0x568   : > { %v3524_v39 = vadd.f32 %v3508_v0, %v3380_v20  ;;  %v3459_v55 = vadd.f32 %v3458_v18, %v3457_v38  ;;  %v3472_v56 = vrot.slane %v3471_v50, 1  ;;  %v3576_v7 = vsel %vm3575_vm7, %v9623_v29, %v3574_v21 }
 0x569   : > { %v3485_v62 = vadd.f32 %v3484_v22, %v3483_v63  ;;  %vm3577_vm8 = vcmp.eq.f32.partialorder %v9623_v29, 0.0  ;;  %v3578_v44 = vand.u32 2147483648, %v9623_v29  ;;  %v3395_v24 = vsel %vm9583_vm6, %v9702_v9, 0.0 }
 0x56a   : > { %v3556_v43 = vsub.f32 %v3524_v39, %v9696_v26  ;;  %v3517_v12 = vadd.f32 %v3459_v55, %v3359_v17  ;;  %v3473_v60 = vadd.f32 %v3472_v56, %v3471_v50  ;;  %v3495_v15 = vsel %vm199_vm1, %v3395_v24, 0.0  ;;  %v3371_v39 = vpop.xlane.xlu1 %3370 }
 0x56b   : > { %8344 = vrsqrt.f32 %v9742_v53  ;;  %v3486_v38 = vrot.slane %v3485_v62, 1  ;;  %v3579_v27 = vsel %vm3577_vm8, %v3578_v44, %v3576_v7  ;;  %v3496_v5 = vrot.slane %v3495_v15, 4 }
 0x56c   : > { %v9754_v63 = vmax.f32 %v3556_v43, 0.0  ;;  %v3549_v21 = vsub.f32 %v3517_v12, %v9711_v14  ;;  %v3519_v29 = vadd.f32 %v3473_v60, %v3365_v32  ;;  %v9759_v0 = vsel %vm9583_vm6, 0.0, %v3579_v27 }
 0x56d   : > { %v9761_v18 = vpop.eup %8338  ;;  %v3487_v26 = vadd.f32 %v3486_v38, %v3485_v62  ;;  %v3749_v17 = vmul.f32 %v9182_v19, %v9759_v0  ;;  %v3497_v50 = vadd.f32 %v3496_v5, %v3495_v15  ;;  %v3581_v20 = vmul.f32 %v9686_v46, %v9629_v47 }
 0x56e   : > { %v8341_v22 = vpop.eup %8340  ;;  %v9767_v55 = vmax.f32 %v3549_v21, 0.0  ;;  %v3551_v14 = vsub.f32 %v3519_v29, %v9725_v58  ;;  %v9771_v32 = vmul.f32 2.0, %v9702_v9  ;;  %vm3582_vm9 = vcmp.eq.f32.partialorder %v9629_v47, inf }
 0x56f   : > { %8346 = vrsqrt.f32 %v9754_v63  ;;  %v3521_v56 = vadd.f32 %v3487_v26, %v3371_v39  ;;  %7956 = vmatmul.mubr.msk.f32.vlgmr.msra.gmra.mrb[54].mxu1 %vm199_vm1, %v3749_v17  ;;  %v3498_v19 = vrot.slane %v3497_v50, 2  ;;  %v3583_v7 = vsel %vm3582_vm9, %v9629_v47, %v3581_v20  ;;  %v3377_v26 = vpop.xlane.xlu1 %3376 }
 0x570   : > { %v9777_v46 = vmax.f32 %v3551_v14, 0.0  ;;  %7964 = vmatpush3.msra.mxu1 %v9205_v6  ;;  %vm3584_vm10 = vcmp.eq.f32.partialorder %v9629_v47, 0.0  ;;  %v3585_v58 = vand.u32 2147483648, %v9629_v47  ;;  %7965 = vmatprep.mubr.msk.f32.mxu1 %vm8603_vm0, %v10791_v40  ;;  %v3588_v9 = vmul.f32 %v9704_v41, %v9645_v33 }
 0x571   : > { %v9786_v62 = vpop.eup %8342  ;;  %8348 = vrsqrt.f32 %v9767_v55  ;;  %v3553_v44 = vsub.f32 %v3521_v56, %v3537_v36  ;;  %v3499_v24 = vadd.f32 %v3498_v19, %v3497_v50  ;;  %7973 = vmatprep.subr.mxu1 %v10791_v40  ;;  %vm3589_vm11 = vcmp.eq.f32.partialorder %v9645_v33, inf }
 0x572   : > { %v3586_v43 = vsel %vm3584_vm10, %v3585_v58, %v3583_v7  ;;  %v3590_v12 = vsel %vm3589_vm11, %v9645_v33, %v3588_v9  ;;  %vm3591_vm12 = vcmp.eq.f32.partialorder %v9645_v33, 0.0  ;;  %v3592_v47 = vand.u32 2147483648, %v9645_v33 }
 0x573   : > { %v9794_v60 = vmax.f32 %v3553_v44, 0.0  ;;  %v3500_v41 = vrot.slane %v3499_v24, 1  ;;  %v9798_v15 = vsel %vm9583_vm6, 0.0, %v3586_v43  ;;  %v3595_v36 = vmul.f32 %v9717_v28, %v9664_v2 }
 0x574   : > { %8350 = vrsqrt.f32 %v9777_v46  ;;  %v3750_v38 = vmul.f32 %v9186_v23, %v9798_v15  ;;  %v3593_v27 = vsel %vm3591_vm12, %v3592_v47, %v3590_v12  ;;  %vm3596_vm13 = vcmp.eq.f32.partialorder %v9664_v2, inf }
 0x575   : > { %v8345_v5 = vpop.eup %8344  ;;  %v3501_v33 = vadd.f32 %v3500_v41, %v3499_v24  ;;  %v9808_v21 = vsel %vm9583_vm6, 0.0, %v3593_v27  ;;  %v3597_v29 = vsel %vm3596_vm13, %v9664_v2, %v3595_v36  ;;  %vm3598_vm14 = vcmp.eq.f32.partialorder %v9664_v2, 0.0 }
 0x576   : > { %8352 = vrsqrt.f32 %v9794_v60  ;;  %7961 = vmatmul.mubr.msk.f32.vlgmr.msra.gmra.mrb[58].mxu0 %vm199_vm1, %v3750_v38  ;;  %v3751_v23 = vmul.f32 %v9196_v31, %v9808_v21  ;;  %v3599_v28 = vand.u32 2147483648, %v9664_v2  ;;  %v3602_v17 = vmul.f32 %v9732_v16, %v9678_v45 }
 0x577   : > { %v3523_v50 = vadd.f32 %v3501_v33, %v3377_v26  ;;  %7969 = vmatpush3.msra.mxu0 %v9219_v49  ;;  %7970 = vmatprep.mubr.msk.f32.mxu0 %vm8603_vm0, %v10791_v40  ;;  %vm3603_vm15 = vcmp.eq.f32.partialorder %v9678_v45, inf  ;;  %v3606_v20 = vand.u32 2147483648, %v9678_v45  ;;  %v3609_v39 = vmul.f32 %v8341_v22, %v9722_v61 }
 0x578   : > { %7966 = vmatmul.mubr.msk.f32.vlgmr.msra.gmra.mrb[56].mxu1 %vm199_vm1, %v3751_v23  ;;  %7978 = vmatprep.subr.mxu0 %v10791_v40  ;;  %v3600_v31 = vsel %vm3598_vm14, %v3599_v28, %v3597_v29  ;;  %v3604_v2 = vsel %vm3603_vm15, %v9678_v45, %v3602_v17  ;;  %vm3605_vm2 = vcmp.eq.f32.partialorder %v9678_v45, 0.0  ;;  %vm3610_vm3 = vcmp.eq.f32.partialorder %v9722_v61, inf }
 0x579   : > { %v9830_v16 = vpop.eup %8346  ;;  %v3555_v14 = vsub.f32 %v3523_v50, %v9771_v32  ;;  %7974 = vmatpush3.msra.mxu1 %v9222_v51  ;;  %v9836_v22 = vsel %vm9583_vm6, 0.0, %v3600_v31  ;;  %7975 = vmatprep.mubr.msk.f32.mxu1 %vm8603_vm0, %v10791_v40  ;;  %v3607_v56 = vsel %vm3605_vm2, %v3606_v20, %v3604_v2  ;;  %v3611_v19 = vsel %vm3610_vm3, %v9722_v61, %v3609_v39 }
 0x57a   : > { %v3752_v45 = vmul.f32 %v9212_v1, %v9836_v22  ;;  %7983 = vmatprep.subr.mxu1 %v10791_v40  ;;  %v9846_v32 = vsel %vm9583_vm6, 0.0, %v3607_v56  ;;  %v3613_v7 = vand.u32 2147483648, %v9722_v61  ;;  %v3616_v58 = vmul.f32 %v8345_v5, %v9742_v53 }
 0x57b   : > { %v8349_v9 = vpop.eup %8348  ;;  %v9850_v44 = vmax.f32 %v3555_v14, 0.0  ;;  %v3753_v24 = vmul.f32 %v9214_v11, %v9846_v32  ;;  %vm3612_vm7 = vcmp.eq.f32.partialorder %v9722_v61, 0.0  ;;  %vm3617_vm8 = vcmp.eq.f32.partialorder %v9742_v53, inf }
 0x57c   : > { %7971 = vmatmul.mubr.msk.f32.vlgmr.msra.gmra.mrb[60].mxu0 %vm199_vm1, %v3752_v45  ;;  %v3614_v1 = vsel %vm3612_vm7, %v3613_v7, %v3611_v19  ;;  %v3618_v43 = vsel %vm3617_vm8, %v9742_v53, %v3616_v58  ;;  %v3620_v12 = vand.u32 2147483648, %v9742_v53  ;;  %v3623_v47 = vmul.f32 %v9708_v4, %v9656_v37  ;;  %v10833_v7 = vld [vmem:[#allocation31_spill] sm:$0xff] }
 0x57d   : > { %8354 = vrsqrt.f32 %v9850_v44  ;;  %7979 = vmatpush3.msra.mxu0 %v9235_v3  ;;  %7976 = vmatmul.mubr.msk.f32.vlgmr.msra.gmra.mrb[58].mxu1 %vm199_vm1, %v3753_v24  ;;  %v9866_v11 = vsel %vm9583_vm6, 0.0, %v3614_v1  ;;  %vm3619_vm9 = vcmp.eq.f32.partialorder %v9742_v53, 0.0  ;;  %vm3624_vm10 = vcmp.eq.f32.partialorder %v9656_v37, inf }
 0x57e   : > { %v8351_v61 = vpop.eup %8350  ;;  %7984 = vmatpush3.msra.mxu1 %v9238_v25  ;;  %7980 = vmatprep.mubr.msk.f32.mxu0 %vm8603_vm0, %v10791_v40  ;;  %v3754_v4 = vmul.f32 %v9227_v57, %v9866_v11  ;;  %v3621_v41 = vsel %vm3619_vm9, %v3620_v12, %v3618_v43  ;;  %v3625_v36 = vsel %vm3624_vm10, %v9656_v37, %v3623_v47  ;;  %v3627_v38 = vand.u32 2147483648, %v9656_v37  ;;  %v10835_v47 = vld [vmem:[#allocation34_spill] sm:$0xff] }
 0x57f   : > { %7988 = vmatprep.subr.mxu0 %v10791_v40  ;;  %7985 = vmatprep.mubr.msk.f32.mxu1 %vm8603_vm0, %v10791_v40  ;;  %v9882_v53 = vsel %vm9583_vm6, 0.0, %v3621_v41  ;;  %vm3626_vm11 = vcmp.eq.f32.partialorder %v9656_v37, 0.0  ;;  %v3630_v27 = vmul.f32 %v8349_v9, %v9767_v55  ;;  %vm3631_vm12 = vcmp.eq.f32.partialorder %v9767_v55, inf  ;;  %v10834_v9 = vld [vmem:[#allocation30_spill] sm:$0xff] }
 0x580   : > { %v8353_v57 = vpop.eup %8352  ;;  %7981 = vmatmul.mubr.msk.f32.vlgmr.msra.gmra.mrb[62].mxu0 %vm199_vm1, %v3754_v4  ;;  %7993 = vmatprep.subr.mxu1 %v10791_v40  ;;  %v3755_v5 = vmul.f32 %v9230_v59, %v9882_v53  ;;  %v3628_v33 = vsel %vm3626_vm11, %v3627_v38, %v3625_v36  ;;  %v3634_v29 = vand.u32 2147483648, %v9767_v55  ;;  %v3637_v26 = vmul.f32 %v9727_v30, %v9673_v42 }
 0x581   : > { %7989 = vmatpush3.msra.mxu0 %v9251_v10  ;;  %7990 = vmatprep.mubr.msk.f32.mxu0 %vm8603_vm0, %v10791_v40  ;;  %v9899_v37 = vsel %vm9583_vm6, 0.0, %v3628_v33  ;;  %v3632_v23 = vsel %vm3631_vm12, %v9767_v55, %v3630_v27  ;;  %vm3633_vm13 = vcmp.eq.f32.partialorder %v9767_v55, 0.0  ;;  %vm3638_vm14 = vcmp.eq.f32.partialorder %v9673_v42, inf  ;;  %v10837_v27 = vld [vmem:[#allocation35_spill] sm:$0xff] }
 0x582   : > { %7998 = vmatprep.subr.mxu0 %v10791_v40  ;;  %7986 = vmatmul.mubr.msk.f32.vlgmr.msra.gmra.mrb[60].mxu1 %vm199_vm1, %v3755_v5  ;;  %v3756_v59 = vmul.f32 %v9243_v34, %v9899_v37  ;;  %v3635_v30 = vsel %vm3633_vm13, %v3634_v29, %v3632_v23  ;;  %v3639_v28 = vsel %vm3638_vm14, %v9673_v42, %v3637_v26  ;;  %v3641_v17 = vand.u32 2147483648, %v9673_v42  ;;  %v10838_v5 = vld [vmem:[#allocation33_spill] sm:$0xff] }
 0x583   : > { %7994 = vmatpush3.msra.mxu1 %v9254_v48  ;;  %7995 = vmatprep.mubr.msk.f32.mxu1 %vm8603_vm0, %v10791_v40  ;;  %v9915_v55 = vsel %vm9583_vm6, 0.0, %v3635_v30  ;;  %vm3640_vm15 = vcmp.eq.f32.partialorder %v9673_v42, 0.0  ;;  %v3644_v50 = vmul.f32 %v8351_v61, %v9777_v46  ;;  %vm3645_vm2 = vcmp.eq.f32.partialorder %v9777_v46, inf }
 0x584   : > { %7991 = vmatmul.mubr.msk.f32.vlgmr.msra.gmra.mrb[64].mxu0 %vm199_vm1, %v3756_v59  ;;  %8003 = vmatprep.subr.mxu1 %v10791_v40  ;;  %v3757_v34 = vmul.f32 %v9246_v35, %v9915_v55  ;;  %v3642_v20 = vsel %vm3640_vm15, %v3641_v17, %v3639_v28  ;;  %v3648_v39 = vand.u32 2147483648, %v9777_v46  ;;  %v3651_v31 = vmul.f32 %v9761_v18, %v9714_v54  ;;  %v10832_v35 = vld [vmem:[#allocation29_spill] sm:$0xff]  ;;  %v10839_v59 = vld [vmem:[#allocation38_spill] sm:$0xff] }
 0x585   : > { %7999 = vmatpush3.msra.mxu0 %v9263_v52  ;;  %8000 = vmatprep.mubr.msk.f32.mxu0 %vm8603_vm0, %v10791_v40  ;;  %v9932_v42 = vsel %vm9583_vm6, 0.0, %v3642_v20  ;;  %v3646_v2 = vsel %vm3645_vm2, %v9777_v46, %v3644_v50  ;;  %vm3647_vm3 = vcmp.eq.f32.partialorder %v9777_v46, 0.0  ;;  %vm3652_vm7 = vcmp.eq.f32.partialorder %v9714_v54, inf  ;;  %v10841_v20 = vld [vmem:[#allocation39_spill] sm:$0xff] }
 0x586   : > { %8008 = vmatprep.subr.mxu0 %v10791_v40  ;;  %7996 = vmatmul.mubr.msk.f32.vlgmr.msra.gmra.mrb[62].mxu1 %vm199_vm1, %v3757_v34  ;;  %v3758_v18 = vmul.f32 %v10832_v35, %v9932_v42  ;;  %v3649_v14 = vsel %vm3647_vm3, %v3648_v39, %v3646_v2  ;;  %v3653_v56 = vsel %vm3652_vm7, %v9714_v54, %v3651_v31  ;;  %v3655_v19 = vand.u32 2147483648, %v9714_v54  ;;  %v10842_v39 = vld [vmem:[#allocation37_spill] sm:$0xff] }
 0x587   : > { %v8355_v45 = vpop.eup %8354  ;;  %8004 = vmatpush3.msra.mxu1 %v10833_v7  ;;  %8005 = vmatprep.mubr.msk.f32.mxu1 %vm8603_vm0, %v10791_v40  ;;  %v9948_v46 = vsel %vm9583_vm6, 0.0, %v3649_v14  ;;  %vm3654_vm8 = vcmp.eq.f32.partialorder %v9714_v54, 0.0  ;;  %v3658_v58 = vmul.f32 %v8353_v57, %v9794_v60  ;;  %vm3659_vm9 = vcmp.eq.f32.partialorder %v9794_v60, inf  ;;  %v10843_v35 = vld [vmem:[#allocation41_spill] sm:$0xff] }
 0x588   : > { %8001 = vmatmul.mubr.msk.f32.vlgmr.msra.gmra.mrb[66].mxu0 %vm199_vm1, %v3758_v18  ;;  %8013 = vmatprep.subr.mxu1 %v10791_v40  ;;  %v3759_v24 = vmul.f32 %v10834_v9, %v9948_v46  ;;  %v3656_v1 = vsel %vm3654_vm8, %v3655_v19, %v3653_v56  ;;  %v3662_v43 = vand.u32 2147483648, %v9794_v60  ;;  %v3665_v12 = vmul.f32 %v9786_v62, %v9735_v8  ;;  %v10836_v62 = vld [vmem:[#allocation32_spill] sm:$0xff]  ;;  %v10845_v56 = vld [vmem:[#allocation27_spill] sm:$0xff] }
 0x589   : > { %8009 = vmatpush3.msra.mxu0 %v10835_v47  ;;  %8010 = vmatprep.mubr.msk.f32.mxu0 %vm8603_vm0, %v10791_v40  ;;  %v9965_v54 = vsel %vm9583_vm6, 0.0, %v3656_v1  ;;  %v3660_v61 = vsel %vm3659_vm9, %v9794_v60, %v3658_v58  ;;  %vm3661_vm10 = vcmp.eq.f32.partialorder %v9794_v60, 0.0  ;;  %vm3666_vm11 = vcmp.eq.f32.partialorder %v9735_v8, inf  ;;  %v10846_v19 = vld [vmem:[#allocation28_spill] sm:$0xff] }
 0x58a   : > { %8018 = vmatprep.subr.mxu0 %v10791_v40  ;;  %8006 = vmatmul.mubr.msk.f32.vlgmr.msra.gmra.mrb[64].mxu1 %vm199_vm1, %v3759_v24  ;;  %v3760_v4 = vmul.f32 %v10836_v62, %v9965_v54  ;;  %v3663_v41 = vsel %vm3661_vm10, %v3662_v43, %v3660_v61  ;;  %v3667_v36 = vsel %vm3666_vm11, %v9735_v8, %v3665_v12  ;;  %v3669_v38 = vand.u32 2147483648, %v9735_v8  ;;  %v10847_v62 = vld [vmem:[#allocation42_spill] sm:$0xff] }
 0x58b   : > { %8014 = vmatpush3.msra.mxu1 %v10837_v27  ;;  %8015 = vmatprep.mubr.msk.f32.mxu1 %vm8603_vm0, %v10791_v40  ;;  %v9981_v60 = vsel %vm9583_vm6, 0.0, %v3663_v41  ;;  %vm3668_vm12 = vcmp.eq.f32.partialorder %v9735_v8, 0.0  ;;  %v3672_v57 = vmul.f32 %v8355_v45, %v9850_v44  ;;  %vm3673_vm13 = vcmp.eq.f32.partialorder %v9850_v44, inf }
 0x58c   : > { %8011 = vmatmul.mubr.msk.f32.vlgmr.msra.gmra.mrb[68].mxu0 %vm199_vm1, %v3760_v4  ;;  %8023 = vmatprep.subr.mxu1 %v10791_v40  ;;  %v3761_v33 = vmul.f32 %v10838_v5, %v9981_v60  ;;  %v3670_v29 = vsel %vm3668_vm12, %v3669_v38, %v3667_v36  ;;  %v3676_v26 = vand.u32 2147483648, %v9850_v44  ;;  %v3679_v23 = vmul.f32 %v9830_v16, %v9754_v63  ;;  %v10840_v16 = vld [vmem:[#allocation36_spill] sm:$0xff]  ;;  %v10848_v36 = vld [vmem:[#allocation66_spill] sm:$0xff] }
 0x58d   : > { %8019 = vmatpush3.msra.mxu0 %v10839_v59  ;;  %8020 = vmatprep.mubr.msk.f32.mxu0 %vm8603_vm0, %v10791_v40  ;;  %v9998_v8 = vsel %vm9583_vm6, 0.0, %v3670_v29  ;;  %v3674_v30 = vsel %vm3673_vm13, %v9850_v44, %v3672_v57  ;;  %vm3675_vm14 = vcmp.eq.f32.partialorder %v9850_v44, 0.0  ;;  %vm3680_vm15 = vcmp.eq.f32.partialorder %v9754_v63, inf }
 0x58e   : > { %8028 = vmatprep.subr.mxu0 %v10791_v40  ;;  %8016 = vmatmul.mubr.msk.f32.vlgmr.msra.gmra.mrb[66].mxu1 %vm199_vm1, %v3761_v33  ;;  %v3762_v28 = vmul.f32 %v10840_v16, %v9998_v8  ;;  %v3677_v17 = vsel %vm3675_vm14, %v3676_v26, %v3674_v30  ;;  %v3681_v50 = vsel %vm3680_vm15, %v9754_v63, %v3679_v23  ;;  %v3683_v34 = vand.u32 2147483648, %v9754_v63 }
 0x58f   : > { %8024 = vmatpush3.msra.mxu1 %v10841_v20  ;;  %8025 = vmatprep.mubr.msk.f32.mxu1 %vm8603_vm0, %v10791_v40  ;;  %v10014_v44 = vsel %vm9583_vm6, 0.0, %v3677_v17  ;;  %vm3682_vm2 = vcmp.eq.f32.partialorder %v9754_v63, 0.0  ;;  %v10844_v63 = vld [vmem:[#allocation40_spill] sm:$0xff]  ;;  %8356 = vrcp.f32 %v10847_v62 }
 0x590   : > { %8021 = vmatmul.mubr.msk.f32.vlgmr.msra.gmra.mrb[70].mxu0 %vm199_vm1, %v3762_v28  ;;  %8033 = vmatprep.subr.mxu1 %v10791_v40  ;;  %v3763_v31 = vmul.f32 %v10842_v39, %v10014_v44  ;;  %v3684_v2 = vsel %vm3682_vm2, %v3683_v34, %v3681_v50  ;;  %8358 = vrcp.f32 %v10848_v36 }
 0x591   : > { %8029 = vmatpush3.msra.mxu0 %v10843_v35  ;;  %8030 = vmatprep.mubr.msk.f32.mxu0 %vm8603_vm0, %v10791_v40  ;;  %v10026_v18 = vsel %vm9583_vm6, 0.0, %v3684_v2 }
 0x592   : > { %8038 = vmatprep.subr.mxu0 %v10791_v40  ;;  %8026 = vmatmul.mubr.msk.f32.vlgmr.msra.gmra.mrb[68].mxu1 %vm199_vm1, %v3763_v31  ;;  %v3764_v14 = vmul.f32 %v10844_v63, %v10026_v18 }
 0x593   : > { %8034 = vmatpush3.msra.mxu1 %v10845_v56  ;;  %8035 = vmatprep.mubr.msk.f32.mxu1 %vm8603_vm0, %v10791_v40 }
 0x594   : > { %8031 = vmatmul.mubr.msk.f32.vlgmr.msra.gmra.mrb[72].mxu0 %vm199_vm1, %v3764_v14  ;;  %8043 = vmatprep.subr.mxu1 %v10791_v40 }
 0x595   : > { %8039 = vmatpush3.msra.mxu0 %v10846_v19  ;;  %8040 = vmatprep.mubr.msk.f32.mxu0 %vm8603_vm0, %v10791_v40 }
 0x596   : > { %8048 = vmatprep.subr.mxu0 %v10791_v40  ;;  %8036 = vmatmul.mubr.msk.f32.vlgmr.msra.gmra.mrb[70].mxu1 %vm199_vm1, %v9759_v0 }
 0x597   : > { %8044 = vmatpush3.msra.mxu1 %v9205_v6  ;;  %8045 = vmatprep.mubr.msk.f32.mxu1 %vm8603_vm0, %v10791_v40 }
 0x598   : > { %8041 = vmatmul.mubr.msk.f32.vlgmr.msra.gmra.mrb[74].mxu0 %vm199_vm1, %v9798_v15  ;;  %8053 = vmatprep.subr.mxu1 %v10791_v40 }
 0x599   : > { %8049 = vmatpush3.msra.mxu0 %v9219_v49  ;;  %8050 = vmatprep.mubr.msk.f32.mxu0 %vm8603_vm0, %v10791_v40 }
 0x59a   : > { %8058 = vmatprep.subr.mxu0 %v10791_v40  ;;  %8046 = vmatmul.mubr.msk.f32.vlgmr.msra.gmra.mrb[72].mxu1 %vm199_vm1, %v9808_v21 }
 0x59b   : > { %8054 = vmatpush3.msra.mxu1 %v9222_v51  ;;  %8055 = vmatprep.mubr.msk.f32.mxu1 %vm8603_vm0, %v10791_v40 }
 0x59c   : > { %8051 = vmatmul.mubr.msk.f32.vlgmr.msra.gmra.mrb[76].mxu0 %vm199_vm1, %v9836_v22  ;;  %8063 = vmatprep.subr.mxu1 %v10791_v40 }
 0x59d   : > { %8059 = vmatpush3.msra.mxu0 %v9235_v3  ;;  %8060 = vmatprep.mubr.msk.f32.mxu0 %vm8603_vm0, %v10791_v40 }
 0x59e   : > { %8068 = vmatprep.subr.mxu0 %v10791_v40  ;;  %8056 = vmatmul.mubr.msk.f32.vlgmr.msra.gmra.mrb[74].mxu1 %vm199_vm1, %v9846_v32 }
 0x59f   : > { %8064 = vmatpush3.msra.mxu1 %v9238_v25  ;;  %8065 = vmatprep.mubr.msk.f32.mxu1 %vm8603_vm0, %v10791_v40 }
 0x5a0   : > { %8061 = vmatmul.mubr.msk.f32.vlgmr.msra.gmra.mrb[78].mxu0 %vm199_vm1, %v9866_v11  ;;  %8073 = vmatprep.subr.mxu1 %v10791_v40 }
 0x5a1   : > { %8069 = vmatpush3.msra.mxu0 %v9251_v10  ;;  %8070 = vmatprep.mubr.msk.f32.mxu0 %vm8603_vm0, %v10791_v40 }
 0x5a2   : > { %8078 = vmatprep.subr.mxu0 %v10791_v40  ;;  %8066 = vmatmul.mubr.msk.f32.vlgmr.msra.gmra.mrb[76].mxu1 %vm199_vm1, %v9882_v53 }
 0x5a3   : > { %8074 = vmatpush3.msra.mxu1 %v9254_v48  ;;  %8075 = vmatprep.mubr.msk.f32.mxu1 %vm8603_vm0, %v10791_v40 }
 0x5a4   : > { %8071 = vmatmul.mubr.msk.f32.vlgmr.msra.gmra.mrb[80].mxu0 %vm199_vm1, %v9899_v37  ;;  %8083 = vmatprep.subr.mxu1 %v10791_v40 }
 0x5a5   : > { %8079 = vmatpush3.msra.mxu0 %v9263_v52  ;;  %8080 = vmatprep.mubr.msk.f32.mxu0 %vm8603_vm0, %v10791_v40 }
 0x5a6   : > { %8088 = vmatprep.subr.mxu0 %v10791_v40  ;;  %8076 = vmatmul.mubr.msk.f32.vlgmr.msra.gmra.mrb[78].mxu1 %vm199_vm1, %v9915_v55 }
 0x5a7   : > { %8084 = vmatpush3.msra.mxu1 %v10833_v7  ;;  %8085 = vmatprep.mubr.msk.f32.mxu1 %vm8603_vm0, %v10791_v40 }
 0x5a8   : > { %8081 = vmatmul.mubr.msk.f32.vlgmr.msra.gmra.mrb[82].mxu0 %vm199_vm1, %v9932_v42  ;;  %8093 = vmatprep.subr.mxu1 %v10791_v40 }
 0x5a9   : > { %8089 = vmatpush3.msra.mxu0 %v10835_v47  ;;  %8090 = vmatprep.mubr.msk.f32.mxu0 %vm8603_vm0, %v10791_v40 }
 0x5aa   : > { %8098 = vmatprep.subr.mxu0 %v10791_v40  ;;  %8086 = vmatmul.mubr.msk.f32.vlgmr.msra.gmra.mrb[80].mxu1 %vm199_vm1, %v9948_v46 }
 0x5ab   : > { %8094 = vmatpush3.msra.mxu1 %v10837_v27  ;;  %8095 = vmatprep.mubr.msk.f32.mxu1 %vm8603_vm0, %v10791_v40 }
 0x5ac   : > { %8091 = vmatmul.mubr.msk.f32.vlgmr.msra.gmra.mrb[84].mxu0 %vm199_vm1, %v9965_v54  ;;  %8103 = vmatprep.subr.mxu1 %v10791_v40 }
 0x5ad   : > { %8099 = vmatpush3.msra.mxu0 %v10839_v59  ;;  %8100 = vmatprep.mubr.msk.f32.mxu0 %vm8603_vm0, %v10791_v40 }
 0x5ae   : > { %8108 = vmatprep.subr.mxu0 %v10791_v40  ;;  %8096 = vmatmul.mubr.msk.f32.vlgmr.msra.gmra.mrb[82].mxu1 %vm199_vm1, %v9981_v60 }
 0x5af   : > { %8104 = vmatpush3.msra.mxu1 %v10841_v20  ;;  %8105 = vmatprep.mubr.msk.f32.mxu1 %vm8603_vm0, %v10791_v40 }
 0x5b0   : > { %8101 = vmatmul.mubr.msk.f32.vlgmr.msra.gmra.mrb[86].mxu0 %vm199_vm1, %v9998_v8  ;;  %v8357_v8 = vpop.eup %8356 }
 0x5b1   : > { %8109 = vmatpush3.msra.mxu0 %v10843_v35  ;;  %8110 = vmatprep.mubr.msk.f32.mxu0 %vm8603_vm0, %v10791_v40  ;;  %v8359_v17 = vpop.eup %8358 }
 0x5b2   : > { %8106 = vmatmul.mubr.msk.f32.vlgmr.msra.gmra.mrb[84].mxu1 %vm199_vm1, %v10014_v44 }
 0x5b4   : > { %8111 = vmatmul.mubr.msk.f32.vlgmr.msra.gmra.mrb[88].mxu0 %vm199_vm1, %v10026_v18 }
 0x642   : > { %v3837_v13 = vpop.f32.mrb[54].mxu1 }
 0x643   : > { %7127 = vrot.lane.b32.xlu1 %v3837_v13, %s8607_s27  ;;  %v7957_v0 = vpop.f32.mrb[55].mxu1 }
 0x649   : > { %v10128_v15 = vpop.f32.mrb[58].mxu0 }
 0x64a   : > { %v7962_v21 = vpop.f32.mrb[59].mxu0 }
 0x64b   : > { %v10130_v22 = vpop.f32.mrb[56].mxu1 }
 0x64c   : > { %v7967_v32 = vpop.f32.mrb[57].mxu1 }
 0x64f   : > { %v10132_v11 = vpop.f32.mrb[60].mxu0 }
 0x650   : > { %v7972_v40 = vpop.f32.mrb[61].mxu0  ;;  %v10134_v53 = vpop.f32.mrb[58].mxu1 }
 0x651   : > { %v7977_v37 = vpop.f32.mrb[59].mxu1 }
 0x653   : > { %v10136_v55 = vpop.f32.mrb[62].mxu0 }
 0x654   : > { %v7982_v42 = vpop.f32.mrb[63].mxu0 }
 0x655   : > { %v10138_v45 = vpop.f32.mrb[60].mxu1 }
 0x656   : > { %v7987_v46 = vpop.f32.mrb[61].mxu1 }
 0x657   : > { %v10140_v58 = vpop.f32.mrb[64].mxu0 }
 0x658   : > { %v7992_v9 = vpop.f32.mrb[65].mxu0 }
 0x659   : > { %v10142_v24 = vpop.f32.mrb[62].mxu1  ;;  %v10849_v9 = vld [vmem:[#allocation49_spill] sm:$0xff] }
 0x65a   : > { %v7997_v1 = vpop.f32.mrb[63].mxu1  ;;  %8360 = vrcp.f32 %v10849_v9  ;;  %v10851_v9 = vld [vmem:[#allocation67_spill] sm:$0xff] }
 0x65b   : > { %v10144_v43 = vpop.f32.mrb[66].mxu0 }
 0x65c   : > { %v8002_v12 = vpop.f32.mrb[67].mxu0 }
 0x65d   : > { %v10146_v54 = vpop.f32.mrb[64].mxu1 }
 0x65e   : > { %v8007_v61 = vpop.f32.mrb[65].mxu1 }
 0x65f   : > { %v10149_v4 = vpop.f32.mrb[68].mxu0 }
 0x660   : > { %v8012_v41 = vpop.f32.mrb[69].mxu0 }
 0x661   : > { %v10152_v38 = vpop.f32.mrb[66].mxu1 }
 0x662   : > { %v8017_v60 = vpop.f32.mrb[67].mxu1 }
 0x663   : > { %v10154_v57 = vpop.f32.mrb[70].mxu0 }
 0x664   : > { %v8022_v5 = vpop.f32.mrb[71].mxu0 }
 0x665   : > { %v10156_v33 = vpop.f32.mrb[68].mxu1 }
 0x666   : > { %v8027_v29 = vpop.f32.mrb[69].mxu1 }
 0x667   : > { %v10158_v26 = vpop.f32.mrb[72].mxu0 }
 0x668   : > { %v8032_v23 = vpop.f32.mrb[73].mxu0 }
 0x669   : > { %v5050_v30 = vpop.f32.mrb[70].mxu1 }
 0x66a   : > { %v6616_v16 = vmul.f32 %v8357_v8, %v5050_v30  ;;  %v8037_v28 = vpop.f32.mrb[71].mxu1  ;;  %v8361_v8 = vpop.eup %8360 }
 0x66b   : > { %v5123_v50 = vpop.f32.mrb[74].mxu0 }
 0x66c   : > { %v6618_v34 = vmul.f32 %v8359_v17, %v5123_v50  ;;  %v8042_v44 = vpop.f32.mrb[75].mxu0  ;;  %6695 = vrot.lane.b32.xlu1 %v6616_v16, %s8608_s22 }
 0x66d   : > { %v5196_v39 = vpop.f32.mrb[72].mxu1  ;;  %v6392_v44 = vmul.f32 %v5123_v50, %v10846_v19 }
 0x66e   : > { %6697 = vrot.lane.b32.xlu0 %v6618_v34, %s8608_s22  ;;  %v8047_v31 = vpop.f32.mrb[73].mxu1 }
 0x66f   : > { %v5269_v2 = vpop.f32.mrb[76].mxu0 }
 0x670   : > { %v8052_v18 = vpop.f32.mrb[77].mxu0 }
 0x671   : > { %v10162_v63 = vpop.f32.mrb[74].mxu1  ;;  %v6391_v18 = vmul.f32 %v5050_v30, %v10845_v56 }
 0x672   : > { %v8057_v14 = vpop.f32.mrb[75].mxu1 }
 0x673   : > { %v5415_v13 = vpop.f32.mrb[78].mxu0  ;;  %v6394_v14 = vmul.f32 %v5269_v2, %v9219_v49 }
 0x674   : > { %v8062_v0 = vpop.f32.mrb[79].mxu0 }
 0x675   : > { %v10164_v21 = vpop.f32.mrb[76].mxu1  ;;  %v6410_v0 = vsel %vm6342_vm5, %v6392_v44, 0.0 }
 0x676   : > { %v8067_v32 = vpop.f32.mrb[77].mxu1 }
 0x677   : > { %v10166_v40 = vpop.f32.mrb[80].mxu0  ;;  %v6407_v32 = vsel %vm6342_vm5, %v6391_v18, 0.0 }
 0x678   : > { %v8072_v37 = vpop.f32.mrb[81].mxu0 }
 0x679   : > { %v10168_v42 = vpop.f32.mrb[78].mxu1  ;;  %v6416_v37 = vsel %vm6342_vm5, %v6394_v14, 0.0 }
 0x67a   : > { %v8077_v46 = vpop.f32.mrb[79].mxu1 }
 0x67b   : > { %v10171_v1 = vpop.f32.mrb[82].mxu0  ;;  %v10850_v46 = vld [vmem:[#allocation43_spill] sm:$0xff] }
 0x67c   : > { %v8082_v12 = vpop.f32.mrb[83].mxu0  ;;  %8362 = vrcp.f32 %v10850_v46 }
 0x67d   : > { %v10173_v61 = vpop.f32.mrb[80].mxu1  ;;  %8364 = vrcp.f32 %v10851_v9  ;;  %v10852_v12 = vld [vmem:[#allocation44_spill] sm:$0xff]  ;;  %v10858_v9 = vld [vmem:[#allocation74_spill] sm:$0xff] }
 0x67e   : > { %v8087_v62 = vpop.f32.mrb[81].mxu1  ;;  %8366 = vrcp.f32 %v10852_v12  ;;  %v7498_v12 = vadd.f32 -1.0, %v10858_v9 }
 0x67f   : > { %v10175_v41 = vpop.f32.mrb[84].mxu0 }
 0x680   : > { %v8092_v36 = vpop.f32.mrb[85].mxu0 }
 0x681   : > { %v10177_v60 = vpop.f32.mrb[82].mxu1  ;;  %v6396_v36 = vmul.f32 %v5415_v13, %v9235_v3  ;;  %v6395_v3 = vmul.f32 %v10162_v63, %v9222_v51 }
 0x682   : > { %v8097_v5 = vpop.f32.mrb[83].mxu1 }
 0x683   : > { %v10179_v29 = vpop.f32.mrb[86].mxu0  ;;  %v6393_v5 = vmul.f32 %v5196_v39, %v9205_v6  ;;  %v6398_v6 = vmul.f32 %v10166_v40, %v9251_v10 }
 0x684   : > { %v8102_v23 = vpop.f32.mrb[87].mxu0 }
 0x685   : > { %v10181_v16 = vpop.f32.mrb[84].mxu1  ;;  %v6422_v23 = vsel %vm6342_vm5, %v6396_v36, 0.0 }
 0x686   : > { %v10184_v28 = vmul.f32 %v8361_v8, %v10181_v16  ;;  %v8107_v17 = vpop.f32.mrb[85].mxu1  ;;  %v8363_v19 = vpop.eup %8362  ;;  %v6413_v8 = vsel %vm6342_vm5, %v6393_v5, 0.0 }
 0x687   : > { %v10186_v34 = vpop.f32.mrb[88].mxu0  ;;  %v6620_v50 = vmul.f32 %v8363_v19, %v5196_v39  ;;  %v8365_v49 = vpop.eup %8364  ;;  %v10853_v17 = vld [vmem:[#allocation68_spill] sm:$0xff]  ;;  %v6428_v39 = vsel %vm6342_vm5, %v6398_v6, 0.0 }
 0x688   : > { %v8112_v31 = vpop.f32.mrb[89].mxu0  ;;  %v6622_v56 = vmul.f32 %v8365_v49, %v5269_v2  ;;  %v8367_v30 = vpop.eup %8366  ;;  %8368 = vrcp.f32 %v10853_v17  ;;  %v10854_v2 = vld [vmem:[#allocation45_spill] sm:$0xff] }
 0x689   : > { %v6624_v62 = vmul.f32 %v8367_v30, %v10162_v63  ;;  %8370 = vrcp.f32 %v10854_v2 }
 0x68d   : > { %6411 = vadd.xlane.f32.xlu0 %v6410_v0  ;;  %v6419_v0 = vsel %vm6342_vm5, %v6395_v3, 0.0  ;;  %v6400_v3 = vmul.f32 %v10171_v1, %v9263_v52  ;;  %v10863_v52 = vld [vmem:[#allocation75_spill] sm:$0xff] }
 0x690   : > { %6408 = vadd.xlane.f32.xlu1 %v6407_v32  ;;  %v10856_v32 = vld [vmem:[#allocation46_spill] sm:$0xff] }
 0x691   : > { %6417 = vadd.xlane.f32.xlu0 %v6416_v37  ;;  %v10857_v37 = vld [vmem:[#allocation81_spill] sm:$0xff] }
 0x692   : > { %v8369_v44 = vpop.eup %8368  ;;  %v7499_v46 = vadd.f32 -1.0, %v10857_v37 }
 0x693   : > { %v6626_v31 = vmul.f32 %v8369_v44, %v5415_v13  ;;  %v8371_v18 = vpop.eup %8370  ;;  %v10855_v13 = vld [vmem:[#allocation69_spill] sm:$0xff] }
 0x694   : > { %v6628_v14 = vmul.f32 %v8371_v18, %v10164_v21  ;;  %8372 = vrcp.f32 %v10855_v13  ;;  %v6472_v49 = vmax.f32 %v7499_v46, 1.0  ;;  %v10861_v46 = vld [vmem:[#allocation47_spill] sm:$0xff] }
 0x695   : > { %8374 = vrcp.f32 %v10856_v32  ;;  %v10860_v32 = vld [vmem:[#allocation70_spill] sm:$0xff] }
 0x696   : > { %8376 = vrcp.f32 %v6472_v49 }
 0x69e   : > { %v8373_v19 = vpop.eup %8372 }
 0x69f   : > { %v6630_v51 = vmul.f32 %v8373_v19, %v10166_v40  ;;  %v8375_v63 = vpop.eup %8374  ;;  %v10862_v19 = vld [vmem:[#allocation77_spill] sm:$0xff] }
 0x6a0   : > { %v6632_v30 = vmul.f32 %v8375_v63, %v10168_v42  ;;  %v7500_v63 = vadd.f32 -1.0, %v10863_v52 }
 0x6a1   : > { %6699 = vrot.lane.b32.xlu1 %v6620_v50, %s8608_s22  ;;  %v10859_v50 = vld [vmem:[#allocation76_spill] sm:$0xff] }
 0x6a2   : > { %v7501_v10 = vadd.f32 -1.0, %v10859_v50 }
 0x6a5   : > { %6701 = vrot.lane.b32.xlu1 %v6622_v56, %s8608_s22  ;;  %v6471_v56 = vmax.f32 %v7498_v12, 1.0 }
 0x6a7   : > { %6703 = vrot.lane.b32.xlu0 %v6624_v62, %s8608_s22  ;;  %v6474_v62 = vmax.f32 %v7501_v10, 1.0  ;;  %8378 = vrcp.f32 %v6471_v56  ;;  %v7503_v10 = vadd.f32 -1.0, %v10862_v19  ;;  %v6473_v56 = vmax.f32 %v7500_v63, 1.0 }
 0x6a9   : > { %8380 = vrcp.f32 %v6474_v62 }
 0x6aa   : > { %8382 = vrcp.f32 %v10860_v32  ;;  %v10864_v32 = vld [vmem:[#allocation71_spill] sm:$0xff] }
 0x6ab   : > { %8384 = vrcp.f32 %v10861_v46  ;;  %v10865_v46 = vld [vmem:[#allocation48_spill] sm:$0xff] }
 0x6b5   : > { %v10225_v36 = vpop.permute.xlu1 %7127 }
 0x6c6   : > { %6423 = vadd.xlane.f32.xlu0 %v6422_v23 }
 0x6c9   : > { %6414 = vadd.xlane.f32.xlu1 %v6413_v8  ;;  %v8377_v8 = vpop.eup %8376 }
 0x6ca   : > { %v8379_v2 = vpop.eup %8378 }
 0x6da   : > { %6705 = vrot.lane.b32.xlu1 %v6626_v31, %s8608_s22  ;;  %v8381_v31 = vpop.eup %8380 }
 0x6db   : > { %v8383_v12 = vpop.eup %8382 }
 0x6dc   : > { %6707 = vrot.lane.b32.xlu0 %v6628_v14, %s8608_s22  ;;  %v6634_v49 = vmul.f32 %v8383_v12, %v10171_v1 }
 0x6de   : > { %v10229_v23 = vpop.permute.xlu1 %6695 }
 0x6e0   : > { %v10227_v5 = vpop.permute.xlu0 %6697 }
 0x6fb   : > { %6429 = vadd.xlane.f32.xlu0 %v6428_v39  ;;  %v6397_v39 = vmul.f32 %v10164_v21, %v9238_v25  ;;  %v6476_v21 = vmax.f32 %v7503_v10, 1.0  ;;  %v10866_v10 = vld [vmem:[#allocation78_spill] sm:$0xff] }
 0x6fd   : > { %v6425_v13 = vsel %vm6342_vm5, %v6397_v39, 0.0  ;;  %8386 = vrcp.f32 %v6476_v21  ;;  %v6399_v39 = vmul.f32 %v10168_v42, %v9254_v48 }
 0x6fe   : > { %6420 = vadd.xlane.f32.xlu1 %v6419_v0  ;;  %v6434_v0 = vsel %vm6342_vm5, %v6400_v3, 0.0  ;;  %8388 = vrcp.f32 %v6473_v56  ;;  %v6402_v3 = vmul.f32 %v10175_v41, %v10835_v47  ;;  %v10867_v47 = vld [vmem:[#allocation83_spill] sm:$0xff] }
 0x6ff   : > { %8390 = vrcp.f32 %v10864_v32 }
 0x700   : > { %8392 = vrcp.f32 %v10865_v46 }
 0x70f   : > { %6709 = vrot.lane.b32.xlu1 %v6630_v51, %s8608_s22  ;;  %v8385_v51 = vpop.eup %8384 }
 0x710   : > { %v6636_v25 = vmul.f32 %v8385_v51, %v10173_v61  ;;  %v8387_v1 = vpop.eup %8386 }
 0x711   : > { %6711 = vrot.lane.b32.xlu0 %v6632_v30, %s8608_s22 }
 0x71a   : > { %v6412_v40 = vpop.xlane.xlu0 %6411 }
 0x71b   : > { %v10231_v17 = vmul.f32 %v8377_v8, %v6412_v40 }
 0x71d   : > { %v6409_v44 = vpop.xlane.xlu1 %6408 }
 0x71e   : > { %v6418_v18 = vpop.xlane.xlu0 %6417  ;;  %v10233_v14 = vmul.f32 %v8379_v2, %v6409_v44  ;;  %v8389_v44 = vpop.eup %8388 }
 0x71f   : > { %v10235_v6 = vmul.f32 %v8381_v31, %v6418_v18  ;;  %v8391_v12 = vpop.eup %8390 }
 0x720   : > { %v6638_v51 = vmul.f32 %v8391_v12, %v10175_v41  ;;  %v8393_v63 = vpop.eup %8392  ;;  %v10868_v12 = vld [vmem:[#allocation72_spill] sm:$0xff] }
 0x721   : > { %v10251_v30 = vpop.permute.xlu1 %6699  ;;  %v6640_v48 = vmul.f32 %v8393_v63, %v10177_v60 }
 0x722   : > { %v10253_v62 = vpop.permute.xlu0 %6703 }
 0x725   : > { %v10255_v8 = vpop.permute.xlu1 %6701 }
 0x730   : > { %6435 = vadd.xlane.f32.xlu0 %v6434_v0  ;;  %v6440_v0 = vsel %vm6342_vm5, %v6402_v3, 0.0 }
 0x733   : > { %6426 = vadd.xlane.f32.xlu1 %v6425_v13  ;;  %v6431_v13 = vsel %vm6342_vm5, %v6399_v39, 0.0 }
 0x744   : > { %6713 = vrot.lane.b32.xlu1 %v6634_v49, %s8608_s22  ;;  %v7505_v49 = vadd.f32 -1.0, %v10866_v10 }
 0x746   : > { %6715 = vrot.lane.b32.xlu0 %v6636_v25, %s8608_s22  ;;  %v7502_v25 = vadd.f32 -1.0, %v10867_v47  ;;  %v6478_v42 = vmax.f32 %v7505_v49, 1.0 }
 0x748   : > { %v6475_v21 = vmax.f32 %v7502_v25, 1.0  ;;  %8394 = vrcp.f32 %v6478_v42 }
 0x74a   : > { %8396 = vrcp.f32 %v6475_v21 }
 0x74b   : > { %8398 = vrcp.f32 %v10868_v12  ;;  %v10872_v12 = vld [vmem:[#allocation15_spill] sm:$0xff] }
 0x74c   : > { %vm6522_vm3 = vcmp.gt.f32.partialorder %v10872_v12, 0.0 }
 0x753   : > { %v6424_v40 = vpop.xlane.xlu0 %6423 }
 0x754   : > { %v10257_v2 = vmul.f32 %v8387_v1, %v6424_v40  ;;  %v8395_v40 = vpop.eup %8394 }
 0x755   : > { %v8397_v41 = vpop.eup %8396 }
 0x756   : > { %v6415_v31 = vpop.xlane.xlu1 %6414  ;;  %v8399_v49 = vpop.eup %8398 }
 0x757   : > { %v10259_v18 = vmul.f32 %v8389_v44, %v6415_v31  ;;  %v10275_v56 = vpop.permute.xlu0 %6707  ;;  %v6642_v25 = vmul.f32 %v8399_v49, %v10179_v29 }
 0x75a   : > { %v6706_v1 = vpop.permute.xlu1 %6705 }
 0x765   : > { %6441 = vadd.xlane.f32.xlu0 %v6440_v0  ;;  %v6404_v0 = vmul.f32 %v10179_v29, %v10839_v59 }
 0x767   : > { %v6446_v32 = vsel %vm6342_vm5, %v6404_v0, 0.0  ;;  %v10871_v0 = vld [vmem:[#allocation12_spill] sm:$0xff] }
 0x768   : > { %6432 = vadd.xlane.f32.xlu1 %v6431_v13  ;;  %v6401_v13 = vmul.f32 %v10173_v61, %v10833_v7  ;;  %vm6520_vm0 = vcmp.gt.f32.partialorder %v10871_v0, 0.0 }
 0x76a   : > { %v6437_v46 = vsel %vm6342_vm5, %v6401_v13, 0.0 }
 0x779   : > { %6717 = vrot.lane.b32.xlu1 %v6638_v51, %s8608_s22  ;;  %v10869_v51 = vld [vmem:[#allocation79_spill] sm:$0xff] }
 0x77a   : > { %v7507_v63 = vadd.f32 -1.0, %v10869_v51 }
 0x77b   : > { %6719 = vrot.lane.b32.xlu0 %v6640_v48, %s8608_s22  ;;  %v10870_v48 = vld [vmem:[#allocation85_spill] sm:$0xff] }
 0x77c   : > { %v7504_v42 = vadd.f32 -1.0, %v10870_v48  ;;  %v6480_v59 = vmax.f32 %v7507_v63, 1.0 }
 0x77e   : > { %v6477_v7 = vmax.f32 %v7504_v42, 1.0  ;;  %8400 = vrcp.f32 %v6480_v59 }
 0x780   : > { %8402 = vrcp.f32 %v6477_v7 }
 0x788   : > { %v6430_v44 = vpop.xlane.xlu0 %6429  ;;  %v8401_v21 = vpop.eup %8400 }
 0x789   : > { %v10277_v31 = vmul.f32 %v8395_v40, %v6430_v44 }
 0x78b   : > { %v6421_v3 = vpop.xlane.xlu1 %6420 }
 0x78c   : > { %v10279_v39 = vmul.f32 %v8397_v41, %v6421_v3  ;;  %v10298_v61 = vpop.permute.xlu0 %6711  ;;  %v8403_v41 = vpop.eup %8402 }
 0x78f   : > { %v6710_v29 = vpop.permute.xlu1 %6709 }
 0x79a   : > { %6447 = vadd.xlane.f32.xlu0 %v6446_v32  ;;  %v8452_v32 = vld [vmem:[%s8781_s4 + $0x8] sm:$0xff] }
 0x79b   : > { %vm6760_vm6 = vcmp.gt.f32.partialorder %v8452_v32, 0.5 }
 0x79d   : > { %6438 = vadd.xlane.f32.xlu1 %v6437_v46  ;;  %v6744_v46 = vsel %vm6520_vm0, %v10227_v5, inf  ;;  %v8454_v5 = vld [vmem:[%s8781_s4 + $0x28] sm:$0xff] }
 0x79e   : > { %v6776_v63 = vsel %vm6760_vm6, inf, %v6744_v46  ;;  %vm6764_vm9 = vcmp.gt.f32.partialorder %v8454_v5, 0.5  ;;  %v10878_v46 = vld [vmem:[#allocation87_spill] sm:$0xff] }
 0x79f   : > { %v6794_v42 = vsel %vm6149_vm4, %v6776_v63, inf  ;;  %v7506_v12 = vadd.f32 -1.0, %v10878_v46 }
 0x7ae   : > { %6721 = vrot.lane.b32.xlu1 %v6642_v25, %s8608_s22  ;;  %v10873_v25 = vld [vmem:[#allocation17_spill] sm:$0xff] }
 0x7af   : > { %vm6524_vm8 = vcmp.gt.f32.partialorder %v10873_v25, 0.0 }
 0x7b0   : > { %6723 = vrot.lane.b32.xlu0 %v10184_v28, %s8608_s22  ;;  %v6748_v7 = vsel %vm6524_vm8, %v6706_v1, inf }
 0x7b4   : > { %7129 = vrot.lane.b32.xlu0 %v10128_v15, %s8607_s27  ;;  %v6403_v15 = vmul.f32 %v10177_v60, %v10837_v27  ;;  %v8453_v27 = vld [vmem:[%s8781_s4 + $0x18] sm:$0xff]  ;;  %v6746_v60 = vsel %vm6522_vm3, %v10255_v8, inf }
 0x7b5   : > { %vm6762_vm7 = vcmp.gt.f32.partialorder %v8453_v27, 0.5  ;;  %v8456_v27 = vld [vmem:[%s8781_s4 + $0x48] sm:$0xff] }
 0x7b6   : > { %v6443_v13 = vsel %vm6342_vm5, %v6403_v15, 0.0  ;;  %v6778_v59 = vsel %vm6762_vm7, inf, %v6746_v60  ;;  %v8455_v15 = vld [vmem:[%s8781_s4 + $0x38] sm:$0xff]  ;;  %vm6768_vm13 = vcmp.gt.f32.partialorder %v8456_v27, 0.5 }
 0x7b7   : > { %vm6766_vm11 = vcmp.gt.f32.partialorder %v8455_v15, 0.5  ;;  %v8457_v15 = vld [vmem:[%s8781_s4 + $0x58] sm:$0xff] }
 0x7b8   : > { %7135 = vrot.lane.b32.xlu0 %v10134_v53, %s8607_s27  ;;  %v6406_v53 = vmul.f32 %v10186_v34, %v10843_v35  ;;  %v10874_v35 = vld [vmem:[#allocation73_spill] sm:$0xff]  ;;  %vm6770_vm15 = vcmp.gt.f32.partialorder %v8457_v15, 0.5  ;;  %v10885_v15 = vld [vmem:[#allocation18_spill] sm:$0xff] }
 0x7b9   : > { %8404 = vrcp.f32 %v10874_v35  ;;  %v6479_v35 = vmax.f32 %v7506_v12, 1.0  ;;  %v8458_v12 = vld [vmem:[%s8781_s4] sm:$0xff] }
 0x7ba   : > { %v6452_v49 = vsel %vm6342_vm5, %v6406_v53, 0.0  ;;  %vm6759_vm0 = vcmp.gt.f32.partialorder %v8458_v12, 0.5 }
 0x7bd   : > { %v6436_v40 = vpop.xlane.xlu0 %6435 }
 0x7be   : > { %v10300_v44 = vmul.f32 %v8401_v21, %v6436_v40  ;;  %v10875_v21 = vld [vmem:[#allocation19_spill] sm:$0xff]  ;;  %v6800_v40 = vsel %vm6149_vm4, %v6778_v59, inf }
 0x7bf   : > { %vm6526_vm10 = vcmp.gt.f32.partialorder %v10875_v21, 0.0 }
 0x7c0   : > { %v6427_v28 = vpop.xlane.xlu1 %6426  ;;  %v6750_v0 = vsel %vm6526_vm10, %v6710_v29, inf  ;;  %vm6527_vm10 = vcmp.gt.f32.partialorder %v10885_v15, 0.0 }
 0x7c1   : > { %v10302_v3 = vmul.f32 %v8403_v41, %v6427_v28  ;;  %v6780_v41 = vsel %vm6764_vm9, inf, %v6748_v7  ;;  %v10876_v28 = vld [vmem:[#allocation80_spill] sm:$0xff]  ;;  %v6782_v1 = vsel %vm6766_vm11, inf, %v6750_v0 }
 0x7c2   : > { %v7509_v8 = vadd.f32 -1.0, %v10876_v28  ;;  %v6806_v32 = vsel %vm6149_vm4, %v6780_v41, inf  ;;  %v6812_v29 = vsel %vm6149_vm4, %v6782_v1, inf }
 0x7c4   : > { %v6714_v53 = vpop.permute.xlu1 %6713  ;;  %v6482_v63 = vmax.f32 %v7509_v8, 1.0  ;;  %v10879_v8 = vld [vmem:[#allocation23_spill] sm:$0xff] }
 0x7c5   : > { %vm6530_vm14 = vcmp.gt.f32.partialorder %v10879_v8, 0.0 }
 0x7c6   : > { %8406 = vrcp.f32 %v6482_v63 }
 0x7c7   : > { %8408 = vrcp.f32 %v6479_v35  ;;  %v10883_v35 = vld [vmem:[#allocation88_spill] sm:$0xff] }
 0x7d2   : > { %6444 = vadd.xlane.f32.xlu1 %v6443_v13  ;;  %v10877_v13 = vld [vmem:[#allocation21_spill] sm:$0xff] }
 0x7d3   : > { %vm6528_vm12 = vcmp.gt.f32.partialorder %v10877_v13, 0.0 }
 0x7d4   : > { %v6752_v60 = vsel %vm6528_vm12, %v6714_v53, inf }
 0x7d7   : > { %6453 = vadd.xlane.f32.xlu0 %v6452_v49  ;;  %v8405_v49 = vpop.eup %8404 }
 0x7d8   : > { %v6646_v25 = vmul.f32 %v8405_v49, %v10186_v34  ;;  %v8407_v34 = vpop.eup %8406  ;;  %v10881_v49 = vld [vmem:[#allocation13_spill] sm:$0xff] }
 0x7d9   : > { %v8409_v21 = vpop.eup %8408  ;;  %vm6521_vm6 = vcmp.gt.f32.partialorder %v10881_v49, 0.0  ;;  %v10887_v49 = vld [vmem:[#allocation22_spill] sm:$0xff] }
 0x7db   : > { %6795 = vmin.xlane.f32.xlu0 %v6794_v42  ;;  %v6784_v42 = vsel %vm6768_vm13, inf, %v6752_v60  ;;  %v8459_v60 = vld [vmem:[%s8781_s4 + $0x10] sm:$0xff] }
 0x7dc   : > { %v6818_v59 = vsel %vm6149_vm4, %v6784_v42, inf  ;;  %vm6761_vm3 = vcmp.gt.f32.partialorder %v8459_v60, 0.5  ;;  %v7508_v42 = vadd.f32 -1.0, %v10883_v35 }
 0x7df   : > { %6801 = vmin.xlane.f32.xlu0 %v6800_v40 }
 0x7e3   : > { %6807 = vmin.xlane.f32.xlu0 %v6806_v32  ;;  %7131 = vrot.lane.b32.xlu1 %v10130_v22, %s8607_s27  ;;  %v6716_v22 = vpop.permute.xlu0 %6715  ;;  %v6405_v32 = vmul.f32 %v10181_v16, %v10841_v20 }
 0x7e5   : > { %v6449_v63 = vsel %vm6342_vm5, %v6405_v32, 0.0 }
 0x7e7   : > { %6813 = vmin.xlane.f32.xlu0 %v6812_v29  ;;  %6725 = vrot.lane.b32.xlu1 %v6646_v25, %s8608_s22  ;;  %v6745_v25 = vsel %vm6521_vm6, %v10251_v30, inf  ;;  %v10882_v29 = vld [vmem:[#allocation14_spill] sm:$0xff]  ;;  %v6481_v30 = vmax.f32 %v7508_v42, 1.0 }
 0x7e8   : > { %vm6523_vm7 = vcmp.gt.f32.partialorder %v10882_v29, 0.0  ;;  %v6777_v16 = vsel %vm6761_vm3, inf, %v6745_v25  ;;  %v10888_v29 = vld [vmem:[#allocation24_spill] sm:$0xff] }
 0x7e9   : > { %8410 = vrcp.f32 %v6481_v30  ;;  %v8466_v30 = vld [vmem:[%s8781_s4 + $0x68] sm:$0xff] }
 0x7ea   : > { %vm6772_vm3 = vcmp.gt.f32.partialorder %v8466_v30, 0.5 }
 0x7eb   : > { %6819 = vmin.xlane.f32.xlu0 %v6818_v59  ;;  %7133 = vrot.lane.b32.xlu1 %v10132_v11, %s8607_s27  ;;  %v6747_v59 = vsel %vm6523_vm7, %v10253_v62, inf  ;;  %v8462_v62 = vld [vmem:[%s8781_s4 + $0x40] sm:$0xff] }
 0x7ec   : > { %vm6767_vm11 = vcmp.gt.f32.partialorder %v8462_v62, 0.5 }
 0x7ef   : > { %7137 = vrot.lane.b32.xlu1 %v10136_v55, %s8607_s27  ;;  %v10880_v55 = vld [vmem:[#allocation11_spill] sm:$0xff] }
 0x7f0   : > { %vm6519_vm2 = vcmp.gt.f32.partialorder %v10880_v55, 0.0 }
 0x7f1   : > { %v6743_v1 = vsel %vm6519_vm2, %v10229_v23, inf  ;;  %v8460_v23 = vld [vmem:[%s8781_s4 + $0x20] sm:$0xff]  ;;  %vm6533_vm2 = vcmp.gt.f32.partialorder %v10888_v29, 0.0 }
 0x7f2   : > { %v6442_v5 = vpop.xlane.xlu0 %6441  ;;  %v6775_v27 = vsel %vm6759_vm0, inf, %v6743_v1  ;;  %vm6763_vm8 = vcmp.gt.f32.partialorder %v8460_v23, 0.5 }
 0x7f3   : > { %v10338_v7 = vmul.f32 %v8407_v34, %v6442_v5  ;;  %v6791_v20 = vsel %vm6149_vm4, %v6775_v27, inf  ;;  %v10884_v34 = vld [vmem:[#allocation16_spill] sm:$0xff]  ;;  %v6797_v5 = vsel %vm6149_vm4, %v6777_v16, inf }
 0x7f4   : > { %vm6525_vm5 = vcmp.gt.f32.partialorder %v10884_v34, 0.0  ;;  %v8465_v34 = vld [vmem:[%s8781_s4 + $0x70] sm:$0xff] }
 0x7f5   : > { %v6433_v40 = vpop.xlane.xlu1 %6432  ;;  %v6749_v8 = vsel %vm6525_vm5, %v10275_v56, inf  ;;  %v8463_v56 = vld [vmem:[%s8781_s4 + $0x50] sm:$0xff]  ;;  %vm6773_vm0 = vcmp.gt.f32.partialorder %v8465_v34, 0.5 }
 0x7f6   : > { %v10340_v41 = vmul.f32 %v8409_v21, %v6433_v40  ;;  %v6779_v21 = vsel %vm6763_vm8, inf, %v6747_v59  ;;  %v8461_v40 = vld [vmem:[%s8781_s4 + $0x30] sm:$0xff]  ;;  %v6720_v12 = vpop.permute.xlu0 %6719  ;;  %vm6769_vm13 = vcmp.gt.f32.partialorder %v8463_v56, 0.5 }
 0x7f7   : > { %vm6765_vm9 = vcmp.gt.f32.partialorder %v8461_v40, 0.5 }
 0x7f9   : > { %v6718_v0 = vpop.permute.xlu1 %6717 }
 0x7fa   : > { %v6754_v11 = vsel %vm6530_vm14, %v6718_v0, inf  ;;  %v6803_v0 = vsel %vm6149_vm4, %v6779_v21, inf  ;;  %vm6531_vm14 = vcmp.gt.f32.partialorder %v10887_v49, 0.0  ;;  %v10889_v21 = vld [vmem:[#allocation25_spill] sm:$0xff] }
 0x7fb   : > { %v6786_v13 = vsel %vm6770_vm15, inf, %v6754_v11  ;;  %v6781_v11 = vsel %vm6765_vm9, inf, %v6749_v8  ;;  %v6755_v25 = vsel %vm6531_vm14, %v6720_v12, inf  ;;  %vm6532_vm6 = vcmp.gt.f32.partialorder %v10889_v21, 0.0 }
 0x7fc   : > { %v6824_v53 = vsel %vm6149_vm4, %v6786_v13, inf  ;;  %v6751_v13 = vsel %vm6527_vm10, %v10298_v61, inf  ;;  %v6809_v55 = vsel %vm6149_vm4, %v6781_v11, inf  ;;  %v8464_v61 = vld [vmem:[%s8781_s4 + $0x60] sm:$0xff]  ;;  %vm6922_vm9 = vcmp.le.f32.partialorder %v10859_v50, 1.0 }
 0x7fd   : > { %6825 = vmin.xlane.f32.xlu0 %v6824_v53  ;;  %v10886_v53 = vld [vmem:[#allocation20_spill] sm:$0xff]  ;;  %v6783_v32 = vsel %vm6767_vm11, inf, %v6751_v13  ;;  %vm6771_vm15 = vcmp.gt.f32.partialorder %v8464_v61, 0.5  ;;  %vm6924_vm11 = vcmp.le.f32.partialorder %v10862_v19, 1.0  ;;  %vm7191_vm14 = vcmask 89088  }
 0x7fe   : > { %vm6529_vm12 = vcmp.gt.f32.partialorder %v10886_v53, 0.0  ;;  %v10890_v53 = vld [vmem:[#allocation82_spill] sm:$0xff] }
 0x7ff   : > { %v6753_v1 = vsel %vm6529_vm12, %v6716_v22, inf  ;;  %v6787_v22 = vsel %vm6771_vm15, inf, %v6755_v25  ;;  %vm7208_vm15 = vcmask 97280  }
 0x800   : > { %v6785_v27 = vsel %vm6769_vm13, inf, %v6753_v1  ;;  %v6827_v8 = vsel %vm6149_vm4, %v6787_v22, inf  ;;  %vm6926_vm13 = vcmp.le.f32.partialorder %v10866_v10, 1.0  ;;  %v10892_v10 = vld [vmem:[#allocation50_spill] sm:$0xff] }
 0x801   : > { %v6821_v42 = vsel %vm6149_vm4, %v6785_v27, inf }
 0x813   : > { %6450 = vadd.xlane.f32.xlu1 %v6449_v63  ;;  %v6815_v63 = vsel %vm6149_vm4, %v6783_v32, inf }
 0x817   : > { %6792 = vmin.xlane.f32.xlu1 %v6791_v20  ;;  %v8411_v20 = vpop.eup %8410 }
 0x81b   : > { %6798 = vmin.xlane.f32.xlu1 %v6797_v5 }
 0x81f   : > { %6804 = vmin.xlane.f32.xlu1 %v6803_v0 }
 0x823   : > { %6810 = vmin.xlane.f32.xlu1 %v6809_v55  ;;  %v7510_v55 = vadd.f32 -1.0, %v10890_v53 }
 0x825   : > { %v6483_v32 = vmax.f32 %v7510_v55, 1.0 }
 0x827   : > { %v10372_v60 = vpop.xlane.xlu0 %6447  ;;  %6816 = vmin.xlane.f32.xlu1 %v6815_v63  ;;  %8412 = vrcp.f32 %v6483_v32  ;;  %v10891_v63 = vld [vmem:[#allocation26_spill] sm:$0xff] }
 0x828   : > { %vm6534_vm7 = vcmp.gt.f32.partialorder %v10891_v63, 0.0 }
 0x82a   : > { %v6439_v16 = vpop.xlane.xlu1 %6438 }
 0x82b   : > { %v6724_v23 = vpop.permute.xlu0 %6723  ;;  %v10377_v59 = vmul.f32 %v8411_v20, %v6439_v16  ;;  %6822 = vmin.xlane.f32.xlu1 %v6821_v42 }
 0x82c   : > { %v6757_v5 = vsel %vm6533_vm2, %v6724_v23, inf  ;;  %vm6928_vm2 = vcmp.le.f32.partialorder %v10869_v51, 1.0 }
 0x82d   : > { %v6789_v15 = vsel %vm6773_vm0, inf, %v6757_v5  ;;  %vm6930_vm0 = vcmp.le.f32.partialorder %v10876_v28, 1.0 }
 0x82e   : > { %v6722_v40 = vpop.permute.xlu1 %6721  ;;  %v6833_v13 = vsel %vm6149_vm4, %v6789_v15, inf }
 0x82f   : > { %v6756_v0 = vsel %vm6532_vm6, %v6722_v40, inf  ;;  %6828 = vmin.xlane.f32.xlu1 %v6827_v8  ;;  %v10396_v12 = vpop.permute.xlu0 %7129 }
 0x830   : > { %v6788_v11 = vsel %vm6772_vm3, inf, %v6756_v0 }
 0x831   : > { %v6830_v62 = vsel %vm6149_vm4, %v6788_v11, inf }
 0x832   : > { %6831 = vmin.xlane.f32.xlu0 %v6830_v62 }
 0x833   : > { %6834 = vmin.xlane.f32.xlu1 %v6833_v13  ;;  %v10398_v1 = vpop.permute.xlu0 %7135 }
 0x844   : > { %7141 = vrot.lane.b32.xlu1 %v10140_v58, %s8607_s27  ;;  %v8413_v58 = vpop.eup %8412 }
 0x848   : > { %7145 = vrot.lane.b32.xlu1 %v10144_v43, %s8607_s27 }
 0x84c   : > { %7149 = vrot.lane.b32.xlu1 %v10149_v4, %s8607_s27 }
 0x850   : > { %7153 = vrot.lane.b32.xlu1 %v10154_v57, %s8607_s27  ;;  %v8467_v57 = vld [vmem:[%s8781_s4 + $0x78] sm:$0xff] }
 0x851   : > { %vm6774_vm8 = vcmp.gt.f32.partialorder %v8467_v57, 0.5 }
 0x854   : > { %7157 = vrot.lane.b32.xlu1 %v10158_v26, %s8607_s27 }
 0x85f   : > { %v6445_v56 = vpop.xlane.xlu1 %6444 }
 0x860   : > { %v10400_v43 = vmul.f32 %v8413_v58, %v6445_v56 }
 0x863   : > { %v10402_v49 = vpop.permute.xlu1 %7131 }
 0x864   : > { %v10404_v4 = vpop.xlane.xlu0 %6453 }
 0x867   : > { %v6726_v27 = vpop.permute.xlu1 %6725 }
 0x868   : > { %v6796_v61 = vpop.xlane.xlu0 %6795  ;;  %v6758_v26 = vsel %vm6534_vm7, %v6726_v27, inf }
 0x869   : > { %v6856_v25 = vmax.f32 %v10231_v17, %v6796_v61  ;;  %v6790_v29 = vsel %vm6774_vm8, inf, %v6758_v26  ;;  %v6840_v8 = vsub.f32 %v6796_v61, %v10231_v17  ;;  %vm6952_vm5 = vcmp.lt.f32.partialorder %v6796_v61, inf }
 0x86a   : > { %v6836_v20 = vsel %vm6149_vm4, %v6790_v29, inf  ;;  %vm6920_vm4 = vcmp.le.f32.partialorder %v10857_v37, 1.0  ;;  %vm6919_vm8 = vcmp.le.f32.partialorder %v10858_v9, 1.0 }
 0x86b   : > { %v6872_v16 = vmax.f32 %v6856_v25, 1e-12  ;;  %6837 = vmin.xlane.f32.xlu0 %v6836_v20 }
 0x86c   : > { %v6802_v42 = vpop.xlane.xlu0 %6801 }
 0x86d   : > { %8414 = vrcp.f32 %v6872_v16  ;;  %v6858_v22 = vmax.f32 %v10235_v6, %v6802_v42  ;;  %v6842_v32 = vsub.f32 %v6802_v42, %v10235_v6  ;;  %vm6954_vm10 = vcmp.lt.f32.partialorder %v6802_v42, inf }
 0x86f   : > { %v6874_v23 = vmax.f32 %v6858_v22, 1e-12 }
 0x870   : > { %v6808_v34 = vpop.xlane.xlu0 %6807 }
 0x871   : > { %8416 = vrcp.f32 %v6874_v23  ;;  %v6860_v5 = vmax.f32 %v10257_v2, %v6808_v34  ;;  %v6844_v37 = vsub.f32 %v6808_v34, %v10257_v2  ;;  %vm6956_vm12 = vcmp.lt.f32.partialorder %v6808_v34, inf }
 0x873   : > { %v6876_v21 = vmax.f32 %v6860_v5, 1e-12 }
 0x874   : > { %v10412_v30 = vpop.xlane.xlu0 %6813 }
 0x875   : > { %8418 = vrcp.f32 %v6876_v21  ;;  %v6862_v40 = vmax.f32 %v10277_v31, %v10412_v30  ;;  %v6846_v23 = vsub.f32 %v10412_v30, %v10277_v31  ;;  %vm6958_vm6 = vcmp.lt.f32.partialorder %v10412_v30, inf }
 0x877   : > { %v8415_v15 = vpop.eup %8414  ;;  %v6878_v0 = vmax.f32 %v6862_v40, 1e-12 }
 0x878   : > { %v6890_v11 = vmul.f32 %v8415_v15, %v6840_v8  ;;  %v10417_v62 = vpop.xlane.xlu0 %6819 }
 0x879   : > { %8420 = vrcp.f32 %v6878_v0  ;;  %v6864_v13 = vmax.f32 %v10300_v44, %v10417_v62  ;;  %v6848_v31 = vsub.f32 %v10417_v62, %v10300_v44  ;;  %vm6960_vm3 = vcmp.lt.f32.partialorder %v10417_v62, inf }
 0x87a   : > { %v6936_v55 = vsel %vm6920_vm4, 0.0, %v6890_v11 }
 0x87b   : > { %v8417_v58 = vpop.eup %8416  ;;  %v6968_v56 = vsel %vm6952_vm5, %v6936_v55, 0.0  ;;  %v6880_v63 = vmax.f32 %v6864_v13, 1e-12  ;;  %v7134_v55 = vpop.permute.xlu1 %7133  ;;  %vm6921_vm5 = vcmp.le.f32.partialorder %v10863_v52, 1.0 }
 0x87c   : > { %v6989_v57 = vrot.slane %v6968_v56, 4  ;;  %v6894_v17 = vmul.f32 %v8417_v58, %v6842_v32  ;;  %v7176_v58 = vsel %vm199_vm1, %v10892_v10, %v10396_v12 }
 0x87d   : > { %8422 = vrcp.f32 %v6880_v63 }
 0x87e   : > { %v6990_v27 = vadd.f32 %v6989_v57, %v6968_v56  ;;  %v6938_v26 = vsel %vm6922_vm9, 0.0, %v6894_v17  ;;  %vm6923_vm9 = vcmp.le.f32.partialorder %v10867_v47, 1.0 }
 0x87f   : > { %v8419_v25 = vpop.eup %8418  ;;  %v6970_v29 = vsel %vm6954_vm10, %v6938_v26, 0.0  ;;  %vm6925_vm10 = vcmp.le.f32.partialorder %v10870_v48, 1.0 }
 0x880   : > { %v6991_v20 = vrot.slane %v6990_v27, 2  ;;  %v7001_v16 = vrot.slane %v6970_v29, 4  ;;  %v6898_v61 = vmul.f32 %v8419_v25, %v6844_v37  ;;  %v10893_v37 = vld [vmem:[#allocation52_spill] sm:$0xff] }
 0x881   : > { %7139 = vrot.lane.b32.xlu0 %v10138_v45, %s8607_s27  ;;  %v7178_v51 = vsel %vm199_vm1, %v10893_v37, %v7134_v55 }
 0x882   : > { %v6992_v6 = vadd.f32 %v6991_v20, %v6990_v27  ;;  %v7002_v22 = vadd.f32 %v7001_v16, %v6970_v29  ;;  %v6940_v50 = vsel %vm6924_vm11, 0.0, %v6898_v61  ;;  %v10894_v29 = vld [vmem:[#allocation84_spill] sm:$0xff]  ;;  %v7138_v61 = vpop.permute.xlu1 %7137 }
 0x883   : > { %v8421_v42 = vpop.eup %8420  ;;  %v6972_v5 = vsel %vm6956_vm12, %v6940_v50, 0.0  ;;  %v7512_v20 = vadd.f32 -1.0, %v10894_v29 }
 0x884   : > { %v6993_v2 = vrot.slane %v6992_v6, 1  ;;  %v7003_v21 = vrot.slane %v7002_v22, 2  ;;  %v7013_v40 = vrot.slane %v6972_v5, 4  ;;  %v6902_v8 = vmul.f32 %v8421_v42, %v6846_v23  ;;  %v10895_v23 = vld [vmem:[#allocation58_spill] sm:$0xff] }
 0x885   : > { %7143 = vrot.lane.b32.xlu0 %v10142_v24, %s8607_s27  ;;  %v7180_v42 = vsel %vm199_vm1, %v10895_v23, %v7138_v61 }
 0x886   : > { %v6994_v19 = vadd.f32 %v6993_v2, %v6992_v6  ;;  %v7004_v34 = vadd.f32 %v7003_v21, %v7002_v22  ;;  %v7014_v45 = vadd.f32 %v7013_v40, %v6972_v5  ;;  %v6942_v15 = vsel %vm6926_vm13, 0.0, %v6902_v8 }
 0x887   : > { %v8423_v0 = vpop.eup %8422  ;;  %v6485_v5 = vmax.f32 %v7512_v20, 1.0  ;;  %vm6927_vm13 = vcmp.le.f32.partialorder %v10878_v46, 1.0 }
 0x888   : > { %v7080_v11 = vmul.f32 0.125, %v6994_v19  ;;  %v7005_v13 = vrot.slane %v7004_v34, 1  ;;  %v7015_v32 = vrot.slane %v7014_v45, 2  ;;  %v6906_v24 = vmul.f32 %v8423_v0, %v6848_v31 }
 0x889   : > { %7147 = vrot.lane.b32.xlu0 %v10146_v54, %s8607_s27 }
 0x88a   : > { %v7193_v56 = vsel %vm7191_vm14, %v7176_v58, %v7080_v11  ;;  %v7006_v63 = vadd.f32 %v7005_v13, %v7004_v34  ;;  %v7016_v44 = vadd.f32 %v7015_v32, %v7014_v45  ;;  %v6826_v57 = vpop.xlane.xlu0 %6825  ;;  %v6944_v27 = vsel %vm6928_vm2, 0.0, %v6906_v24  ;;  %v10896_v13 = vld [vmem:[#allocation89_spill] sm:$0xff] }
 0x88b   : > { %v7210_v17 = vsel %vm7208_vm15, %v7193_v56, 0.0  ;;  %v6866_v26 = vmax.f32 %v10338_v7, %v6826_v57  ;;  %v6850_v21 = vsub.f32 %v6826_v57, %v10338_v7  ;;  %v7511_v55 = vadd.f32 -1.0, %v10896_v13 }
 0x88c   : > { %7226 = vst [vmem:[%s10446_s28 + $0x8] sm:$0xff] %v7210_v17  ;;  %v7082_v12 = vmul.f32 0.125, %v7006_v63  ;;  %v7017_v54 = vrot.slane %v7016_v44, 1  ;;  %v6974_v32 = vsel %vm6958_vm6, %v6942_v15, 0.0  ;;  %v6976_v30 = vsel %vm6960_vm3, %v6944_v27, 0.0 }
 0x88d   : > { %v6882_v25 = vmax.f32 %v6866_v26, 1e-12  ;;  %7151 = vrot.lane.b32.xlu0 %v10152_v38, %s8607_s27  ;;  %v7025_v58 = vrot.slane %v6974_v32, 4  ;;  %v6484_v24 = vmax.f32 %v7511_v55, 1.0  ;;  %vm6962_vm7 = vcmp.lt.f32.partialorder %v6826_v57, inf }
 0x88e   : > { %v7195_v16 = vsel %vm7191_vm14, %v7178_v51, %v7082_v12  ;;  %v7018_v6 = vadd.f32 %v7017_v54, %v7016_v44  ;;  %v7037_v12 = vrot.slane %v6976_v30, 4  ;;  %vm6929_vm2 = vcmp.le.f32.partialorder %v10883_v35, 1.0 }
 0x88f   : > { %v7212_v22 = vsel %vm7208_vm15, %v7195_v16, 0.0  ;;  %8424 = vrcp.f32 %v6882_v25  ;;  %v7026_v44 = vadd.f32 %v7025_v58, %v6974_v32  ;;  %vm6932_vm6 = vcmp.le.f32.partialorder %v10896_v13, 1.0 }
 0x890   : > { %7228 = vst [vmem:[%s10446_s28 + $0x18] sm:$0xff] %v7212_v22  ;;  %v7084_v50 = vmul.f32 0.125, %v7018_v6  ;;  %8426 = vrcp.f32 %v6485_v5  ;;  %v7038_v57 = vadd.f32 %v7037_v12, %v6976_v30 }
 0x891   : > { %7155 = vrot.lane.b32.xlu0 %v10156_v33, %s8607_s27  ;;  %v7027_v51 = vrot.slane %v7026_v44, 2 }
 0x892   : > { %v7197_v38 = vsel %vm7191_vm14, %v7180_v42, %v7084_v50 }
 0x893   : > { %v7214_v2 = vsel %vm7208_vm15, %v7197_v38, 0.0 }
 0x894   : > { %7230 = vst [vmem:[%s10446_s28 + $0x28] sm:$0xff] %v7214_v2 }
 0x899   : > { %v8425_v40 = vpop.eup %8424 }
 0x89a   : > { %v6910_v8 = vmul.f32 %v8425_v40, %v6850_v21  ;;  %v8427_v34 = vpop.eup %8426  ;;  %v7039_v21 = vrot.slane %v7038_v57, 2 }
 0x89c   : > { %v6946_v19 = vsel %vm6930_vm0, 0.0, %v6910_v8  ;;  %vm6931_vm0 = vcmp.le.f32.partialorder %v10890_v53, 1.0 }
 0x89d   : > { %v6978_v15 = vsel %vm6962_vm7, %v6946_v19, 0.0  ;;  %vm6933_vm7 = vcmp.le.f32.partialorder %v10894_v29, 1.0 }
 0x89e   : > { %v7049_v25 = vrot.slane %v6978_v15, 4 }
 0x8a0   : > { %v6451_v45 = vpop.xlane.xlu1 %6450  ;;  %v7050_v23 = vadd.f32 %v7049_v25, %v6978_v15 }
 0x8a1   : > { %v10466_v0 = vmul.f32 %v8427_v34, %v6451_v45 }
 0x8a4   : > { %v6793_v31 = vpop.xlane.xlu1 %6792 }
 0x8a5   : > { %v6855_v33 = vmax.f32 %v10233_v14, %v6793_v31  ;;  %v6839_v37 = vsub.f32 %v6793_v31, %v10233_v14  ;;  %vm6951_vm4 = vcmp.lt.f32.partialorder %v6793_v31, inf  ;;  %v7028_v14 = vadd.f32 %v7027_v51, %v7026_v44 }
 0x8a6   : > { %v7051_v31 = vrot.slane %v7050_v23, 2 }
 0x8a7   : > { %v6871_v11 = vmax.f32 %v6855_v33, 1e-12  ;;  %v7029_v45 = vrot.slane %v7028_v14, 1 }
 0x8a8   : > { %v6799_v10 = vpop.xlane.xlu1 %6798 }
 0x8a9   : > { %8428 = vrcp.f32 %v6871_v11  ;;  %v6857_v7 = vmax.f32 %v10259_v18, %v6799_v10  ;;  %v6841_v22 = vsub.f32 %v6799_v10, %v10259_v18  ;;  %vm6953_vm11 = vcmp.lt.f32.partialorder %v6799_v10, inf }
 0x8ab   : > { %v6873_v28 = vmax.f32 %v6857_v7, 1e-12 }
 0x8ac   : > { %v10472_v56 = vpop.xlane.xlu1 %6804 }
 0x8ad   : > { %8430 = vrcp.f32 %v6873_v28  ;;  %v6859_v63 = vmax.f32 %v10279_v39, %v10472_v56  ;;  %v6843_v52 = vsub.f32 %v10472_v56, %v10279_v39  ;;  %vm6955_vm12 = vcmp.lt.f32.partialorder %v10472_v56, inf }
 0x8ae   : > { %8432 = vrcp.f32 %v6484_v24  ;;  %v7040_v24 = vadd.f32 %v7039_v21, %v7038_v57  ;;  %v7030_v56 = vadd.f32 %v7029_v45, %v7028_v14 }
 0x8af   : > { %v6875_v17 = vmax.f32 %v6859_v63, 1e-12 }
 0x8b0   : > { %v10477_v26 = vpop.xlane.xlu1 %6810  ;;  %v7041_v57 = vrot.slane %v7040_v24, 1 }
 0x8b1   : > { %8434 = vrcp.f32 %v6875_v17  ;;  %v6861_v54 = vmax.f32 %v10302_v3, %v10477_v26  ;;  %v6845_v30 = vsub.f32 %v10477_v26, %v10302_v3  ;;  %v7052_v17 = vadd.f32 %v7051_v31, %v7050_v23 }
 0x8b3   : > { %v8429_v62 = vpop.eup %8428  ;;  %v6877_v20 = vmax.f32 %v6861_v54, 1e-12 }
 0x8b4   : > { %v6888_v16 = vmul.f32 %v8429_v62, %v6839_v37  ;;  %v10482_v27 = vpop.xlane.xlu1 %6816 }
 0x8b5   : > { %8436 = vrcp.f32 %v6877_v20  ;;  %v6863_v61 = vmax.f32 %v10340_v41, %v10482_v27  ;;  %v6847_v23 = vsub.f32 %v10482_v27, %v10340_v41 }
 0x8b6   : > { %v6935_v6 = vsel %vm6919_vm8, 0.0, %v6888_v16  ;;  %v10897_v16 = vld [vmem:[#allocation51_spill] sm:$0xff]  ;;  %vm6957_vm8 = vcmp.lt.f32.partialorder %v10477_v26, inf }
 0x8b7   : > { %v8431_v50 = vpop.eup %8430  ;;  %v6967_v42 = vsel %vm6951_vm4, %v6935_v6, 0.0  ;;  %v6879_v5 = vmax.f32 %v6863_v61, 1e-12  ;;  %v7175_v47 = vsel %vm199_vm1, %v10897_v16, %v10225_v36  ;;  %vm6959_vm4 = vcmp.lt.f32.partialorder %v10482_v27, inf }
 0x8b8   : > { %v6983_v38 = vrot.slane %v6967_v42, 4  ;;  %v6892_v9 = vmul.f32 %v8431_v50, %v6841_v22  ;;  %v10490_v2 = vpop.xlane.xlu1 %6822  ;;  %v8433_v40 = vpop.eup %8432 }
 0x8b9   : > { %8438 = vrcp.f32 %v6879_v5  ;;  %v6865_v18 = vmax.f32 %v10377_v59, %v10490_v2  ;;  %v10498_v55 = vmul.f32 %v8433_v40, %v10372_v60  ;;  %v7086_v5 = vmul.f32 0.125, %v7030_v56 }
 0x8ba   : > { %v6984_v8 = vadd.f32 %v6983_v38, %v6967_v42  ;;  %v6937_v19 = vsel %vm6921_vm5, 0.0, %v6892_v9  ;;  %v7053_v38 = vrot.slane %v7052_v17, 1  ;;  %v6849_v41 = vsub.f32 %v10490_v2, %v10377_v59 }
 0x8bb   : > { %v8435_v34 = vpop.eup %8434  ;;  %v6969_v33 = vsel %vm6953_vm11, %v6937_v19, 0.0  ;;  %v6881_v11 = vmax.f32 %v6865_v18, 1e-12  ;;  %v7042_v19 = vadd.f32 %v7041_v57, %v7040_v24  ;;  %vm6961_vm5 = vcmp.lt.f32.partialorder %v10490_v2, inf }
 0x8bc   : > { %v6985_v32 = vrot.slane %v6984_v8, 2  ;;  %v6995_v7 = vrot.slane %v6969_v33, 4  ;;  %v6896_v58 = vmul.f32 %v8435_v34, %v6843_v52  ;;  %v10500_v28 = vpop.xlane.xlu1 %6828 }
 0x8bd   : > { %8440 = vrcp.f32 %v6881_v11  ;;  %v6867_v39 = vmax.f32 %v10400_v43, %v10500_v28 }
 0x8be   : > { %v6986_v10 = vadd.f32 %v6985_v32, %v6984_v8  ;;  %v6996_v63 = vadd.f32 %v6995_v7, %v6969_v33  ;;  %v6939_v60 = vsel %vm6923_vm9, 0.0, %v6896_v58  ;;  %v10898_v32 = vld [vmem:[#allocation54_spill] sm:$0xff]  ;;  %v10899_v58 = vld [vmem:[#allocation53_spill] sm:$0xff]  ;;  %vm6963_vm9 = vcmp.lt.f32.partialorder %v10500_v28, inf }
 0x8bf   : > { %v8437_v44 = vpop.eup %8436  ;;  %v6971_v15 = vsel %vm6955_vm12, %v6939_v60, 0.0  ;;  %v6883_v12 = vmax.f32 %v6867_v39, 1e-12  ;;  %v10510_v54 = vpop.xlane.xlu0 %6831  ;;  %v7177_v24 = vsel %vm199_vm1, %v10899_v58, %v10402_v49  ;;  %v6851_v49 = vsub.f32 %v10500_v28, %v10400_v43  ;;  %v10901_v43 = vld [vmem:[#allocation55_spill] sm:$0xff]  ;;  %v10904_v58 = vld [vmem:[#allocation86_spill] sm:$0xff] }
 0x8c0   : > { %v6987_v37 = vrot.slane %v6986_v10, 1  ;;  %v6997_v62 = vrot.slane %v6996_v63, 2  ;;  %v7007_v51 = vrot.slane %v6971_v15, 4  ;;  %v6900_v25 = vmul.f32 %v8437_v44, %v6845_v30  ;;  %v10512_v20 = vpop.xlane.xlu1 %6834  ;;  %v10900_v44 = vld [vmem:[#allocation56_spill] sm:$0xff] }
 0x8c1   : > { %8442 = vrcp.f32 %v6883_v12  ;;  %v6868_v3 = vmax.f32 %v10498_v55, %v10510_v54  ;;  %v6869_v36 = vmax.f32 %v10466_v0, %v10512_v20  ;;  %v7088_v30 = vmul.f32 0.125, %v7042_v19 }
 0x8c2   : > { %v6988_v61 = vadd.f32 %v6987_v37, %v6986_v10  ;;  %v6998_v6 = vadd.f32 %v6997_v62, %v6996_v63  ;;  %v7008_v22 = vadd.f32 %v7007_v51, %v6971_v15  ;;  %v10522_v50 = vsel %vm6925_vm10, 0.0, %v6900_v25 }
 0x8c3   : > { %v8439_v14 = vpop.eup %8438  ;;  %v6884_v42 = vmax.f32 %v6868_v3, 1e-12  ;;  %v6885_v48 = vmax.f32 %v6869_v36, 1e-12  ;;  %v7054_v63 = vadd.f32 %v7053_v38, %v7052_v17  ;;  %v6853_v38 = vsub.f32 %v10512_v20, %v10466_v0 }
 0x8c4   : > { %v7079_v9 = vmul.f32 0.125, %v6988_v61  ;;  %v6999_v21 = vrot.slane %v6998_v6, 1  ;;  %v7009_v18 = vrot.slane %v7008_v22, 2  ;;  %v7142_v40 = vpop.permute.xlu1 %7141  ;;  %v6904_v8 = vmul.f32 %v8439_v14, %v6847_v23 }
 0x8c5   : > { %8444 = vrcp.f32 %v6884_v42  ;;  %v7182_v7 = vsel %vm199_vm1, %v10898_v32, %v7142_v40  ;;  %v7090_v3 = vmul.f32 0.125, %v7054_v63  ;;  %v7179_v61 = vsel %vm199_vm1, %v10901_v43, %v10398_v1 }
 0x8c6   : > { %v7192_v52 = vsel %vm7191_vm14, %v7175_v47, %v7079_v9  ;;  %v7000_v34 = vadd.f32 %v6999_v21, %v6998_v6  ;;  %v7010_v45 = vadd.f32 %v7009_v18, %v7008_v22  ;;  %v10534_v11 = vsel %vm6927_vm13, 0.0, %v6904_v8  ;;  %v10902_v6 = vld [vmem:[#allocation57_spill] sm:$0xff] }
 0x8c7   : > { %v8441_v31 = vpop.eup %8440  ;;  %v7209_v33 = vsel %vm7208_vm15, %v7192_v52, 0.0  ;;  %8446 = vrcp.f32 %v6885_v48  ;;  %v7199_v46 = vsel %vm7191_vm14, %v7182_v7, %v7086_v5  ;;  %v6852_v42 = vsub.f32 %v10510_v54, %v10498_v55 }
 0x8c8   : > { %7225 = vst [vmem:[%s10446_s28] sm:$0xff] %v7209_v33  ;;  %v7081_v39 = vmul.f32 0.125, %v7000_v34  ;;  %v7011_v10 = vrot.slane %v7010_v45, 1  ;;  %v7146_v59 = vpop.permute.xlu1 %7145  ;;  %v6908_v60 = vmul.f32 %v8441_v31, %v6849_v41  ;;  %v7216_v37 = vsel %vm7208_vm15, %v7199_v46, 0.0  ;;  %v10903_v33 = vld [vmem:[#allocation59_spill] sm:$0xff] }
 0x8c9   : > { %v7184_v15 = vsel %vm199_vm1, %v10900_v44, %v7146_v59  ;;  %7232 = vst [vmem:[%s10446_s28 + $0x38] sm:$0xff] %v7216_v37  ;;  %vm6964_vm3 = vcmp.lt.f32.partialorder %v10510_v54, inf  ;;  %v6973_v13 = vsel %vm6957_vm8, %v10522_v50, 0.0  ;;  %vm6965_vm10 = vcmp.lt.f32.partialorder %v10512_v20, inf }
 0x8ca   : > { %v7194_v12 = vsel %vm7191_vm14, %v7177_v24, %v7081_v39  ;;  %v7012_v56 = vadd.f32 %v7011_v10, %v7010_v45  ;;  %v6945_v17 = vsel %vm6929_vm2, 0.0, %v6908_v60  ;;  %v7201_v25 = vsel %vm7191_vm14, %v7184_v15, %v7088_v30 }
 0x8cb   : > { %v8443_v62 = vpop.eup %8442  ;;  %v7211_v51 = vsel %vm7208_vm15, %v7194_v12, 0.0  ;;  %v7218_v35 = vsel %vm7208_vm15, %v7201_v25, 0.0  ;;  %v7019_v32 = vrot.slane %v6973_v13, 4  ;;  %v7513_v24 = vadd.f32 -1.0, %v10904_v58 }
 0x8cc   : > { %7227 = vst [vmem:[%s10446_s28 + $0x10] sm:$0xff] %v7211_v51  ;;  %v7083_v16 = vmul.f32 0.125, %v7012_v56  ;;  %v6912_v47 = vmul.f32 %v8443_v62, %v6851_v49  ;;  %v7150_v57 = vpop.permute.xlu1 %7149  ;;  %7234 = vst [vmem:[%s10446_s28 + $0x48] sm:$0xff] %v7218_v35  ;;  %v6975_v39 = vsel %vm6959_vm4, %v10534_v11, 0.0  ;;  %v6977_v50 = vsel %vm6961_vm5, %v6945_v17, 0.0 }
 0x8cd   : > { %v7186_v22 = vsel %vm199_vm1, %v10902_v6, %v7150_v57  ;;  %v7020_v10 = vadd.f32 %v7019_v32, %v6973_v13  ;;  %v6486_v26 = vmax.f32 %v7513_v24, 1.0  ;;  %v7031_v59 = vrot.slane %v6975_v39, 4  ;;  %v10908_v24 = vld [vmem:[#allocation64_spill] sm:$0xff] }
 0x8ce   : > { %v7196_v14 = vsel %vm7191_vm14, %v7179_v61, %v7083_v16  ;;  %v6947_v23 = vsel %vm6931_vm0, 0.0, %v6912_v47  ;;  %v7203_v36 = vsel %vm7191_vm14, %v7186_v22, %v7090_v3  ;;  %v7043_v46 = vrot.slane %v6977_v50, 4 }
 0x8cf   : > { %v8445_v53 = vpop.eup %8444  ;;  %v7213_v5 = vsel %vm7208_vm15, %v7196_v14, 0.0  ;;  %v7220_v9 = vsel %vm7208_vm15, %v7203_v36, 0.0  ;;  %v7021_v63 = vrot.slane %v7020_v10, 2  ;;  %8448 = vrcp.f32 %v6486_v26 }
 0x8d0   : > { %7229 = vst [vmem:[%s10446_s28 + $0x20] sm:$0xff] %v7213_v5  ;;  %v6914_v1 = vmul.f32 %v8445_v53, %v6852_v42  ;;  %7236 = vst [vmem:[%s10446_s28 + $0x58] sm:$0xff] %v7220_v9  ;;  %v7154_v45 = vpop.permute.xlu1 %7153  ;;  %v7032_v60 = vadd.f32 %v7031_v59, %v6975_v39  ;;  %v6979_v30 = vsel %vm6963_vm9, %v6947_v23, 0.0  ;;  %v7044_v12 = vadd.f32 %v7043_v46, %v6977_v50  ;;  %v10905_v42 = vld [vmem:[#allocation60_spill] sm:$0xff] }
 0x8d1   : > { %v8447_v21 = vpop.eup %8446  ;;  %v7188_v54 = vsel %vm199_vm1, %v10903_v33, %v7154_v45  ;;  %v7022_v44 = vadd.f32 %v7021_v63, %v7020_v10  ;;  %v7055_v27 = vrot.slane %v6979_v30, 4  ;;  %vm6934_vm11 = vcmp.le.f32.partialorder %v10904_v58, 1.0 }
 0x8d2   : > { %v6948_v18 = vsel %vm6932_vm6, 0.0, %v6914_v1  ;;  %v6916_v55 = vmul.f32 %v8447_v21, %v6853_v38  ;;  %v7033_v15 = vrot.slane %v7032_v60, 2  ;;  %v7045_v37 = vrot.slane %v7044_v12, 2 }
 0x8d3   : > { %v6980_v40 = vsel %vm6964_vm3, %v6948_v18, 0.0  ;;  %v7023_v56 = vrot.slane %v7022_v44, 1  ;;  %v7056_v62 = vadd.f32 %v7055_v27, %v6979_v30  ;;  %v10906_v18 = vld [vmem:[#allocation61_spill] sm:$0xff] }
 0x8d4   : > { %v7061_v8 = vrot.slane %v6980_v40, 4  ;;  %v6949_v48 = vsel %vm6933_vm7, 0.0, %v6916_v55  ;;  %v7034_v49 = vadd.f32 %v7033_v15, %v7032_v60  ;;  %v7046_v47 = vadd.f32 %v7045_v37, %v7044_v12  ;;  %v10909_v30 = vld [vmem:[#allocation65_spill] sm:$0xff] }
 0x8d5   : > { %v6981_v11 = vsel %vm6965_vm10, %v6949_v48, 0.0  ;;  %v7024_v25 = vadd.f32 %v7023_v56, %v7022_v44  ;;  %v7057_v28 = vrot.slane %v7056_v62, 2 }
 0x8d6   : > { %v7062_v19 = vadd.f32 %v7061_v8, %v6980_v40  ;;  %v7067_v2 = vrot.slane %v6981_v11, 4  ;;  %v7035_v16 = vrot.slane %v7034_v49, 1  ;;  %v7047_v20 = vrot.slane %v7046_v47, 1 }
 0x8d7   : > { %v7085_v35 = vmul.f32 0.125, %v7024_v25  ;;  %v7058_v6 = vadd.f32 %v7057_v28, %v7056_v62 }
 0x8d8   : > { %v7063_v52 = vrot.slane %v7062_v19, 2  ;;  %v7068_v57 = vadd.f32 %v7067_v2, %v6981_v11  ;;  %v7036_v23 = vadd.f32 %v7035_v16, %v7034_v49  ;;  %v7048_v21 = vadd.f32 %v7047_v20, %v7046_v47  ;;  %v7158_v49 = vpop.permute.xlu1 %7157  ;;  %v10910_v2 = vld [vmem:[#allocation62_spill] sm:$0xff] }
 0x8d9   : > { %v8449_v51 = vpop.eup %8448  ;;  %v7059_v5 = vrot.slane %v7058_v6, 1 }
 0x8da   : > { %v7064_v34 = vadd.f32 %v7063_v52, %v7062_v19  ;;  %v6518_v17 = vmul.f32 %v8449_v51, %v10404_v4  ;;  %v7069_v22 = vrot.slane %v7068_v57, 2  ;;  %v7087_v38 = vmul.f32 0.125, %v7036_v23 }
 0x8db   : > { %v7089_v19 = vmul.f32 0.125, %v7048_v21  ;;  %v7190_v51 = vsel %vm199_vm1, %v10910_v2, %v7158_v49 }
 0x8dc   : > { %v7065_v0 = vrot.slane %v7064_v34, 1  ;;  %v7070_v1 = vadd.f32 %v7069_v22, %v7068_v57 }
 0x8de   : > { %v7066_v41 = vadd.f32 %v7065_v0, %v7064_v34  ;;  %v7071_v48 = vrot.slane %v7070_v1, 1  ;;  %v7060_v34 = vadd.f32 %v7059_v5, %v7058_v6  ;;  %v10907_v0 = vld [vmem:[#allocation63_spill] sm:$0xff] }
 0x8e0   : > { %v7092_v31 = vmul.f32 0.125, %v7066_v41 }
 0x8e2   : > { %v7205_v29 = vsel %vm7191_vm14, %v7188_v54, %v7092_v31 }
 0x8e3   : > { %v7222_v7 = vsel %vm7208_vm15, %v7205_v29, 0.0  ;;  %v7091_v29 = vmul.f32 0.125, %v7060_v34 }
 0x8e4   : > { %7238 = vst [vmem:[%s10446_s28 + $0x68] sm:$0xff] %v7222_v7  ;;  %v7072_v7 = vadd.f32 %v7071_v48, %v7070_v1 }
 0x8e6   : > { %v7093_v60 = vmul.f32 0.125, %v7072_v7 }
 0x8f8   : > { %v6838_v3 = vpop.xlane.xlu0 %6837 }
 0x8f9   : > { %v6870_v43 = vmax.f32 %v6518_v17, %v6838_v3  ;;  %v6854_v41 = vsub.f32 %v6838_v3, %v6518_v17  ;;  %vm6966_vm12 = vcmp.lt.f32.partialorder %v6838_v3, inf }
 0x8fb   : > { %v6886_v61 = vmax.f32 %v6870_v43, 1e-12 }
 0x8fc   : > { %v7140_v14 = vpop.permute.xlu0 %7139 }
 0x8fd   : > { %8450 = vrcp.f32 %v6886_v61  ;;  %v7181_v4 = vsel %vm199_vm1, %v10905_v42, %v7140_v14 }
 0x8fe   : > { %v7198_v36 = vsel %vm7191_vm14, %v7181_v4, %v7085_v35 }
 0x8ff   : > { %v7215_v53 = vsel %vm7208_vm15, %v7198_v36, 0.0 }
 0x900   : > { %7231 = vst [vmem:[%s10446_s28 + $0x30] sm:$0xff] %v7215_v53  ;;  %v7144_v9 = vpop.permute.xlu0 %7143 }
 0x901   : > { %v7183_v55 = vsel %vm199_vm1, %v10906_v18, %v7144_v9 }
 0x902   : > { %v7200_v40 = vsel %vm7191_vm14, %v7183_v55, %v7087_v38 }
 0x903   : > { %v7217_v8 = vsel %vm7208_vm15, %v7200_v40, 0.0 }
 0x904   : > { %7233 = vst [vmem:[%s10446_s28 + $0x40] sm:$0xff] %v7217_v8  ;;  %v7148_v52 = vpop.permute.xlu0 %7147 }
 0x905   : > { %v7185_v45 = vsel %vm199_vm1, %v10907_v0, %v7148_v52 }
 0x906   : > { %v7202_v13 = vsel %vm7191_vm14, %v7185_v45, %v7089_v19 }
 0x907   : > { %v8451_v31 = vpop.eup %8450  ;;  %v7219_v33 = vsel %vm7208_vm15, %v7202_v13, 0.0 }
 0x908   : > { %v6918_v54 = vmul.f32 %v8451_v31, %v6854_v41  ;;  %7235 = vst [vmem:[%s10446_s28 + $0x50] sm:$0xff] %v7219_v33  ;;  %v7152_v32 = vpop.permute.xlu0 %7151 }
 0x909   : > { %v7187_v39 = vsel %vm199_vm1, %v10908_v24, %v7152_v32 }
 0x90a   : > { %v6950_v10 = vsel %vm6934_vm11, 0.0, %v6918_v54  ;;  %v7204_v26 = vsel %vm7191_vm14, %v7187_v39, %v7091_v29 }
 0x90b   : > { %v6982_v59 = vsel %vm6966_vm12, %v6950_v10, 0.0  ;;  %v7221_v50 = vsel %vm7208_vm15, %v7204_v26, 0.0 }
 0x90c   : > { %v7073_v63 = vrot.slane %v6982_v59, 4  ;;  %7237 = vst [vmem:[%s10446_s28 + $0x60] sm:$0xff] %v7221_v50  ;;  %v7156_v46 = vpop.permute.xlu0 %7155 }
 0x90d   : > { %v7189_v58 = vsel %vm199_vm1, %v10909_v30, %v7156_v46 }
 0x90e   : > { %v7074_v44 = vadd.f32 %v7073_v63, %v6982_v59  ;;  %v7206_v15 = vsel %vm7191_vm14, %v7189_v58, %v7093_v60 }
 0x90f   : > { %v7223_v12 = vsel %vm7208_vm15, %v7206_v15, 0.0 }
 0x910   : > { %v7075_v27 = vrot.slane %v7074_v44, 2  ;;  %7239 = vst [vmem:[%s10446_s28 + $0x70] sm:$0xff] %v7223_v12 }
 0x912   : > { %v7076_v11 = vadd.f32 %v7075_v27, %v7074_v44 }
 0x914   : > { %v7077_v56 = vrot.slane %v7076_v11, 1 }
 0x916   : > { %v7078_v37 = vadd.f32 %v7077_v56, %v7076_v11 }
 0x918   : > { %v7094_v62 = vmul.f32 0.125, %v7078_v37 }
 0x91a   : > { %v7207_v17 = vsel %vm7191_vm14, %v7190_v51, %v7094_v62 }
 0x91b   : > { %v7224_v25 = vsel %vm7208_vm15, %v7207_v17, 0.0 }
 0x91c   : > { %7240 = vst [vmem:[%s10446_s28 + $0x78] sm:$0xff] %v7224_v25 }
 0x91d   : > { %8539 = shalt.err (!%p8536_p7)
}
 0x91e   : > { %s8540_s23 = scalar_lea.hbm %s10623_s20, 2048  ;;  %s8544_s15 = scalar_lea.hbm %s10675_s2, 4096 }
 0x91f   : > { %p8541_p9 = scmp.ne.s32.totalorder %s10623_s20, %s8540_s23  ;;  %p8545_p5 = scmp.lt.u32.totalorder %s10623_s20, %s10675_s2 }
 0x920   : > { %p8546_p2 = scmp.lt.u32.totalorder %s8544_s15, %s8540_s23  ;;  %p8548_p4 = scmp.lt.u32.totalorder %s8540_s23, %s10623_s20 }
 0x921   : > { %p8542_p1 = pnand %p8541_p9, %p8720_p12 }
 0x922   : > { %p8547_p11 = por %p8546_p2, %p8545_p5 }
 0x923   : > { %p8543_p0 = pneg %p8542_p1 }
 0x924   : > { %p8549_p6 = por %p8548_p4, %p8547_p11 }
 0x926   : > { %p8550_p8 = pnand %p8549_p6, %p8543_p0 }
 0x928   : > { %8553 = shalt.err (!%p8550_p8)
}
 0x929   : > { %s8610_s22 = smov 128  }
 0x92a   : > { %8135 = dma.vmem_to_hbm [thread:$0]  (%p8720_p12), %s10626_s3, 2048, %s10623_s20, %s7242_s13, %s8610_s22, %s8610_s22, %s8607_s27  }
 0x92b PF: > { %s7270_s28 = sand.u32 1, %s8584_s9   ;;  %p10911_p10 = scmp.ne.s32.totalorder %s10740_s16, 0 }
 0x92c   : > { %p10912_p13 = scmp.ge.s32.totalorder %s8596_s12, 2  ;;  %s7271_s30 = scalar_lea.sflag [#allocation4], %s7270_s28 }
 0x92e   : > { %p8146_p3 = pnand %p10912_p13, %p10911_p10 }
 0x930   : > { %8579 = dma.done.wait (!%p8146_p3), %s7271_s30, 2048  }
 0x931   : > { %8581 = vsyncadd (!%p8146_p3), %s7271_s30, 4294965248  ;;  %p16_p7 = scmp.ge.s32.totalorder %s8682_s21, 4   ;;  %s10913_s9 = smov %s8588_s10 }
 0x932   : > { %s10914_s10 = smov %s8592_s11  ;;  %s10915_s11 = smov %s8716_s8 }
 0x933   : > { %s10916_s12 = smov %s8682_s21  ;;  %18 = sbr.rel (!%p16_p7) target bundleno = 6 (0x6), region = 78 }
 0x93a   :  { %7276 = vsyncpa [#allocation3], 1 }
 0x93b   :  { %7278 = vsyncpa [#allocation3 + $0x1], 1 }
 0x93c   :  { %7279 = vsyncpa [#allocation6], 1 }
 0x93d   :  { %7281 = vsyncpa [#allocation6 + $0x1], 1 }
 0x93e   :  { %7282 = vsyncpa [#allocation4], 1 }
 0x93f   :  { %7284 = vsyncpa [#allocation4 + $0x1], 1 }

</bundles_post_ra>
